<compile_context>
chip_gen: v5e
topology: v5e:2x2
jax: 0.10.0
libtpu: 0.0.40
codegen_flags: <defaults>
</compile_context>

<pallas_src>
import functools
import math

import jax
import jax.numpy as jnp
from jax.experimental import pallas as pl
from jax.experimental.pallas import tpu as pltpu


# Set to jnp.bfloat16 on v6e/v7x for higher MXU throughput (re-validate
# tolerances); jnp.float32 keeps the small demo comparable to the reference.
MATMUL_DTYPE = jnp.float32


# ---------------------------------------------------------------------------
# Small helpers
# ---------------------------------------------------------------------------

def _gelu_tanh(x):
    # tanh-approximate GELU (EUP tanh). PyTorch's exact-erf GELU differs by
    # ~1e-3; the pure-JAX reference below uses the same formula.
    c = math.sqrt(2.0 / math.pi)
    return 0.5 * x * (1.0 + jnp.tanh(c * (x + 0.044715 * x * x * x)))


def _mm(a, b):
    # MXU matmul with f32 accumulation; operands optionally narrowed to bf16.
    return jnp.dot(a.astype(MATMUL_DTYPE), b.astype(MATMUL_DTYPE),
                   preferred_element_type=jnp.float32)


def _layer_norm(x, g, b, eps):
    mu = jnp.mean(x, axis=-1, keepdims=True)
    xc = x - mu
    var = jnp.mean(xc * xc, axis=-1, keepdims=True)
    return xc * jax.lax.rsqrt(var + eps) * g + b


def _row_tile(m, tm=512):
    """Row tile: multiple of 8, capped so the parallel grid has >=2 steps."""
    half = -(-m // 2)                # cdiv(m, 2)
    half = -(-half // 8) * 8         # round up to a multiple of 8
    return max(8, min(tm, half))


def _const_spec(shape):
    rank = len(shape)
    return pl.BlockSpec(shape, lambda *_: (0,) * rank)


# ---------------------------------------------------------------------------
# Kernels
# ---------------------------------------------------------------------------

def _attn_block_kernel(h_ref, g1_ref, b1_ref, wqkv_ref, bqkv_ref,
                       wo_ref, bo_ref, o_ref, *, num_heads, scale, eps):
    """One batch element per grid step: LN1 -> QKV -> MHSA -> Wo -> +residual."""
    h = h_ref[...].astype(jnp.float32)                         # (T, D)
    T, D = h.shape
    dh = D // num_heads

    y = _layer_norm(h, g1_ref[...].astype(jnp.float32),
                    b1_ref[...].astype(jnp.float32), eps)
    qkv = _mm(y, wqkv_ref[...]) + bqkv_ref[...].astype(jnp.float32)   # (T, 3D)

    head_outs = []
    for hd in range(num_heads):                                # static unroll
        q = qkv[:, hd * dh:(hd + 1) * dh]
        k = qkv[:, D + hd * dh:D + (hd + 1) * dh]
        v = qkv[:, 2 * D + hd * dh:2 * D + (hd + 1) * dh]
        s = jax.lax.dot_general(q, k, (((1,), (1,)), ((), ())),
                                preferred_element_type=jnp.float32) * scale
        s = s - jnp.max(s, axis=-1, keepdims=True)
        p = jnp.exp(s)
        p = p * pl.reciprocal(jnp.sum(p, axis=-1, keepdims=True), approx=True)
        head_outs.append(jnp.dot(p, v, preferred_element_type=jnp.float32))
    att = jnp.concatenate(head_outs, axis=-1)                  # (T, D)

    out = _mm(att, wo_ref[...]) + bo_ref[...].astype(jnp.float32) + h
    o_ref[...] = out.astype(o_ref.dtype)


def _ffn_block_kernel(x_ref, g2_ref, b2_ref, w1_ref, b1_ref,
                      w2_ref, b2b_ref, o_ref, *, eps):
    """Row tile: LN2 -> GELU(x@W1+b1) -> @W2+b2 -> +residual."""
    h = x_ref[...].astype(jnp.float32)                         # (tm, D)
    y = _layer_norm(h, g2_ref[...].astype(jnp.float32),
                    b2_ref[...].astype(jnp.float32), eps)
    f = _gelu_tanh(_mm(y, w1_ref[...]) + b1_ref[...].astype(jnp.float32))
    out = _mm(f, w2_ref[...]) + b2b_ref[...].astype(jnp.float32) + h
    o_ref[...] = out.astype(o_ref.dtype)


def _layernorm_kernel(x_ref, g_ref, b_ref, o_ref, *, eps):
    x = x_ref[...].astype(jnp.float32)
    o_ref[...] = _layer_norm(x, g_ref[...].astype(jnp.float32),
                             b_ref[...].astype(jnp.float32), eps).astype(o_ref.dtype)


# ---------------------------------------------------------------------------
# Pallas wrappers
# ---------------------------------------------------------------------------

def attention_module(h, blk, *, num_heads, eps):
    B, T, D = h.shape
    dh = D // num_heads
    scale = 1.0 / math.sqrt(dh)
    kern = functools.partial(_attn_block_kernel, num_heads=num_heads,
                             scale=scale, eps=eps)
    row_spec = pl.BlockSpec((None, T, D), lambda b: (b, 0, 0))
    return pl.pallas_call(
        kern,
        out_shape=jax.ShapeDtypeStruct((B, T, D), h.dtype),
        grid_spec=pl.GridSpec(
            grid=(B,),
            in_specs=[
                row_spec,                       # h rows for this batch
                _const_spec((1, D)),            # ln1 gamma
                _const_spec((1, D)),            # ln1 beta
                _const_spec((D, 3 * D)),        # fused QKV weight (resident)
                _const_spec((1, 3 * D)),        # fused QKV bias
                _const_spec((D, D)),            # output projection weight
                _const_spec((1, D)),            # output projection bias
            ],
            out_specs=row_spec,
        ),
        compiler_params=pltpu.CompilerParams(dimension_semantics=("parallel",)),
    )(h, blk["ln1_g"], blk["ln1_b"], blk["w_qkv"], blk["b_qkv"],
      blk["w_o"], blk["b_o"])


def ffn_module(h, blk, *, eps, tm=512):
    B, T, D = h.shape
    M = B * T
    ff = blk["w1"].shape[1]
    x2 = h.reshape(M, D)                       # contiguous reshape (free)
    tm = _row_tile(M, tm)
    M_pad = pl.cdiv(M, tm) * tm
    if M_pad != M:
        x2 = jnp.pad(x2, ((0, M_pad - M), (0, 0)))
    out = pl.pallas_call(
        functools.partial(_ffn_block_kernel, eps=eps),
        out_shape=jax.ShapeDtypeStruct((M_pad, D), h.dtype),
        grid_spec=pl.GridSpec(
            grid=(M_pad // tm,),
            in_specs=[
                pl.BlockSpec((tm, D), lambda i: (i, 0)),   # streamed rows
                _const_spec((1, D)),                       # ln2 gamma
                _const_spec((1, D)),                       # ln2 beta
                _const_spec((D, ff)),                      # W1 (resident)
                _const_spec((1, ff)),                      # b1
                _const_spec((ff, D)),                      # W2 (resident)
                _const_spec((1, D)),                       # b2
            ],
            out_specs=pl.BlockSpec((tm, D), lambda i: (i, 0)),
        ),
        compiler_params=pltpu.CompilerParams(dimension_semantics=("parallel",)),
    )(x2, blk["ln2_g"], blk["ln2_b"], blk["w1"], blk["b1"],
      blk["w2"], blk["b2"])
    return out[:M].reshape(B, T, D)


def pallas_layer_norm(x, gamma2, beta2, *, eps=1e-5, tm=512):
    B, T, D = x.shape
    M = B * T
    x2 = x.reshape(M, D)
    tm = _row_tile(M, tm)
    M_pad = pl.cdiv(M, tm) * tm
    if M_pad != M:
        x2 = jnp.pad(x2, ((0, M_pad - M), (0, 0)))
    out = pl.pallas_call(
        functools.partial(_layernorm_kernel, eps=eps),
        out_shape=jax.ShapeDtypeStruct((M_pad, D), x.dtype),
        grid_spec=pl.GridSpec(
            grid=(M_pad // tm,),
            in_specs=[
                pl.BlockSpec((tm, D), lambda i: (i, 0)),
                _const_spec((1, D)),
                _const_spec((1, D)),
            ],
            out_specs=pl.BlockSpec((tm, D), lambda i: (i, 0)),
        ),
        compiler_params=pltpu.CompilerParams(dimension_semantics=("parallel",)),
    )(x2, gamma2, beta2)
    return out[:M].reshape(B, T, D)


# ---------------------------------------------------------------------------
# Transformer forward (pre-norm)
# ---------------------------------------------------------------------------

def transformer_forward(x, params, *, num_heads, eps=1e-5):
    # pos_embedding=None and mask=None in this configuration; nn.Dropout is
    # identity at inference.
    # TODO(synk): train-mode dropout (stochastic masking) is not implemented.
    h = x
    for blk in params["blocks"]:
        h = attention_module(h, blk, num_heads=num_heads, eps=eps)
        h = ffn_module(h, blk, eps=eps)
    return pallas_layer_norm(h, params["ln_f_g"], params["ln_f_b"], eps=eps)


# ---------------------------------------------------------------------------
# One-time parameter preparation (2-D biases / LN params; no per-call copies)
# ---------------------------------------------------------------------------

def prepare_params(params):
    def prep_block(b):
        nb = dict(b)
        for k in ("ln1_g", "ln1_b", "b_qkv", "b_o", "ln2_g", "ln2_b", "b1", "b2"):
            nb[k] = b[k].reshape(1, -1)
        return nb
    return dict(blocks=[prep_block(b) for b in params["blocks"]],
                ln_f_g=params["ln_f_g"].reshape(1, -1),
                ln_f_b=params["ln_f_b"].reshape(1, -1))


# ---------------------------------------------------------------------------
# Pure-JAX reference (same math, XLA ops)
# ---------------------------------------------------------------------------

def _reference(x, params, *, num_heads, eps=1e-5):
    hp = jax.lax.Precision.HIGHEST
    B, T, D = x.shape
    dh = D // num_heads

    def ln(z, g, b):
        mu = jnp.mean(z, axis=-1, keepdims=True)
        var = jnp.mean((z - mu) ** 2, axis=-1, keepdims=True)
        return (z - mu) * jax.lax.rsqrt(var + eps) * g + b

    h = x
    for blk in params["blocks"]:
        y = ln(h, blk["ln1_g"], blk["ln1_b"])
        qkv = jnp.einsum("btd,de->bte", y, blk["w_qkv"], precision=hp) + blk["b_qkv"]
        q, k, v = jnp.split(qkv, 3, axis=-1)

        def heads(z):
            return z.reshape(B, T, num_heads, dh).transpose(0, 2, 1, 3)

        qh, kh, vh = heads(q), heads(k), heads(v)
        s = jnp.einsum("bhqd,bhkd->bhqk", qh, kh, precision=hp) / math.sqrt(dh)
        p = jax.nn.softmax(s, axis=-1)
        att = jnp.einsum("bhqk,bhkd->bhqd", p, vh, precision=hp)
        att = att.transpose(0, 2, 1, 3).reshape(B, T, D)
        o = jnp.einsum("btd,de->bte", att, blk["w_o"], precision=hp) + blk["b_o"]
        h = h + o

        y = ln(h, blk["ln2_g"], blk["ln2_b"])
        f = _gelu_tanh(jnp.einsum("btd,df->btf", y, blk["w1"], precision=hp) + blk["b1"])
        f = jnp.einsum("btf,fd->btd", f, blk["w2"], precision=hp) + blk["b2"]
        h = h + f
    return ln(h, params["ln_f_g"], params["ln_f_b"])


# ---------------------------------------------------------------------------
# Parameter init (weight_init='normal_02', bias_init='zeros')
# ---------------------------------------------------------------------------

def init_params(key, *, dim_model, num_blocks, ff_ratio):
    ff = dim_model * ff_ratio

    def normal02(k, shape):
        return 0.02 * jax.random.normal(k, shape, dtype=jnp.float32)

    blocks = []
    for _ in range(num_blocks):
        key, kqkv, ko, k1, k2 = jax.random.split(key, 5)
        blocks.append(dict(
            ln1_g=jnp.ones((dim_model,), jnp.float32),
            ln1_b=jnp.zeros((dim_model,), jnp.float32),
            w_qkv=normal02(kqkv, (dim_model, 3 * dim_model)),
            b_qkv=jnp.zeros((3 * dim_model,), jnp.float32),
            w_o=normal02(ko, (dim_model, dim_model)),
            b_o=jnp.zeros((dim_model,), jnp.float32),
            ln2_g=jnp.ones((dim_model,), jnp.float32),
            ln2_b=jnp.zeros((dim_model,), jnp.float32),
            w1=normal02(k1, (dim_model, ff)),
            b1=jnp.zeros((ff,), jnp.float32),
            w2=normal02(k2, (ff, dim_model)),
            b2=jnp.zeros((dim_model,), jnp.float32),
        ))
    params = dict(blocks=blocks,
                  ln_f_g=jnp.ones((dim_model,), jnp.float32),
                  ln_f_b=jnp.zeros((dim_model,), jnp.float32))
    return params, key


if __name__ == "__main__":
    key = jax.random.PRNGKey(0)

    B, T = 2, 8
    dim_model, num_blocks, num_heads, ff_ratio = 128, 2, 4, 4

    params, key = init_params(key, dim_model=dim_model,
                              num_blocks=num_blocks, ff_ratio=ff_ratio)
    prepped = prepare_params(params)          # one-time layout prep

    key, kx = jax.random.split(key)
    x = jax.random.normal(kx, (B, T, dim_model), dtype=jnp.float32)

    fwd = jax.jit(functools.partial(transformer_forward, num_heads=num_heads))
    out = jax.block_until_ready(fwd(x, prepped))

    ref = _reference(x, params, num_heads=num_heads)
    assert out.shape == (B, T, dim_model), out.shape
    assert jnp.allclose(out, ref, atol=5e-3, rtol=5e-3), (
        "max abs diff = %g" % float(jnp.max(jnp.abs(out - ref))))

    print("KERNEL_OK")
</pallas_src>

<mosaic_0001>
module attributes {stable_mosaic.version = 11 : i64} {
  func.func @_ffn_block_kernel(%arg0: i32, %arg1: memref<8x128xf32, #tpu.memory_space<vmem>>, %arg2: memref<1x128xf32, #tpu.memory_space<vmem>>, %arg3: memref<1x128xf32, #tpu.memory_space<vmem>>, %arg4: memref<128x512xf32, #tpu.memory_space<vmem>>, %arg5: memref<1x512xf32, #tpu.memory_space<vmem>>, %arg6: memref<512x128xf32, #tpu.memory_space<vmem>>, %arg7: memref<1x128xf32, #tpu.memory_space<vmem>>, %arg8: memref<8x128xf32, #tpu.memory_space<vmem>>) attributes {dimension_semantics = [#tpu.dimension_semantics<parallel>], iteration_bounds = array<i64: 2>, scalar_prefetch = 0 : i64, scratch_operands = 0 : i64, tpu.core_type = #tpu.core_type<tc>, window_params = [{transform_indices = @transform_0, window_bounds = array<i64: 8, 128>}, {pipeline_mode = #tpu.pipeline_mode<synchronous>, transform_indices = @transform_1, window_bounds = array<i64: 1, 128>}, {pipeline_mode = #tpu.pipeline_mode<synchronous>, transform_indices = @transform_2, window_bounds = array<i64: 1, 128>}, {pipeline_mode = #tpu.pipeline_mode<synchronous>, transform_indices = @transform_3, window_bounds = array<i64: 128, 512>}, {pipeline_mode = #tpu.pipeline_mode<synchronous>, transform_indices = @transform_4, window_bounds = array<i64: 1, 512>}, {pipeline_mode = #tpu.pipeline_mode<synchronous>, transform_indices = @transform_5, window_bounds = array<i64: 512, 128>}, {pipeline_mode = #tpu.pipeline_mode<synchronous>, transform_indices = @transform_6, window_bounds = array<i64: 1, 128>}, {transform_indices = @transform_7, window_bounds = array<i64: 8, 128>}]} {
    %c0 = arith.constant 0 : index
    %c0_0 = arith.constant 0 : index
    %0 = vector.load %arg1[%c0, %c0_0] : memref<8x128xf32, #tpu.memory_space<vmem>>, vector<8x128xf32>
    %c0_1 = arith.constant 0 : index
    %c0_2 = arith.constant 0 : index
    %1 = vector.load %arg2[%c0_1, %c0_2] : memref<1x128xf32, #tpu.memory_space<vmem>>, vector<1x128xf32>
    %c0_3 = arith.constant 0 : index
    %c0_4 = arith.constant 0 : index
    %2 = vector.load %arg3[%c0_3, %c0_4] : memref<1x128xf32, #tpu.memory_space<vmem>>, vector<1x128xf32>
    %cst = arith.constant dense<0.000000e+00> : vector<8xf32>
    %3 = vector.multi_reduction <add>, %0, %cst [1] : vector<8x128xf32> to vector<8xf32>
    %4 = vector.shape_cast %3 : vector<8xf32> to vector<8x1xf32>
    %cst_5 = arith.constant 1.280000e+02 : f32
    %5 = vector.broadcast %cst_5 : f32 to vector<8x1xf32>
    %6 = arith.divf %4, %5 : vector<8x1xf32>
    %7 = vector.broadcast %6 : vector<8x1xf32> to vector<8x128xf32>
    %8 = arith.subf %0, %7 : vector<8x128xf32>
    %9 = arith.mulf %8, %8 : vector<8x128xf32>
    %cst_6 = arith.constant dense<0.000000e+00> : vector<8xf32>
    %10 = vector.multi_reduction <add>, %9, %cst_6 [1] : vector<8x128xf32> to vector<8xf32>
    %11 = vector.shape_cast %10 : vector<8xf32> to vector<8x1xf32>
    %cst_7 = arith.constant 1.280000e+02 : f32
    %12 = vector.broadcast %cst_7 : f32 to vector<8x1xf32>
    %13 = arith.divf %11, %12 : vector<8x1xf32>
    %cst_8 = arith.constant 9.99999974E-6 : f32
    %14 = vector.broadcast %cst_8 : f32 to vector<8x1xf32>
    %15 = arith.addf %13, %14 : vector<8x1xf32>
    %16 = math.rsqrt %15 : vector<8x1xf32>
    %17 = vector.broadcast %16 : vector<8x1xf32> to vector<8x128xf32>
    %18 = arith.mulf %8, %17 : vector<8x128xf32>
    %19 = vector.broadcast %1 : vector<1x128xf32> to vector<8x128xf32>
    %20 = arith.mulf %18, %19 : vector<8x128xf32>
    %21 = vector.broadcast %2 : vector<1x128xf32> to vector<8x128xf32>
    %22 = arith.addf %20, %21 : vector<8x128xf32>
    %c0_9 = arith.constant 0 : index
    %c0_10 = arith.constant 0 : index
    %23 = vector.load %arg4[%c0_9, %c0_10] : memref<128x512xf32, #tpu.memory_space<vmem>>, vector<128x512xf32>
    %cst_11 = arith.constant dense<0.000000e+00> : vector<8x512xf32>
    %24 = tpu.matmul %22, %23, %cst_11 {dimension_numbers = #tpu.dot_dimension_numbers<[1], [0], [0], [1], [0, 0, 1, 1], [], []>} : vector<8x128xf32>, vector<128x512xf32>, vector<8x512xf32> -> vector<8x512xf32>
    %c0_12 = arith.constant 0 : index
    %c0_13 = arith.constant 0 : index
    %25 = vector.load %arg5[%c0_12, %c0_13] : memref<1x512xf32, #tpu.memory_space<vmem>>, vector<1x512xf32>
    %26 = vector.broadcast %25 : vector<1x512xf32> to vector<8x512xf32>
    %27 = arith.addf %24, %26 : vector<8x512xf32>
    %cst_14 = arith.constant 5.000000e-01 : f32
    %28 = vector.broadcast %cst_14 : f32 to vector<8x512xf32>
    %29 = arith.mulf %28, %27 : vector<8x512xf32>
    %cst_15 = arith.constant 4.471500e-02 : f32
    %30 = vector.broadcast %cst_15 : f32 to vector<8x512xf32>
    %31 = arith.mulf %30, %27 : vector<8x512xf32>
    %32 = arith.mulf %31, %27 : vector<8x512xf32>
    %33 = arith.mulf %32, %27 : vector<8x512xf32>
    %34 = arith.addf %27, %33 : vector<8x512xf32>
    %cst_16 = arith.constant 0.797884583 : f32
    %35 = vector.broadcast %cst_16 : f32 to vector<8x512xf32>
    %36 = arith.mulf %35, %34 : vector<8x512xf32>
    %37 = math.tanh %36 : vector<8x512xf32>
    %cst_17 = arith.constant 1.000000e+00 : f32
    %38 = vector.broadcast %cst_17 : f32 to vector<8x512xf32>
    %39 = arith.addf %38, %37 : vector<8x512xf32>
    %40 = arith.mulf %29, %39 : vector<8x512xf32>
    %c0_18 = arith.constant 0 : index
    %c0_19 = arith.constant 0 : index
    %41 = vector.load %arg6[%c0_18, %c0_19] : memref<512x128xf32, #tpu.memory_space<vmem>>, vector<512x128xf32>
    %cst_20 = arith.constant dense<0.000000e+00> : vector<8x128xf32>
    %42 = tpu.matmul %40, %41, %cst_20 {dimension_numbers = #tpu.dot_dimension_numbers<[1], [0], [0], [1], [0, 0, 1, 1], [], []>} : vector<8x512xf32>, vector<512x128xf32>, vector<8x128xf32> -> vector<8x128xf32>
    %c0_21 = arith.constant 0 : index
    %c0_22 = arith.constant 0 : index
    %43 = vector.load %arg7[%c0_21, %c0_22] : memref<1x128xf32, #tpu.memory_space<vmem>>, vector<1x128xf32>
    %44 = vector.broadcast %43 : vector<1x128xf32> to vector<8x128xf32>
    %45 = arith.addf %42, %44 : vector<8x128xf32>
    %46 = arith.addf %45, %0 : vector<8x128xf32>
    %c0_23 = arith.constant 0 : index
    %c0_24 = arith.constant 0 : index
    %47 = vector.load %arg8[%c0_23, %c0_24] : memref<8x128xf32, #tpu.memory_space<vmem>>, vector<8x128xf32>
    tpu.vector_store %arg8[%c0_23, %c0_24], %46 {strides = array<i32>} : memref<8x128xf32, #tpu.memory_space<vmem>>, vector<8x128xf32>,
    return
  }
  func.func @transform_0(%arg0: i32) -> (i32, i32) {
    %c0_i32 = arith.constant 0 : i32
    %c0_i32_0 = arith.constant 0 : i32
    return %arg0, %c0_i32 : i32, i32
  }
  func.func @transform_1(%arg0: i32) -> (i32, i32) {
    %c0_i32 = arith.constant 0 : i32
    %c0_i32_0 = arith.constant 0 : i32
    %c0_i32_1 = arith.constant 0 : i32
    return %c0_i32, %c0_i32_0 : i32, i32
  }
  func.func @transform_2(%arg0: i32) -> (i32, i32) {
    %c0_i32 = arith.constant 0 : i32
    %c0_i32_0 = arith.constant 0 : i32
    %c0_i32_1 = arith.constant 0 : i32
    return %c0_i32, %c0_i32_0 : i32, i32
  }
  func.func @transform_3(%arg0: i32) -> (i32, i32) {
    %c0_i32 = arith.constant 0 : i32
    %c0_i32_0 = arith.constant 0 : i32
    %c0_i32_1 = arith.constant 0 : i32
    return %c0_i32, %c0_i32_0 : i32, i32
  }
  func.func @transform_4(%arg0: i32) -> (i32, i32) {
    %c0_i32 = arith.constant 0 : i32
    %c0_i32_0 = arith.constant 0 : i32
    %c0_i32_1 = arith.constant 0 : i32
    return %c0_i32, %c0_i32_0 : i32, i32
  }
  func.func @transform_5(%arg0: i32) -> (i32, i32) {
    %c0_i32 = arith.constant 0 : i32
    %c0_i32_0 = arith.constant 0 : i32
    %c0_i32_1 = arith.constant 0 : i32
    return %c0_i32, %c0_i32_0 : i32, i32
  }
  func.func @transform_6(%arg0: i32) -> (i32, i32) {
    %c0_i32 = arith.constant 0 : i32
    %c0_i32_0 = arith.constant 0 : i32
    %c0_i32_1 = arith.constant 0 : i32
    return %c0_i32, %c0_i32_0 : i32, i32
  }
  func.func @transform_7(%arg0: i32) -> (i32, i32) {
    %c0_i32 = arith.constant 0 : i32
    %c0_i32_0 = arith.constant 0 : i32
    return %arg0, %c0_i32 : i32, i32
  }
}

module attributes {stable_mosaic.version = 11 : i64} {
  func.func @_ffn_block_kernel(%arg0: i32, %arg1: memref<8x128xf32, #tpu.memory_space<vmem>>, %arg2: memref<1x128xf32, #tpu.memory_space<vmem>>, %arg3: memref<1x128xf32, #tpu.memory_space<vmem>>, %arg4: memref<128x512xf32, #tpu.memory_space<vmem>>, %arg5: memref<1x512xf32, #tpu.memory_space<vmem>>, %arg6: memref<512x128xf32, #tpu.memory_space<vmem>>, %arg7: memref<1x128xf32, #tpu.memory_space<vmem>>, %arg8: memref<8x128xf32, #tpu.memory_space<vmem>>) attributes {dimension_semantics = [#tpu.dimension_semantics<parallel>], iteration_bounds = array<i64: 2>, scalar_prefetch = 0 : i64, scratch_operands = 0 : i64, tpu.core_type = #tpu.core_type<tc>, window_params = [{transform_indices = @transform_0, window_bounds = array<i64: 8, 128>}, {pipeline_mode = #tpu.pipeline_mode<synchronous>, transform_indices = @transform_1, window_bounds = array<i64: 1, 128>}, {pipeline_mode = #tpu.pipeline_mode<synchronous>, transform_indices = @transform_2, window_bounds = array<i64: 1, 128>}, {pipeline_mode = #tpu.pipeline_mode<synchronous>, transform_indices = @transform_3, window_bounds = array<i64: 128, 512>}, {pipeline_mode = #tpu.pipeline_mode<synchronous>, transform_indices = @transform_4, window_bounds = array<i64: 1, 512>}, {pipeline_mode = #tpu.pipeline_mode<synchronous>, transform_indices = @transform_5, window_bounds = array<i64: 512, 128>}, {pipeline_mode = #tpu.pipeline_mode<synchronous>, transform_indices = @transform_6, window_bounds = array<i64: 1, 128>}, {transform_indices = @transform_7, window_bounds = array<i64: 8, 128>}]} {
    %c0 = arith.constant 0 : index
    %c0_0 = arith.constant 0 : index
    %0 = vector.load %arg1[%c0, %c0_0] : memref<8x128xf32, #tpu.memory_space<vmem>>, vector<8x128xf32>
    %c0_1 = arith.constant 0 : index
    %c0_2 = arith.constant 0 : index
    %1 = vector.load %arg2[%c0_1, %c0_2] : memref<1x128xf32, #tpu.memory_space<vmem>>, vector<1x128xf32>
    %c0_3 = arith.constant 0 : index
    %c0_4 = arith.constant 0 : index
    %2 = vector.load %arg3[%c0_3, %c0_4] : memref<1x128xf32, #tpu.memory_space<vmem>>, vector<1x128xf32>
    %cst = arith.constant dense<0.000000e+00> : vector<8xf32>
    %3 = vector.multi_reduction <add>, %0, %cst [1] : vector<8x128xf32> to vector<8xf32>
    %4 = vector.shape_cast %3 : vector<8xf32> to vector<8x1xf32>
    %cst_5 = arith.constant 1.280000e+02 : f32
    %5 = vector.broadcast %cst_5 : f32 to vector<8x1xf32>
    %6 = arith.divf %4, %5 : vector<8x1xf32>
    %7 = vector.broadcast %6 : vector<8x1xf32> to vector<8x128xf32>
    %8 = arith.subf %0, %7 : vector<8x128xf32>
    %9 = arith.mulf %8, %8 : vector<8x128xf32>
    %cst_6 = arith.constant dense<0.000000e+00> : vector<8xf32>
    %10 = vector.multi_reduction <add>, %9, %cst_6 [1] : vector<8x128xf32> to vector<8xf32>
    %11 = vector.shape_cast %10 : vector<8xf32> to vector<8x1xf32>
    %cst_7 = arith.constant 1.280000e+02 : f32
    %12 = vector.broadcast %cst_7 : f32 to vector<8x1xf32>
    %13 = arith.divf %11, %12 : vector<8x1xf32>
    %cst_8 = arith.constant 9.99999974E-6 : f32
    %14 = vector.broadcast %cst_8 : f32 to vector<8x1xf32>
    %15 = arith.addf %13, %14 : vector<8x1xf32>
    %16 = math.rsqrt %15 : vector<8x1xf32>
    %17 = vector.broadcast %16 : vector<8x1xf32> to vector<8x128xf32>
    %18 = arith.mulf %8, %17 : vector<8x128xf32>
    %19 = vector.broadcast %1 : vector<1x128xf32> to vector<8x128xf32>
    %20 = arith.mulf %18, %19 : vector<8x128xf32>
    %21 = vector.broadcast %2 : vector<1x128xf32> to vector<8x128xf32>
    %22 = arith.addf %20, %21 : vector<8x128xf32>
    %c0_9 = arith.constant 0 : index
    %c0_10 = arith.constant 0 : index
    %23 = vector.load %arg4[%c0_9, %c0_10] : memref<128x512xf32, #tpu.memory_space<vmem>>, vector<128x512xf32>
    %cst_11 = arith.constant dense<0.000000e+00> : vector<8x512xf32>
    %24 = tpu.matmul %22, %23, %cst_11 {dimension_numbers = #tpu.dot_dimension_numbers<[1], [0], [0], [1], [0, 0, 1, 1], [], []>} : vector<8x128xf32>, vector<128x512xf32>, vector<8x512xf32> -> vector<8x512xf32>
    %c0_12 = arith.constant 0 : index
    %c0_13 = arith.constant 0 : index
    %25 = vector.load %arg5[%c0_12, %c0_13] : memref<1x512xf32, #tpu.memory_space<vmem>>, vector<1x512xf32>
    %26 = vector.broadcast %25 : vector<1x512xf32> to vector<8x512xf32>
    %27 = arith.addf %24, %26 : vector<8x512xf32>
    %cst_14 = arith.constant 5.000000e-01 : f32
    %28 = vector.broadcast %cst_14 : f32 to vector<8x512xf32>
    %29 = arith.mulf %28, %27 : vector<8x512xf32>
    %cst_15 = arith.constant 4.471500e-02 : f32
    %30 = vector.broadcast %cst_15 : f32 to vector<8x512xf32>
    %31 = arith.mulf %30, %27 : vector<8x512xf32>
    %32 = arith.mulf %31, %27 : vector<8x512xf32>
    %33 = arith.mulf %32, %27 : vector<8x512xf32>
    %34 = arith.addf %27, %33 : vector<8x512xf32>
    %cst_16 = arith.constant 0.797884583 : f32
    %35 = vector.broadcast %cst_16 : f32 to vector<8x512xf32>
    %36 = arith.mulf %35, %34 : vector<8x512xf32>
    %37 = math.tanh %36 : vector<8x512xf32>
    %cst_17 = arith.constant 1.000000e+00 : f32
    %38 = vector.broadcast %cst_17 : f32 to vector<8x512xf32>
    %39 = arith.addf %38, %37 : vector<8x512xf32>
    %40 = arith.mulf %29, %39 : vector<8x512xf32>
    %c0_18 = arith.constant 0 : index
    %c0_19 = arith.constant 0 : index
    %41 = vector.load %arg6[%c0_18, %c0_19] : memref<512x128xf32, #tpu.memory_space<vmem>>, vector<512x128xf32>
    %cst_20 = arith.constant dense<0.000000e+00> : vector<8x128xf32>
    %42 = tpu.matmul %40, %41, %cst_20 {dimension_numbers = #tpu.dot_dimension_numbers<[1], [0], [0], [1], [0, 0, 1, 1], [], []>} : vector<8x512xf32>, vector<512x128xf32>, vector<8x128xf32> -> vector<8x128xf32>
    %c0_21 = arith.constant 0 : index
    %c0_22 = arith.constant 0 : index
    %43 = vector.load %arg7[%c0_21, %c0_22] : memref<1x128xf32, #tpu.memory_space<vmem>>, vector<1x128xf32>
    %44 = vector.broadcast %43 : vector<1x128xf32> to vector<8x128xf32>
    %45 = arith.addf %42, %44 : vector<8x128xf32>
    %46 = arith.addf %45, %0 : vector<8x128xf32>
    %c0_23 = arith.constant 0 : index
    %c0_24 = arith.constant 0 : index
    %47 = vector.load %arg8[%c0_23, %c0_24] : memref<8x128xf32, #tpu.memory_space<vmem>>, vector<8x128xf32>
    tpu.vector_store %arg8[%c0_23, %c0_24], %46 {strides = array<i32>} : memref<8x128xf32, #tpu.memory_space<vmem>>, vector<8x128xf32>,
    return
  }
  func.func @transform_0(%arg0: i32) -> (i32, i32) {
    %c0_i32 = arith.constant 0 : i32
    %c0_i32_0 = arith.constant 0 : i32
    return %arg0, %c0_i32 : i32, i32
  }
  func.func @transform_1(%arg0: i32) -> (i32, i32) {
    %c0_i32 = arith.constant 0 : i32
    %c0_i32_0 = arith.constant 0 : i32
    %c0_i32_1 = arith.constant 0 : i32
    return %c0_i32, %c0_i32_0 : i32, i32
  }
  func.func @transform_2(%arg0: i32) -> (i32, i32) {
    %c0_i32 = arith.constant 0 : i32
    %c0_i32_0 = arith.constant 0 : i32
    %c0_i32_1 = arith.constant 0 : i32
    return %c0_i32, %c0_i32_0 : i32, i32
  }
  func.func @transform_3(%arg0: i32) -> (i32, i32) {
    %c0_i32 = arith.constant 0 : i32
    %c0_i32_0 = arith.constant 0 : i32
    %c0_i32_1 = arith.constant 0 : i32
    return %c0_i32, %c0_i32_0 : i32, i32
  }
  func.func @transform_4(%arg0: i32) -> (i32, i32) {
    %c0_i32 = arith.constant 0 : i32
    %c0_i32_0 = arith.constant 0 : i32
    %c0_i32_1 = arith.constant 0 : i32
    return %c0_i32, %c0_i32_0 : i32, i32
  }
  func.func @transform_5(%arg0: i32) -> (i32, i32) {
    %c0_i32 = arith.constant 0 : i32
    %c0_i32_0 = arith.constant 0 : i32
    %c0_i32_1 = arith.constant 0 : i32
    return %c0_i32, %c0_i32_0 : i32, i32
  }
  func.func @transform_6(%arg0: i32) -> (i32, i32) {
    %c0_i32 = arith.constant 0 : i32
    %c0_i32_0 = arith.constant 0 : i32
    %c0_i32_1 = arith.constant 0 : i32
    return %c0_i32, %c0_i32_0 : i32, i32
  }
  func.func @transform_7(%arg0: i32) -> (i32, i32) {
    %c0_i32 = arith.constant 0 : i32
    %c0_i32_0 = arith.constant 0 : i32
    return %arg0, %c0_i32 : i32, i32
  }
}

module attributes {stable_mosaic.version = 11 : i64} {
  func.func @_attn_block_kernel(%arg0: i32, %arg1: memref<1x8x128xf32, #tpu.memory_space<vmem>>, %arg2: memref<1x128xf32, #tpu.memory_space<vmem>>, %arg3: memref<1x128xf32, #tpu.memory_space<vmem>>, %arg4: memref<128x384xf32, #tpu.memory_space<vmem>>, %arg5: memref<1x384xf32, #tpu.memory_space<vmem>>, %arg6: memref<128x128xf32, #tpu.memory_space<vmem>>, %arg7: memref<1x128xf32, #tpu.memory_space<vmem>>, %arg8: memref<1x8x128xf32, #tpu.memory_space<vmem>>) attributes {dimension_semantics = [#tpu.dimension_semantics<parallel>], iteration_bounds = array<i64: 2>, scalar_prefetch = 0 : i64, scratch_operands = 0 : i64, tpu.core_type = #tpu.core_type<tc>, window_params = [{transform_indices = @transform_0, window_bounds = array<i64: 1, 8, 128>}, {pipeline_mode = #tpu.pipeline_mode<synchronous>, transform_indices = @transform_1, window_bounds = array<i64: 1, 128>}, {pipeline_mode = #tpu.pipeline_mode<synchronous>, transform_indices = @transform_2, window_bounds = array<i64: 1, 128>}, {pipeline_mode = #tpu.pipeline_mode<synchronous>, transform_indices = @transform_3, window_bounds = array<i64: 128, 384>}, {pipeline_mode = #tpu.pipeline_mode<synchronous>, transform_indices = @transform_4, window_bounds = array<i64: 1, 384>}, {pipeline_mode = #tpu.pipeline_mode<synchronous>, transform_indices = @transform_5, window_bounds = array<i64: 128, 128>}, {pipeline_mode = #tpu.pipeline_mode<synchronous>, transform_indices = @transform_6, window_bounds = array<i64: 1, 128>}, {transform_indices = @transform_7, window_bounds = array<i64: 1, 8, 128>}]} {
    %c0 = arith.constant 0 : index
    %c0_0 = arith.constant 0 : index
    %c0_1 = arith.constant 0 : index
    %0 = vector.load %arg1[%c0, %c0_0, %c0_1] : memref<1x8x128xf32, #tpu.memory_space<vmem>>, vector<1x8x128xf32>
    %1 = vector.shape_cast %0 : vector<1x8x128xf32> to vector<8x128xf32>
    %c0_2 = arith.constant 0 : index
    %c0_3 = arith.constant 0 : index
    %2 = vector.load %arg2[%c0_2, %c0_3] : memref<1x128xf32, #tpu.memory_space<vmem>>, vector<1x128xf32>
    %c0_4 = arith.constant 0 : index
    %c0_5 = arith.constant 0 : index
    %3 = vector.load %arg3[%c0_4, %c0_5] : memref<1x128xf32, #tpu.memory_space<vmem>>, vector<1x128xf32>
    %cst = arith.constant dense<0.000000e+00> : vector<8xf32>
    %4 = vector.multi_reduction <add>, %1, %cst [1] : vector<8x128xf32> to vector<8xf32>
    %5 = vector.shape_cast %4 : vector<8xf32> to vector<8x1xf32>
    %cst_6 = arith.constant 1.280000e+02 : f32
    %6 = vector.broadcast %cst_6 : f32 to vector<8x1xf32>
    %7 = arith.divf %5, %6 : vector<8x1xf32>
    %8 = vector.broadcast %7 : vector<8x1xf32> to vector<8x128xf32>
    %9 = arith.subf %1, %8 : vector<8x128xf32>
    %10 = arith.mulf %9, %9 : vector<8x128xf32>
    %cst_7 = arith.constant dense<0.000000e+00> : vector<8xf32>
    %11 = vector.multi_reduction <add>, %10, %cst_7 [1] : vector<8x128xf32> to vector<8xf32>
    %12 = vector.shape_cast %11 : vector<8xf32> to vector<8x1xf32>
    %cst_8 = arith.constant 1.280000e+02 : f32
    %13 = vector.broadcast %cst_8 : f32 to vector<8x1xf32>
    %14 = arith.divf %12, %13 : vector<8x1xf32>
    %cst_9 = arith.constant 9.99999974E-6 : f32
    %15 = vector.broadcast %cst_9 : f32 to vector<8x1xf32>
    %16 = arith.addf %14, %15 : vector<8x1xf32>
    %17 = math.rsqrt %16 : vector<8x1xf32>
    %18 = vector.broadcast %17 : vector<8x1xf32> to vector<8x128xf32>
    %19 = arith.mulf %9, %18 : vector<8x128xf32>
    %20 = vector.broadcast %2 : vector<1x128xf32> to vector<8x128xf32>
    %21 = arith.mulf %19, %20 : vector<8x128xf32>
    %22 = vector.broadcast %3 : vector<1x128xf32> to vector<8x128xf32>
    %23 = arith.addf %21, %22 : vector<8x128xf32>
    %c0_10 = arith.constant 0 : index
    %c0_11 = arith.constant 0 : index
    %24 = vector.load %arg4[%c0_10, %c0_11] : memref<128x384xf32, #tpu.memory_space<vmem>>, vector<128x384xf32>
    %cst_12 = arith.constant dense<0.000000e+00> : vector<8x384xf32>
    %25 = tpu.matmul %23, %24, %cst_12 {dimension_numbers = #tpu.dot_dimension_numbers<[1], [0], [0], [1], [0, 0, 1, 1], [], []>} : vector<8x128xf32>, vector<128x384xf32>, vector<8x384xf32> -> vector<8x384xf32>
    %c0_13 = arith.constant 0 : index
    %c0_14 = arith.constant 0 : index
    %26 = vector.load %arg5[%c0_13, %c0_14] : memref<1x384xf32, #tpu.memory_space<vmem>>, vector<1x384xf32>
    %27 = vector.broadcast %26 : vector<1x384xf32> to vector<8x384xf32>
    %28 = arith.addf %25, %27 : vector<8x384xf32>
    %29 = vector.extract_strided_slice %28 {offsets = [0, 0], sizes = [8, 32], strides = [1, 1]} : vector<8x384xf32> to vector<8x32xf32>
    %30 = vector.extract_strided_slice %28 {offsets = [0, 128], sizes = [8, 32], strides = [1, 1]} : vector<8x384xf32> to vector<8x32xf32>
    %31 = vector.extract_strided_slice %28 {offsets = [0, 256], sizes = [8, 32], strides = [1, 1]} : vector<8x384xf32> to vector<8x32xf32>
    %cst_15 = arith.constant dense<0.000000e+00> : vector<8x8xf32>
    %32 = tpu.matmul %29, %30, %cst_15 {dimension_numbers = #tpu.dot_dimension_numbers<[1], [1], [0], [0], [0, 0, 1, 0], [], []>} : vector<8x32xf32>, vector<8x32xf32>, vector<8x8xf32> -> vector<8x8xf32>
    %cst_16 = arith.constant 0.176776692 : f32
    %33 = vector.broadcast %cst_16 : f32 to vector<8x8xf32>
    %34 = arith.mulf %32, %33 : vector<8x8xf32>
    %cst_17 = arith.constant dense<0xFF800000> : vector<8xf32>
    %35 = vector.multi_reduction <maximumf>, %34, %cst_17 [1] : vector<8x8xf32> to vector<8xf32>
    %36 = vector.shape_cast %35 : vector<8xf32> to vector<8x1xf32>
    %37 = vector.broadcast %36 : vector<8x1xf32> to vector<8x8xf32>
    %38 = arith.subf %34, %37 : vector<8x8xf32>
    %39 = math.exp %38 : vector<8x8xf32>
    %cst_18 = arith.constant dense<0.000000e+00> : vector<8xf32>
    %40 = vector.multi_reduction <add>, %39, %cst_18 [1] : vector<8x8xf32> to vector<8xf32>
    %41 = vector.shape_cast %40 : vector<8xf32> to vector<8x1xf32>
    %42 = tpu.reciprocal %41 {approx = true} : vector<8x1xf32> -> vector<8x1xf32>
    %43 = vector.broadcast %42 : vector<8x1xf32> to vector<8x8xf32>
    %44 = arith.mulf %39, %43 : vector<8x8xf32>
    %cst_19 = arith.constant dense<0.000000e+00> : vector<8x32xf32>
    %45 = tpu.matmul %44, %31, %cst_19 {dimension_numbers = #tpu.dot_dimension_numbers<[1], [0], [0], [1], [0, 0, 1, 1], [], []>} : vector<8x8xf32>, vector<8x32xf32>, vector<8x32xf32> -> vector<8x32xf32>
    %46 = vector.extract_strided_slice %28 {offsets = [0, 32], sizes = [8, 32], strides = [1, 1]} : vector<8x384xf32> to vector<8x32xf32>
    %47 = vector.extract_strided_slice %28 {offsets = [0, 160], sizes = [8, 32], strides = [1, 1]} : vector<8x384xf32> to vector<8x32xf32>
    %48 = vector.extract_strided_slice %28 {offsets = [0, 288], sizes = [8, 32], strides = [1, 1]} : vector<8x384xf32> to vector<8x32xf32>
    %cst_20 = arith.constant dense<0.000000e+00> : vector<8x8xf32>
    %49 = tpu.matmul %46, %47, %cst_20 {dimension_numbers = #tpu.dot_dimension_numbers<[1], [1], [0], [0], [0, 0, 1, 0], [], []>} : vector<8x32xf32>, vector<8x32xf32>, vector<8x8xf32> -> vector<8x8xf32>
    %cst_21 = arith.constant 0.176776692 : f32
    %50 = vector.broadcast %cst_21 : f32 to vector<8x8xf32>
    %51 = arith.mulf %49, %50 : vector<8x8xf32>
    %cst_22 = arith.constant dense<0xFF800000> : vector<8xf32>
    %52 = vector.multi_reduction <maximumf>, %51, %cst_22 [1] : vector<8x8xf32> to vector<8xf32>
    %53 = vector.shape_cast %52 : vector<8xf32> to vector<8x1xf32>
    %54 = vector.broadcast %53 : vector<8x1xf32> to vector<8x8xf32>
    %55 = arith.subf %51, %54 : vector<8x8xf32>
    %56 = math.exp %55 : vector<8x8xf32>
    %cst_23 = arith.constant dense<0.000000e+00> : vector<8xf32>
    %57 = vector.multi_reduction <add>, %56, %cst_23 [1] : vector<8x8xf32> to vector<8xf32>
    %58 = vector.shape_cast %57 : vector<8xf32> to vector<8x1xf32>
    %59 = tpu.reciprocal %58 {approx = true} : vector<8x1xf32> -> vector<8x1xf32>
    %60 = vector.broadcast %59 : vector<8x1xf32> to vector<8x8xf32>
    %61 = arith.mulf %56, %60 : vector<8x8xf32>
    %cst_24 = arith.constant dense<0.000000e+00> : vector<8x32xf32>
    %62 = tpu.matmul %61, %48, %cst_24 {dimension_numbers = #tpu.dot_dimension_numbers<[1], [0], [0], [1], [0, 0, 1, 1], [], []>} : vector<8x8xf32>, vector<8x32xf32>, vector<8x32xf32> -> vector<8x32xf32>
    %63 = vector.extract_strided_slice %28 {offsets = [0, 64], sizes = [8, 32], strides = [1, 1]} : vector<8x384xf32> to vector<8x32xf32>
    %64 = vector.extract_strided_slice %28 {offsets = [0, 192], sizes = [8, 32], strides = [1, 1]} : vector<8x384xf32> to vector<8x32xf32>
    %65 = vector.extract_strided_slice %28 {offsets = [0, 320], sizes = [8, 32], strides = [1, 1]} : vector<8x384xf32> to vector<8x32xf32>
    %cst_25 = arith.constant dense<0.000000e+00> : vector<8x8xf32>
    %66 = tpu.matmul %63, %64, %cst_25 {dimension_numbers = #tpu.dot_dimension_numbers<[1], [1], [0], [0], [0, 0, 1, 0], [], []>} : vector<8x32xf32>, vector<8x32xf32>, vector<8x8xf32> -> vector<8x8xf32>
    %cst_26 = arith.constant 0.176776692 : f32
    %67 = vector.broadcast %cst_26 : f32 to vector<8x8xf32>
    %68 = arith.mulf %66, %67 : vector<8x8xf32>
    %cst_27 = arith.constant dense<0xFF800000> : vector<8xf32>
    %69 = vector.multi_reduction <maximumf>, %68, %cst_27 [1] : vector<8x8xf32> to vector<8xf32>
    %70 = vector.shape_cast %69 : vector<8xf32> to vector<8x1xf32>
    %71 = vector.broadcast %70 : vector<8x1xf32> to vector<8x8xf32>
    %72 = arith.subf %68, %71 : vector<8x8xf32>
    %73 = math.exp %72 : vector<8x8xf32>
    %cst_28 = arith.constant dense<0.000000e+00> : vector<8xf32>
    %74 = vector.multi_reduction <add>, %73, %cst_28 [1] : vector<8x8xf32> to vector<8xf32>
    %75 = vector.shape_cast %74 : vector<8xf32> to vector<8x1xf32>
    %76 = tpu.reciprocal %75 {approx = true} : vector<8x1xf32> -> vector<8x1xf32>
    %77 = vector.broadcast %76 : vector<8x1xf32> to vector<8x8xf32>
    %78 = arith.mulf %73, %77 : vector<8x8xf32>
    %cst_29 = arith.constant dense<0.000000e+00> : vector<8x32xf32>
    %79 = tpu.matmul %78, %65, %cst_29 {dimension_numbers = #tpu.dot_dimension_numbers<[1], [0], [0], [1], [0, 0, 1, 1], [], []>} : vector<8x8xf32>, vector<8x32xf32>, vector<8x32xf32> -> vector<8x32xf32>
    %80 = vector.extract_strided_slice %28 {offsets = [0, 96], sizes = [8, 32], strides = [1, 1]} : vector<8x384xf32> to vector<8x32xf32>
    %81 = vector.extract_strided_slice %28 {offsets = [0, 224], sizes = [8, 32], strides = [1, 1]} : vector<8x384xf32> to vector<8x32xf32>
    %82 = vector.extract_strided_slice %28 {offsets = [0, 352], sizes = [8, 32], strides = [1, 1]} : vector<8x384xf32> to vector<8x32xf32>
    %cst_30 = arith.constant dense<0.000000e+00> : vector<8x8xf32>
    %83 = tpu.matmul %80, %81, %cst_30 {dimension_numbers = #tpu.dot_dimension_numbers<[1], [1], [0], [0], [0, 0, 1, 0], [], []>} : vector<8x32xf32>, vector<8x32xf32>, vector<8x8xf32> -> vector<8x8xf32>
    %cst_31 = arith.constant 0.176776692 : f32
    %84 = vector.broadcast %cst_31 : f32 to vector<8x8xf32>
    %85 = arith.mulf %83, %84 : vector<8x8xf32>
    %cst_32 = arith.constant dense<0xFF800000> : vector<8xf32>
    %86 = vector.multi_reduction <maximumf>, %85, %cst_32 [1] : vector<8x8xf32> to vector<8xf32>
    %87 = vector.shape_cast %86 : vector<8xf32> to vector<8x1xf32>
    %88 = vector.broadcast %87 : vector<8x1xf32> to vector<8x8xf32>
    %89 = arith.subf %85, %88 : vector<8x8xf32>
    %90 = math.exp %89 : vector<8x8xf32>
    %cst_33 = arith.constant dense<0.000000e+00> : vector<8xf32>
    %91 = vector.multi_reduction <add>, %90, %cst_33 [1] : vector<8x8xf32> to vector<8xf32>
    %92 = vector.shape_cast %91 : vector<8xf32> to vector<8x1xf32>
    %93 = tpu.reciprocal %92 {approx = true} : vector<8x1xf32> -> vector<8x1xf32>
    %94 = vector.broadcast %93 : vector<8x1xf32> to vector<8x8xf32>
    %95 = arith.mulf %90, %94 : vector<8x8xf32>
    %cst_34 = arith.constant dense<0.000000e+00> : vector<8x32xf32>
    %96 = tpu.matmul %95, %82, %cst_34 {dimension_numbers = #tpu.dot_dimension_numbers<[1], [0], [0], [1], [0, 0, 1, 1], [], []>} : vector<8x8xf32>, vector<8x32xf32>, vector<8x32xf32> -> vector<8x32xf32>
    %97 = tpu.concatenate %45, %62, %79, %96 in 1 : vector<8x32xf32>, vector<8x32xf32>, vector<8x32xf32>, vector<8x32xf32> -> vector<8x128xf32>
    %c0_35 = arith.constant 0 : index
    %c0_36 = arith.constant 0 : index
    %98 = vector.load %arg6[%c0_35, %c0_36] : memref<128x128xf32, #tpu.memory_space<vmem>>, vector<128x128xf32>
    %cst_37 = arith.constant dense<0.000000e+00> : vector<8x128xf32>
    %99 = tpu.matmul %97, %98, %cst_37 {dimension_numbers = #tpu.dot_dimension_numbers<[1], [0], [0], [1], [0, 0, 1, 1], [], []>} : vector<8x128xf32>, vector<128x128xf32>, vector<8x128xf32> -> vector<8x128xf32>
    %c0_38 = arith.constant 0 : index
    %c0_39 = arith.constant 0 : index
    %100 = vector.load %arg7[%c0_38, %c0_39] : memref<1x128xf32, #tpu.memory_space<vmem>>, vector<1x128xf32>
    %101 = vector.broadcast %100 : vector<1x128xf32> to vector<8x128xf32>
    %102 = arith.addf %99, %101 : vector<8x128xf32>
    %103 = arith.addf %102, %1 : vector<8x128xf32>
    %c0_40 = arith.constant 0 : index
    %c0_41 = arith.constant 0 : index
    %c0_42 = arith.constant 0 : index
    %104 = vector.load %arg8[%c0_40, %c0_41, %c0_42] : memref<1x8x128xf32, #tpu.memory_space<vmem>>, vector<1x8x128xf32>
    %105 = vector.shape_cast %104 : vector<1x8x128xf32> to vector<8x128xf32>
    %106 = vector.shape_cast %103 : vector<8x128xf32> to vector<1x8x128xf32>
    tpu.vector_store %arg8[%c0_40, %c0_41, %c0_42], %106 {strides = array<i32>} : memref<1x8x128xf32, #tpu.memory_space<vmem>>, vector<1x8x128xf32>,
    return
  }
  func.func @transform_0(%arg0: i32) -> (i32, i32, i32) {
    %c0_i32 = arith.constant 0 : i32
    %c0_i32_0 = arith.constant 0 : i32
    %c0_i32_1 = arith.constant 0 : i32
    return %arg0, %c0_i32, %c0_i32_0 : i32, i32, i32
  }
  func.func @transform_1(%arg0: i32) -> (i32, i32) {
    %c0_i32 = arith.constant 0 : i32
    %c0_i32_0 = arith.constant 0 : i32
    %c0_i32_1 = arith.constant 0 : i32
    return %c0_i32, %c0_i32_0 : i32, i32
  }
  func.func @transform_2(%arg0: i32) -> (i32, i32) {
    %c0_i32 = arith.constant 0 : i32
    %c0_i32_0 = arith.constant 0 : i32
    %c0_i32_1 = arith.constant 0 : i32
    return %c0_i32, %c0_i32_0 : i32, i32
  }
  func.func @transform_3(%arg0: i32) -> (i32, i32) {
    %c0_i32 = arith.constant 0 : i32
    %c0_i32_0 = arith.constant 0 : i32
    %c0_i32_1 = arith.constant 0 : i32
    return %c0_i32, %c0_i32_0 : i32, i32
  }
  func.func @transform_4(%arg0: i32) -> (i32, i32) {
    %c0_i32 = arith.constant 0 : i32
    %c0_i32_0 = arith.constant 0 : i32
    %c0_i32_1 = arith.constant 0 : i32
    return %c0_i32, %c0_i32_0 : i32, i32
  }
  func.func @transform_5(%arg0: i32) -> (i32, i32) {
    %c0_i32 = arith.constant 0 : i32
    %c0_i32_0 = arith.constant 0 : i32
    %c0_i32_1 = arith.constant 0 : i32
    return %c0_i32, %c0_i32_0 : i32, i32
  }
  func.func @transform_6(%arg0: i32) -> (i32, i32) {
    %c0_i32 = arith.constant 0 : i32
    %c0_i32_0 = arith.constant 0 : i32
    %c0_i32_1 = arith.constant 0 : i32
    return %c0_i32, %c0_i32_0 : i32, i32
  }
  func.func @transform_7(%arg0: i32) -> (i32, i32, i32) {
    %c0_i32 = arith.constant 0 : i32
    %c0_i32_0 = arith.constant 0 : i32
    %c0_i32_1 = arith.constant 0 : i32
    return %arg0, %c0_i32, %c0_i32_0 : i32, i32, i32
  }
}

module attributes {stable_mosaic.version = 11 : i64} {
  func.func @_attn_block_kernel(%arg0: i32, %arg1: memref<1x8x128xf32, #tpu.memory_space<vmem>>, %arg2: memref<1x128xf32, #tpu.memory_space<vmem>>, %arg3: memref<1x128xf32, #tpu.memory_space<vmem>>, %arg4: memref<128x384xf32, #tpu.memory_space<vmem>>, %arg5: memref<1x384xf32, #tpu.memory_space<vmem>>, %arg6: memref<128x128xf32, #tpu.memory_space<vmem>>, %arg7: memref<1x128xf32, #tpu.memory_space<vmem>>, %arg8: memref<1x8x128xf32, #tpu.memory_space<vmem>>) attributes {dimension_semantics = [#tpu.dimension_semantics<parallel>], iteration_bounds = array<i64: 2>, scalar_prefetch = 0 : i64, scratch_operands = 0 : i64, tpu.core_type = #tpu.core_type<tc>, window_params = [{transform_indices = @transform_0, window_bounds = array<i64: 1, 8, 128>}, {pipeline_mode = #tpu.pipeline_mode<synchronous>, transform_indices = @transform_1, window_bounds = array<i64: 1, 128>}, {pipeline_mode = #tpu.pipeline_mode<synchronous>, transform_indices = @transform_2, window_bounds = array<i64: 1, 128>}, {pipeline_mode = #tpu.pipeline_mode<synchronous>, transform_indices = @transform_3, window_bounds = array<i64: 128, 384>}, {pipeline_mode = #tpu.pipeline_mode<synchronous>, transform_indices = @transform_4, window_bounds = array<i64: 1, 384>}, {pipeline_mode = #tpu.pipeline_mode<synchronous>, transform_indices = @transform_5, window_bounds = array<i64: 128, 128>}, {pipeline_mode = #tpu.pipeline_mode<synchronous>, transform_indices = @transform_6, window_bounds = array<i64: 1, 128>}, {transform_indices = @transform_7, window_bounds = array<i64: 1, 8, 128>}]} {
    %c0 = arith.constant 0 : index
    %c0_0 = arith.constant 0 : index
    %c0_1 = arith.constant 0 : index
    %0 = vector.load %arg1[%c0, %c0_0, %c0_1] : memref<1x8x128xf32, #tpu.memory_space<vmem>>, vector<1x8x128xf32>
    %1 = vector.shape_cast %0 : vector<1x8x128xf32> to vector<8x128xf32>
    %c0_2 = arith.constant 0 : index
    %c0_3 = arith.constant 0 : index
    %2 = vector.load %arg2[%c0_2, %c0_3] : memref<1x128xf32, #tpu.memory_space<vmem>>, vector<1x128xf32>
    %c0_4 = arith.constant 0 : index
    %c0_5 = arith.constant 0 : index
    %3 = vector.load %arg3[%c0_4, %c0_5] : memref<1x128xf32, #tpu.memory_space<vmem>>, vector<1x128xf32>
    %cst = arith.constant dense<0.000000e+00> : vector<8xf32>
    %4 = vector.multi_reduction <add>, %1, %cst [1] : vector<8x128xf32> to vector<8xf32>
    %5 = vector.shape_cast %4 : vector<8xf32> to vector<8x1xf32>
    %cst_6 = arith.constant 1.280000e+02 : f32
    %6 = vector.broadcast %cst_6 : f32 to vector<8x1xf32>
    %7 = arith.divf %5, %6 : vector<8x1xf32>
    %8 = vector.broadcast %7 : vector<8x1xf32> to vector<8x128xf32>
    %9 = arith.subf %1, %8 : vector<8x128xf32>
    %10 = arith.mulf %9, %9 : vector<8x128xf32>
    %cst_7 = arith.constant dense<0.000000e+00> : vector<8xf32>
    %11 = vector.multi_reduction <add>, %10, %cst_7 [1] : vector<8x128xf32> to vector<8xf32>
    %12 = vector.shape_cast %11 : vector<8xf32> to vector<8x1xf32>
    %cst_8 = arith.constant 1.280000e+02 : f32
    %13 = vector.broadcast %cst_8 : f32 to vector<8x1xf32>
    %14 = arith.divf %12, %13 : vector<8x1xf32>
    %cst_9 = arith.constant 9.99999974E-6 : f32
    %15 = vector.broadcast %cst_9 : f32 to vector<8x1xf32>
    %16 = arith.addf %14, %15 : vector<8x1xf32>
    %17 = math.rsqrt %16 : vector<8x1xf32>
    %18 = vector.broadcast %17 : vector<8x1xf32> to vector<8x128xf32>
    %19 = arith.mulf %9, %18 : vector<8x128xf32>
    %20 = vector.broadcast %2 : vector<1x128xf32> to vector<8x128xf32>
    %21 = arith.mulf %19, %20 : vector<8x128xf32>
    %22 = vector.broadcast %3 : vector<1x128xf32> to vector<8x128xf32>
    %23 = arith.addf %21, %22 : vector<8x128xf32>
    %c0_10 = arith.constant 0 : index
    %c0_11 = arith.constant 0 : index
    %24 = vector.load %arg4[%c0_10, %c0_11] : memref<128x384xf32, #tpu.memory_space<vmem>>, vector<128x384xf32>
    %cst_12 = arith.constant dense<0.000000e+00> : vector<8x384xf32>
    %25 = tpu.matmul %23, %24, %cst_12 {dimension_numbers = #tpu.dot_dimension_numbers<[1], [0], [0], [1], [0, 0, 1, 1], [], []>} : vector<8x128xf32>, vector<128x384xf32>, vector<8x384xf32> -> vector<8x384xf32>
    %c0_13 = arith.constant 0 : index
    %c0_14 = arith.constant 0 : index
    %26 = vector.load %arg5[%c0_13, %c0_14] : memref<1x384xf32, #tpu.memory_space<vmem>>, vector<1x384xf32>
    %27 = vector.broadcast %26 : vector<1x384xf32> to vector<8x384xf32>
    %28 = arith.addf %25, %27 : vector<8x384xf32>
    %29 = vector.extract_strided_slice %28 {offsets = [0, 0], sizes = [8, 32], strides = [1, 1]} : vector<8x384xf32> to vector<8x32xf32>
    %30 = vector.extract_strided_slice %28 {offsets = [0, 128], sizes = [8, 32], strides = [1, 1]} : vector<8x384xf32> to vector<8x32xf32>
    %31 = vector.extract_strided_slice %28 {offsets = [0, 256], sizes = [8, 32], strides = [1, 1]} : vector<8x384xf32> to vector<8x32xf32>
    %cst_15 = arith.constant dense<0.000000e+00> : vector<8x8xf32>
    %32 = tpu.matmul %29, %30, %cst_15 {dimension_numbers = #tpu.dot_dimension_numbers<[1], [1], [0], [0], [0, 0, 1, 0], [], []>} : vector<8x32xf32>, vector<8x32xf32>, vector<8x8xf32> -> vector<8x8xf32>
    %cst_16 = arith.constant 0.176776692 : f32
    %33 = vector.broadcast %cst_16 : f32 to vector<8x8xf32>
    %34 = arith.mulf %32, %33 : vector<8x8xf32>
    %cst_17 = arith.constant dense<0xFF800000> : vector<8xf32>
    %35 = vector.multi_reduction <maximumf>, %34, %cst_17 [1] : vector<8x8xf32> to vector<8xf32>
    %36 = vector.shape_cast %35 : vector<8xf32> to vector<8x1xf32>
    %37 = vector.broadcast %36 : vector<8x1xf32> to vector<8x8xf32>
    %38 = arith.subf %34, %37 : vector<8x8xf32>
    %39 = math.exp %38 : vector<8x8xf32>
    %cst_18 = arith.constant dense<0.000000e+00> : vector<8xf32>
    %40 = vector.multi_reduction <add>, %39, %cst_18 [1] : vector<8x8xf32> to vector<8xf32>
    %41 = vector.shape_cast %40 : vector<8xf32> to vector<8x1xf32>
    %42 = tpu.reciprocal %41 {approx = true} : vector<8x1xf32> -> vector<8x1xf32>
    %43 = vector.broadcast %42 : vector<8x1xf32> to vector<8x8xf32>
    %44 = arith.mulf %39, %43 : vector<8x8xf32>
    %cst_19 = arith.constant dense<0.000000e+00> : vector<8x32xf32>
    %45 = tpu.matmul %44, %31, %cst_19 {dimension_numbers = #tpu.dot_dimension_numbers<[1], [0], [0], [1], [0, 0, 1, 1], [], []>} : vector<8x8xf32>, vector<8x32xf32>, vector<8x32xf32> -> vector<8x32xf32>
    %46 = vector.extract_strided_slice %28 {offsets = [0, 32], sizes = [8, 32], strides = [1, 1]} : vector<8x384xf32> to vector<8x32xf32>
    %47 = vector.extract_strided_slice %28 {offsets = [0, 160], sizes = [8, 32], strides = [1, 1]} : vector<8x384xf32> to vector<8x32xf32>
    %48 = vector.extract_strided_slice %28 {offsets = [0, 288], sizes = [8, 32], strides = [1, 1]} : vector<8x384xf32> to vector<8x32xf32>
    %cst_20 = arith.constant dense<0.000000e+00> : vector<8x8xf32>
    %49 = tpu.matmul %46, %47, %cst_20 {dimension_numbers = #tpu.dot_dimension_numbers<[1], [1], [0], [0], [0, 0, 1, 0], [], []>} : vector<8x32xf32>, vector<8x32xf32>, vector<8x8xf32> -> vector<8x8xf32>
    %cst_21 = arith.constant 0.176776692 : f32
    %50 = vector.broadcast %cst_21 : f32 to vector<8x8xf32>
    %51 = arith.mulf %49, %50 : vector<8x8xf32>
    %cst_22 = arith.constant dense<0xFF800000> : vector<8xf32>
    %52 = vector.multi_reduction <maximumf>, %51, %cst_22 [1] : vector<8x8xf32> to vector<8xf32>
    %53 = vector.shape_cast %52 : vector<8xf32> to vector<8x1xf32>
    %54 = vector.broadcast %53 : vector<8x1xf32> to vector<8x8xf32>
    %55 = arith.subf %51, %54 : vector<8x8xf32>
    %56 = math.exp %55 : vector<8x8xf32>
    %cst_23 = arith.constant dense<0.000000e+00> : vector<8xf32>
    %57 = vector.multi_reduction <add>, %56, %cst_23 [1] : vector<8x8xf32> to vector<8xf32>
    %58 = vector.shape_cast %57 : vector<8xf32> to vector<8x1xf32>
    %59 = tpu.reciprocal %58 {approx = true} : vector<8x1xf32> -> vector<8x1xf32>
    %60 = vector.broadcast %59 : vector<8x1xf32> to vector<8x8xf32>
    %61 = arith.mulf %56, %60 : vector<8x8xf32>
    %cst_24 = arith.constant dense<0.000000e+00> : vector<8x32xf32>
    %62 = tpu.matmul %61, %48, %cst_24 {dimension_numbers = #tpu.dot_dimension_numbers<[1], [0], [0], [1], [0, 0, 1, 1], [], []>} : vector<8x8xf32>, vector<8x32xf32>, vector<8x32xf32> -> vector<8x32xf32>
    %63 = vector.extract_strided_slice %28 {offsets = [0, 64], sizes = [8, 32], strides = [1, 1]} : vector<8x384xf32> to vector<8x32xf32>
    %64 = vector.extract_strided_slice %28 {offsets = [0, 192], sizes = [8, 32], strides = [1, 1]} : vector<8x384xf32> to vector<8x32xf32>
    %65 = vector.extract_strided_slice %28 {offsets = [0, 320], sizes = [8, 32], strides = [1, 1]} : vector<8x384xf32> to vector<8x32xf32>
    %cst_25 = arith.constant dense<0.000000e+00> : vector<8x8xf32>
    %66 = tpu.matmul %63, %64, %cst_25 {dimension_numbers = #tpu.dot_dimension_numbers<[1], [1], [0], [0], [0, 0, 1, 0], [], []>} : vector<8x32xf32>, vector<8x32xf32>, vector<8x8xf32> -> vector<8x8xf32>
    %cst_26 = arith.constant 0.176776692 : f32
    %67 = vector.broadcast %cst_26 : f32 to vector<8x8xf32>
    %68 = arith.mulf %66, %67 : vector<8x8xf32>
    %cst_27 = arith.constant dense<0xFF800000> : vector<8xf32>
    %69 = vector.multi_reduction <maximumf>, %68, %cst_27 [1] : vector<8x8xf32> to vector<8xf32>
    %70 = vector.shape_cast %69 : vector<8xf32> to vector<8x1xf32>
    %71 = vector.broadcast %70 : vector<8x1xf32> to vector<8x8xf32>
    %72 = arith.subf %68, %71 : vector<8x8xf32>
    %73 = math.exp %72 : vector<8x8xf32>
    %cst_28 = arith.constant dense<0.000000e+00> : vector<8xf32>
    %74 = vector.multi_reduction <add>, %73, %cst_28 [1] : vector<8x8xf32> to vector<8xf32>
    %75 = vector.shape_cast %74 : vector<8xf32> to vector<8x1xf32>
    %76 = tpu.reciprocal %75 {approx = true} : vector<8x1xf32> -> vector<8x1xf32>
    %77 = vector.broadcast %76 : vector<8x1xf32> to vector<8x8xf32>
    %78 = arith.mulf %73, %77 : vector<8x8xf32>
    %cst_29 = arith.constant dense<0.000000e+00> : vector<8x32xf32>
    %79 = tpu.matmul %78, %65, %cst_29 {dimension_numbers = #tpu.dot_dimension_numbers<[1], [0], [0], [1], [0, 0, 1, 1], [], []>} : vector<8x8xf32>, vector<8x32xf32>, vector<8x32xf32> -> vector<8x32xf32>
    %80 = vector.extract_strided_slice %28 {offsets = [0, 96], sizes = [8, 32], strides = [1, 1]} : vector<8x384xf32> to vector<8x32xf32>
    %81 = vector.extract_strided_slice %28 {offsets = [0, 224], sizes = [8, 32], strides = [1, 1]} : vector<8x384xf32> to vector<8x32xf32>
    %82 = vector.extract_strided_slice %28 {offsets = [0, 352], sizes = [8, 32], strides = [1, 1]} : vector<8x384xf32> to vector<8x32xf32>
    %cst_30 = arith.constant dense<0.000000e+00> : vector<8x8xf32>
    %83 = tpu.matmul %80, %81, %cst_30 {dimension_numbers = #tpu.dot_dimension_numbers<[1], [1], [0], [0], [0, 0, 1, 0], [], []>} : vector<8x32xf32>, vector<8x32xf32>, vector<8x8xf32> -> vector<8x8xf32>
    %cst_31 = arith.constant 0.176776692 : f32
    %84 = vector.broadcast %cst_31 : f32 to vector<8x8xf32>
    %85 = arith.mulf %83, %84 : vector<8x8xf32>
    %cst_32 = arith.constant dense<0xFF800000> : vector<8xf32>
    %86 = vector.multi_reduction <maximumf>, %85, %cst_32 [1] : vector<8x8xf32> to vector<8xf32>
    %87 = vector.shape_cast %86 : vector<8xf32> to vector<8x1xf32>
    %88 = vector.broadcast %87 : vector<8x1xf32> to vector<8x8xf32>
    %89 = arith.subf %85, %88 : vector<8x8xf32>
    %90 = math.exp %89 : vector<8x8xf32>
    %cst_33 = arith.constant dense<0.000000e+00> : vector<8xf32>
    %91 = vector.multi_reduction <add>, %90, %cst_33 [1] : vector<8x8xf32> to vector<8xf32>
    %92 = vector.shape_cast %91 : vector<8xf32> to vector<8x1xf32>
    %93 = tpu.reciprocal %92 {approx = true} : vector<8x1xf32> -> vector<8x1xf32>
    %94 = vector.broadcast %93 : vector<8x1xf32> to vector<8x8xf32>
    %95 = arith.mulf %90, %94 : vector<8x8xf32>
    %cst_34 = arith.constant dense<0.000000e+00> : vector<8x32xf32>
    %96 = tpu.matmul %95, %82, %cst_34 {dimension_numbers = #tpu.dot_dimension_numbers<[1], [0], [0], [1], [0, 0, 1, 1], [], []>} : vector<8x8xf32>, vector<8x32xf32>, vector<8x32xf32> -> vector<8x32xf32>
    %97 = tpu.concatenate %45, %62, %79, %96 in 1 : vector<8x32xf32>, vector<8x32xf32>, vector<8x32xf32>, vector<8x32xf32> -> vector<8x128xf32>
    %c0_35 = arith.constant 0 : index
    %c0_36 = arith.constant 0 : index
    %98 = vector.load %arg6[%c0_35, %c0_36] : memref<128x128xf32, #tpu.memory_space<vmem>>, vector<128x128xf32>
    %cst_37 = arith.constant dense<0.000000e+00> : vector<8x128xf32>
    %99 = tpu.matmul %97, %98, %cst_37 {dimension_numbers = #tpu.dot_dimension_numbers<[1], [0], [0], [1], [0, 0, 1, 1], [], []>} : vector<8x128xf32>, vector<128x128xf32>, vector<8x128xf32> -> vector<8x128xf32>
    %c0_38 = arith.constant 0 : index
    %c0_39 = arith.constant 0 : index
    %100 = vector.load %arg7[%c0_38, %c0_39] : memref<1x128xf32, #tpu.memory_space<vmem>>, vector<1x128xf32>
    %101 = vector.broadcast %100 : vector<1x128xf32> to vector<8x128xf32>
    %102 = arith.addf %99, %101 : vector<8x128xf32>
    %103 = arith.addf %102, %1 : vector<8x128xf32>
    %c0_40 = arith.constant 0 : index
    %c0_41 = arith.constant 0 : index
    %c0_42 = arith.constant 0 : index
    %104 = vector.load %arg8[%c0_40, %c0_41, %c0_42] : memref<1x8x128xf32, #tpu.memory_space<vmem>>, vector<1x8x128xf32>
    %105 = vector.shape_cast %104 : vector<1x8x128xf32> to vector<8x128xf32>
    %106 = vector.shape_cast %103 : vector<8x128xf32> to vector<1x8x128xf32>
    tpu.vector_store %arg8[%c0_40, %c0_41, %c0_42], %106 {strides = array<i32>} : memref<1x8x128xf32, #tpu.memory_space<vmem>>, vector<1x8x128xf32>,
    return
  }
  func.func @transform_0(%arg0: i32) -> (i32, i32, i32) {
    %c0_i32 = arith.constant 0 : i32
    %c0_i32_0 = arith.constant 0 : i32
    %c0_i32_1 = arith.constant 0 : i32
    return %arg0, %c0_i32, %c0_i32_0 : i32, i32, i32
  }
  func.func @transform_1(%arg0: i32) -> (i32, i32) {
    %c0_i32 = arith.constant 0 : i32
    %c0_i32_0 = arith.constant 0 : i32
    %c0_i32_1 = arith.constant 0 : i32
    return %c0_i32, %c0_i32_0 : i32, i32
  }
  func.func @transform_2(%arg0: i32) -> (i32, i32) {
    %c0_i32 = arith.constant 0 : i32
    %c0_i32_0 = arith.constant 0 : i32
    %c0_i32_1 = arith.constant 0 : i32
    return %c0_i32, %c0_i32_0 : i32, i32
  }
  func.func @transform_3(%arg0: i32) -> (i32, i32) {
    %c0_i32 = arith.constant 0 : i32
    %c0_i32_0 = arith.constant 0 : i32
    %c0_i32_1 = arith.constant 0 : i32
    return %c0_i32, %c0_i32_0 : i32, i32
  }
  func.func @transform_4(%arg0: i32) -> (i32, i32) {
    %c0_i32 = arith.constant 0 : i32
    %c0_i32_0 = arith.constant 0 : i32
    %c0_i32_1 = arith.constant 0 : i32
    return %c0_i32, %c0_i32_0 : i32, i32
  }
  func.func @transform_5(%arg0: i32) -> (i32, i32) {
    %c0_i32 = arith.constant 0 : i32
    %c0_i32_0 = arith.constant 0 : i32
    %c0_i32_1 = arith.constant 0 : i32
    return %c0_i32, %c0_i32_0 : i32, i32
  }
  func.func @transform_6(%arg0: i32) -> (i32, i32) {
    %c0_i32 = arith.constant 0 : i32
    %c0_i32_0 = arith.constant 0 : i32
    %c0_i32_1 = arith.constant 0 : i32
    return %c0_i32, %c0_i32_0 : i32, i32
  }
  func.func @transform_7(%arg0: i32) -> (i32, i32, i32) {
    %c0_i32 = arith.constant 0 : i32
    %c0_i32_0 = arith.constant 0 : i32
    %c0_i32_1 = arith.constant 0 : i32
    return %arg0, %c0_i32, %c0_i32_0 : i32, i32, i32
  }
}

module attributes {stable_mosaic.version = 11 : i64} {
  func.func @_layernorm_kernel(%arg0: i32, %arg1: memref<8x128xf32, #tpu.memory_space<vmem>>, %arg2: memref<1x128xf32, #tpu.memory_space<vmem>>, %arg3: memref<1x128xf32, #tpu.memory_space<vmem>>, %arg4: memref<8x128xf32, #tpu.memory_space<vmem>>) attributes {dimension_semantics = [#tpu.dimension_semantics<parallel>], iteration_bounds = array<i64: 2>, scalar_prefetch = 0 : i64, scratch_operands = 0 : i64, tpu.core_type = #tpu.core_type<tc>, window_params = [{transform_indices = @transform_0, window_bounds = array<i64: 8, 128>}, {pipeline_mode = #tpu.pipeline_mode<synchronous>, transform_indices = @transform_1, window_bounds = array<i64: 1, 128>}, {pipeline_mode = #tpu.pipeline_mode<synchronous>, transform_indices = @transform_2, window_bounds = array<i64: 1, 128>}, {transform_indices = @transform_3, window_bounds = array<i64: 8, 128>}]} {
    %c0 = arith.constant 0 : index
    %c0_0 = arith.constant 0 : index
    %0 = vector.load %arg1[%c0, %c0_0] : memref<8x128xf32, #tpu.memory_space<vmem>>, vector<8x128xf32>
    %c0_1 = arith.constant 0 : index
    %c0_2 = arith.constant 0 : index
    %1 = vector.load %arg2[%c0_1, %c0_2] : memref<1x128xf32, #tpu.memory_space<vmem>>, vector<1x128xf32>
    %c0_3 = arith.constant 0 : index
    %c0_4 = arith.constant 0 : index
    %2 = vector.load %arg3[%c0_3, %c0_4] : memref<1x128xf32, #tpu.memory_space<vmem>>, vector<1x128xf32>
    %cst = arith.constant dense<0.000000e+00> : vector<8xf32>
    %3 = vector.multi_reduction <add>, %0, %cst [1] : vector<8x128xf32> to vector<8xf32>
    %4 = vector.shape_cast %3 : vector<8xf32> to vector<8x1xf32>
    %cst_5 = arith.constant 1.280000e+02 : f32
    %5 = vector.broadcast %cst_5 : f32 to vector<8x1xf32>
    %6 = arith.divf %4, %5 : vector<8x1xf32>
    %7 = vector.broadcast %6 : vector<8x1xf32> to vector<8x128xf32>
    %8 = arith.subf %0, %7 : vector<8x128xf32>
    %9 = arith.mulf %8, %8 : vector<8x128xf32>
    %cst_6 = arith.constant dense<0.000000e+00> : vector<8xf32>
    %10 = vector.multi_reduction <add>, %9, %cst_6 [1] : vector<8x128xf32> to vector<8xf32>
    %11 = vector.shape_cast %10 : vector<8xf32> to vector<8x1xf32>
    %cst_7 = arith.constant 1.280000e+02 : f32
    %12 = vector.broadcast %cst_7 : f32 to vector<8x1xf32>
    %13 = arith.divf %11, %12 : vector<8x1xf32>
    %cst_8 = arith.constant 9.99999974E-6 : f32
    %14 = vector.broadcast %cst_8 : f32 to vector<8x1xf32>
    %15 = arith.addf %13, %14 : vector<8x1xf32>
    %16 = math.rsqrt %15 : vector<8x1xf32>
    %17 = vector.broadcast %16 : vector<8x1xf32> to vector<8x128xf32>
    %18 = arith.mulf %8, %17 : vector<8x128xf32>
    %19 = vector.broadcast %1 : vector<1x128xf32> to vector<8x128xf32>
    %20 = arith.mulf %18, %19 : vector<8x128xf32>
    %21 = vector.broadcast %2 : vector<1x128xf32> to vector<8x128xf32>
    %22 = arith.addf %20, %21 : vector<8x128xf32>
    %c0_9 = arith.constant 0 : index
    %c0_10 = arith.constant 0 : index
    %23 = vector.load %arg4[%c0_9, %c0_10] : memref<8x128xf32, #tpu.memory_space<vmem>>, vector<8x128xf32>
    tpu.vector_store %arg4[%c0_9, %c0_10], %22 {strides = array<i32>} : memref<8x128xf32, #tpu.memory_space<vmem>>, vector<8x128xf32>,
    return
  }
  func.func @transform_0(%arg0: i32) -> (i32, i32) {
    %c0_i32 = arith.constant 0 : i32
    %c0_i32_0 = arith.constant 0 : i32
    return %arg0, %c0_i32 : i32, i32
  }
  func.func @transform_1(%arg0: i32) -> (i32, i32) {
    %c0_i32 = arith.constant 0 : i32
    %c0_i32_0 = arith.constant 0 : i32
    %c0_i32_1 = arith.constant 0 : i32
    return %c0_i32, %c0_i32_0 : i32, i32
  }
  func.func @transform_2(%arg0: i32) -> (i32, i32) {
    %c0_i32 = arith.constant 0 : i32
    %c0_i32_0 = arith.constant 0 : i32
    %c0_i32_1 = arith.constant 0 : i32
    return %c0_i32, %c0_i32_0 : i32, i32
  }
  func.func @transform_3(%arg0: i32) -> (i32, i32) {
    %c0_i32 = arith.constant 0 : i32
    %c0_i32_0 = arith.constant 0 : i32
    return %arg0, %c0_i32 : i32, i32
  }
}

</mosaic_0001>

<bundles_post_ra>
// kernel: transformer_forward.5
= control target key start
LH: loop header
LB: loop body
LE: loop exit
PB: predicated region body
PF: predicated region fallthrough
CT: control target
= control target key end

     0   :  { %12 = vsyncpa [#allocation3], 0  ;;  %s1591_s0 = inlined_call_operand.hbm [shape: f32[2,8,128], index: 0, kind: input, shape index: {}]   ;;  %s1592_s1 = inlined_call_operand.hbm [shape: f32[1,128], index: 1, kind: input, shape index: {}]   ;;  %s1593_s2 = inlined_call_operand.hbm [shape: f32[1,128], index: 2, kind: input, shape index: {}]   ;;  %s1594_s3 = inlined_call_operand.hbm [shape: f32[128,384], index: 3, kind: input, shape index: {}]   ;;  %s1595_s4 = inlined_call_operand.vmem [shape: f32[1,384], index: 4, kind: input, shape index: {}]   ;;  %s1596_s5 = inlined_call_operand.hbm [shape: f32[128,128], index: 5, kind: input, shape index: {}]   ;;  %s1597_s6 = inlined_call_operand.hbm [shape: f32[1,128], index: 6, kind: input, shape index: {}]   ;;  %s1598_s7 = inlined_call_operand.vmem [shape: f32[2,8,128], index: 7, kind: output, shape index: {}]  }
   0x1   :  { %14 = vsyncpa [#allocation3 + $0x1], 0 }
   0x2   :  { %15 = vsyncpa [#allocation5], 0 }
   0x3   :  { %16 = vsyncpa [#allocation8], 0 }
   0x4   :  { %17 = vsyncpa [#allocation11], 0  ;;  %s1395_s24 = smov 0   ;;  %s1397_s25 = smov 0  }
   0x5   :  { %s1399_s26 = smov 0   ;;  %s1401_s27 = smov 0  }
   0x6 LB: > { %s218_s30 = sshll.u32 %s1592_s1, 4  ;;  %s1419_s8 = sadd.s32 4294967295, %s1340_s27   ;;  %s1340_s27 = sphi %s1401_s27, %s1606_s27   ;;  %s1336_s26 = sphi %s1399_s26, %s1605_s26   ;;  %s1332_s25 = sphi %s1397_s25, %s1604_s25   ;;  %s1328_s24 = sphi %s1395_s24, %s1603_s24   ;;  %s219_s30 = int_to_ptr.hbm [resolvable:$true] %s218_s30 }
   0x7   : > { %p962_p0 = scmp.ge.s32.totalorder %s1340_s27, 1  ;;  %p44_p1 = scmp.eq.s32.totalorder %s1419_s8, 0 }
   0x8   : > { %p206_p2 = scmp.lt.s32.totalorder %s1340_s27, 3  ;;  %s1342_s10 = smov [#allocation4]  }
   0x9   : > { %s220_s11 = sshll.u32 %s1342_s10, 4  ;;  %s241_s14 = sshll.u32 %s1594_s3, 4  ;;  %s221_s11 = int_to_ptr.vmem [resolvable:$true] %s220_s11  ;;  %s242_s14 = int_to_ptr.hbm [resolvable:$true] %s241_s14 }
   0xa   : > { %p1424_p3 = pnand %p962_p0, %p206_p2  ;;  %s1343_s16 = smov [#allocation7]  }
   0xb   : > { %s243_s17 = sshll.u32 %s1343_s16, 4  ;;  %s1344_s18 = smov 384   ;;  %s244_s17 = int_to_ptr.vmem [resolvable:$true] %s243_s17 }
   0xc   : > { %p1015_p4 = pneg %p1424_p3  ;;  %s1345_s19 = smov 24  }
   0xd   : > { %s230_s22 = sshll.u32 %s1593_s2, 4  ;;  %s1346_s23 = smov [#allocation6]   ;;  %s231_s22 = int_to_ptr.hbm [resolvable:$true] %s230_s22 }
   0xe   : > { %p1435_p5 = pnand %p1015_p4, %p44_p1  ;;  %s232_s28 = sshll.u32 %s1346_s23, 4  ;;  %s233_s28 = int_to_ptr.vmem [resolvable:$true] %s232_s28 }
   0xf   : > { %s258_s12 = sshll.u32 %s1596_s5, 4  ;;  %s1348_s13 = smov 128   ;;  %s259_s12 = int_to_ptr.hbm [resolvable:$true] %s258_s12 }
  0x10   : > { %1018 = dma.hbm_to_vmem [thread:$0]  (!%p1435_p5), %s219_s30, 16, %s221_s11, [#allocation5]  }
  0x11   : > { %1024 = dma.hbm_to_vmem [thread:$0]  (!%p1435_p5), %s242_s14, 6144, %s244_s17, [#allocation8], %s1344_s18, %s1344_s18, %s1345_s19  }
  0x12   : > { %1021 = dma.hbm_to_vmem [thread:$0]  (!%p1435_p5), %s231_s22, 16, %s233_s28, [#allocation5]  }
  0x13   : > { %s1347_s30 = smov [#allocation9]   ;;  %s1349_s14 = smov 8  }
  0x14   : > { %s260_s11 = sshll.u32 %s1347_s30, 4  ;;  %s273_s18 = sshll.u32 %s1597_s6, 4  ;;  %s261_s11 = int_to_ptr.vmem [resolvable:$true] %s260_s11  ;;  %s274_s18 = int_to_ptr.hbm [resolvable:$true] %s273_s18 }
  0x15   : > { %1027 = dma.hbm_to_vmem [thread:$0]  (!%p1435_p5), %s259_s12, 2048, %s261_s11, [#allocation8], %s1348_s13, %s1348_s13, %s1349_s14  }
  0x16   : > { %s1350_s19 = smov [#allocation10]   ;;  %s1459_s21 = sadd.s32 1, %s1340_s27  }
  0x17   : > { %s275_s20 = sshll.u32 %s1350_s19, 4  ;;  %s27_s22 = ssub.s32 %s1340_s27, %s1459_s21  ;;  %s276_s20 = int_to_ptr.vmem [resolvable:$true] %s275_s20 }
  0x18   : > { %1030 = dma.hbm_to_vmem [thread:$0]  (!%p1435_p5), %s274_s18, 16, %s276_s20, [#allocation11]  }
  0x19   : > { %s30_s23 = sadd.s32 1, %s1336_s26  ;;  %p28_p6 = scmp.eq.s32.totalorder %s27_s22, 0 }
  0x1a   : > { %p37_p7 = scmp.ne.s32.totalorder %s1336_s26, %s1332_s25  ;;  %p38_p8 = scmp.eq.s32.totalorder %s1340_s27, 0 }
  0x1b   : > { %p43_p9 = scmp.ne.s32.totalorder %s1332_s25, %s1328_s24  ;;  %p1040_p12 = scmp.lt.s32.totalorder %s1340_s27, 2 }
  0x1c   : > { %s1470_s28 = scalar_select %p28_p6, %s1336_s26, %s30_s23  }
  0x1d   : > { %p39_p10 = por %p38_p8, %p37_p7  ;;  %p1474_p11 = por %p44_p1, %p43_p9 }
  0x1e   : > { %s286_s15 = sand.u32 1, %s1336_s26   ;;  %s970_s12 = sshll.u32 %s1340_s27, 3 }
  0x1f   : > { %s969_s10 = sshll.u32 %s286_s15, 3  ;;  %s294_s13 = scalar_lea.hbm %s1591_s0, %s970_s12 }
  0x20   : > { %s290_s14 = scalar_lea.vmem [#allocation2], %s969_s10  ;;  %s296_s17 = sshll.u32 %s294_s13, 4  ;;  %s297_s17 = int_to_ptr.hbm [resolvable:$true] %s296_s17 }
  0x21   : > { %s298_s16 = sshll.u32 %s290_s14, 4  ;;  %p1484_p13 = pnand %p1040_p12, %p39_p10  ;;  %s299_s16 = int_to_ptr.vmem [resolvable:$true] %s298_s16 }
  0x22   : > { %s287_s18 = scalar_lea.sflag [#allocation3], %s286_s15  ;;  %s1264_s19 = sshra.s32 %s297_s17, 4  ;;  %s1265_s19 = int_to_ptr.hbm [resolvable:$true] %s1264_s19 }
  0x23   : > { %s1266_s20 = scalar_lea.hbm %s1265_s19, 8  ;;  %p1268_p2 = pneg %p1484_p13 }
  0x24   : > { %p1267_p0 = scmp.ne.s32.totalorder %s1265_s19, %s1266_s20  ;;  %s1271_s23 = scalar_lea.hbm %s1591_s0, 16 }
  0x25   : > { %p1272_p6 = scmp.lt.s32.totalorder %s1265_s19, %s1591_s0  ;;  %p1273_p7 = scmp.lt.s32.totalorder %s1271_s23, %s1266_s20 }
  0x26   : > { %p1269_p4 = pnand %p1268_p2, %p1267_p0 }
  0x27   : > { %p1274_p8 = por %p1273_p7, %p1272_p6 }
  0x28   : > { %p1270_p5 = pneg %p1269_p4 }
  0x2a   : > { %p1275_p9 = pnand %p1274_p8, %p1270_p5 }
  0x2c   : > { %1278 = shalt.err (!%p1275_p9)
}
  0x2d   : > { %1034 = dma.hbm_to_vmem [thread:$0]  (!%p1484_p13), %s297_s17, 128, %s299_s16, %s287_s18  }
  0x2e   : > { %307 = sbr.rel (%p1424_p3) target bundleno = 1734 (0x6c6), region = 48  ;;  %s309_s15 = sand.u32 (!%p1424_p3), 1, %s1332_s25  }
  0x2f   : > { %s972_s30 = sshll.u32 (!%p1424_p3), %s309_s15, 3  ;;  %s310_s11 = scalar_lea.sflag (!%p1424_p3), [#allocation3], %s309_s15 }
  0x30   : > { %s313_s13 = scalar_lea.vmem (!%p1424_p3), [#allocation2], %s972_s30 }
  0x33   : > { %1311 = dma.done.wait (%p1474_p11), %s310_s11, 128  }
  0x34   : > { %1313 = vsyncadd (%p1474_p11), %s310_s11, 4294967168 }
  0x35   : > { %1315 = dma.done.wait (%p44_p1), [#allocation5], 32  }
  0x36   : > { %1317 = vsyncadd (%p44_p1), [#allocation5], 4294967264 }
  0x37   : > { %1319 = dma.done.wait (%p44_p1), [#allocation8], 8192  }
  0x38   : > { %1321 = vsyncadd (%p44_p1), [#allocation8], 4294959104 }
  0x39   : > { %1323 = dma.done.wait (%p44_p1), [#allocation11], 16  }
  0x3a   : > { %1325 = vsyncadd (%p44_p1), [#allocation11], 4294967280  ;;  %v1517_v0 = vld [vmem:[%s313_s13] sm:$0xff]  ;;  %v1351_v1 = vmov 128.0   ;;  %v455_v7 = vld [vmem:[#allocation7 + $0x160] sm:$0xff]  ;;  %vm527_vm4 = vcmask 261120  }
  0x3b   : > { %376 = vadd.xlane.f32.xlu0 %v1517_v0  ;;  %1094 = vrcp.f32 %v1351_v1  ;;  %v456_v2 = vld [vmem:[#allocation7 + $0x168] sm:$0xff]  ;;  %v457_v3 = vld [vmem:[#allocation7 + $0x170] sm:$0xff]  ;;  %v458_v4 = vld [vmem:[#allocation7 + $0x178] sm:$0xff]  ;;  %s1352_s14 = smov 96   ;;  %s1353_s16 = smov 64   ;;  %vm555_vm5 = vcmask 64512  }
  0x3c   : > { %467 = vmatpush.msra.mxu0 %v456_v2  ;;  %487 = vmatpush.msra.mxu1 %v457_v3  ;;  %v453_v5 = vld [vmem:[#allocation7 + $0x150] sm:$0xff]  ;;  %v454_v6 = vld [vmem:[#allocation7 + $0x158] sm:$0xff]  ;;  %v451_v19 = vld [vmem:[#allocation7 + $0x140] sm:$0xff]  ;;  %s1354_s17 = smov 32   ;;  %vm802_vm6 = vcmask 523264   ;;  %vm804_vm7 = vcmask 785408  }
  0x3d   : > { %507 = vmatpush.msra.mxu2 %v458_v4  ;;  %v450_v18 = vld [vmem:[#allocation7 + $0x138] sm:$0xff]  ;;  %v452_v20 = vld [vmem:[#allocation7 + $0x148] sm:$0xff]  ;;  %v447_v21 = vld [vmem:[#allocation7 + $0x120] sm:$0xff]  ;;  %p369_p1 = scmp.lt.s32.totalorder %s1419_s8, 1 }
  0x3e   : > { %468 = vmatpush.msra.mxu0 %v453_v5  ;;  %488 = vmatpush.msra.mxu1 %v454_v6  ;;  %v448_v22 = vld [vmem:[#allocation7 + $0x128] sm:$0xff]  ;;  %v449_v23 = vld [vmem:[#allocation7 + $0x130] sm:$0xff]  ;;  %v446_v26 = vld [vmem:[#allocation7 + $0x118] sm:$0xff] }
  0x3f   : > { %508 = vmatpush.msra.mxu2 %v455_v7  ;;  %v444_v24 = vld [vmem:[#allocation7 + $0x108] sm:$0xff]  ;;  %v445_v25 = vld [vmem:[#allocation7 + $0x110] sm:$0xff]  ;;  %v442_v28 = vld [vmem:[#allocation7 + $0xf8] sm:$0xff]  ;;  %s1608_s8 = smov (!%p369_p1, %s1419_s8), 1 }
  0x40   : > { %469 = vmatpush.msra.mxu0 %v450_v18  ;;  %489 = vmatpush.msra.mxu1 %v451_v19  ;;  %v441_v27 = vld [vmem:[#allocation7 + $0xf0] sm:$0xff]  ;;  %v443_v29 = vld [vmem:[#allocation7 + $0x100] sm:$0xff]  ;;  %v438_v30 = vld [vmem:[#allocation7 + $0xd8] sm:$0xff]  ;;  %s978_s24 = sshll.u32 %s1608_s8, 3 }
  0x41   : > { %v1095_v8 = vpop.eup %1094  ;;  %509 = vmatpush.msra.mxu2 %v452_v20  ;;  %v439_v31 = vld [vmem:[#allocation7 + $0xe0] sm:$0xff]  ;;  %v440_v32 = vld [vmem:[#allocation7 + $0xe8] sm:$0xff]  ;;  %v437_v35 = vld [vmem:[#allocation7 + $0xd0] sm:$0xff]  ;;  %s372_s20 = scalar_lea.vmem %s1598_s7, %s978_s24 }
  0x42   : > { %v379_v9 = vmul.f32 128.0, %v1095_v8  ;;  %vm383_vm0 = vweird.f32 %v1095_v8  ;;  %470 = vmatpush.msra.mxu0 %v447_v21  ;;  %490 = vmatpush.msra.mxu1 %v448_v22  ;;  %v435_v33 = vld [vmem:[#allocation7 + $0xc0] sm:$0xff]  ;;  %v436_v34 = vld [vmem:[#allocation7 + $0xc8] sm:$0xff]  ;;  %v433_v37 = vld [vmem:[#allocation7 + $0xb0] sm:$0xff] }
  0x43   : > { %510 = vmatpush.msra.mxu2 %v449_v23  ;;  %v432_v36 = vld [vmem:[#allocation7 + $0xa8] sm:$0xff]  ;;  %v434_v38 = vld [vmem:[#allocation7 + $0xb8] sm:$0xff]  ;;  %v429_v39 = vld [vmem:[#allocation7 + $0x90] sm:$0xff] }
  0x44   : > { %v380_v10 = vsub.f32 1.0, %v379_v9  ;;  %471 = vmatpush.msra.mxu0 %v444_v24  ;;  %491 = vmatpush.msra.mxu1 %v445_v25  ;;  %v430_v40 = vld [vmem:[#allocation7 + $0x98] sm:$0xff]  ;;  %v431_v41 = vld [vmem:[#allocation7 + $0xa0] sm:$0xff]  ;;  %v428_v44 = vld [vmem:[#allocation7 + $0x88] sm:$0xff] }
  0x45   : > { %511 = vmatpush.msra.mxu2 %v446_v26  ;;  %v426_v42 = vld [vmem:[#allocation7 + $0x78] sm:$0xff]  ;;  %v427_v43 = vld [vmem:[#allocation7 + $0x80] sm:$0xff]  ;;  %v424_v46 = vld [vmem:[#allocation7 + $0x68] sm:$0xff] }
  0x46   : > { %v381_v11 = vmul.f32 %v1095_v8, %v380_v10  ;;  %472 = vmatpush.msra.mxu0 %v441_v27  ;;  %492 = vmatpush.msra.mxu1 %v442_v28  ;;  %v423_v45 = vld [vmem:[#allocation7 + $0x60] sm:$0xff]  ;;  %v425_v47 = vld [vmem:[#allocation7 + $0x70] sm:$0xff]  ;;  %v420_v48 = vld [vmem:[#allocation7 + $0x48] sm:$0xff] }
  0x47   : > { %512 = vmatpush.msra.mxu2 %v443_v29  ;;  %v421_v49 = vld [vmem:[#allocation7 + $0x50] sm:$0xff]  ;;  %v422_v50 = vld [vmem:[#allocation7 + $0x58] sm:$0xff]  ;;  %v419_v53 = vld [vmem:[#allocation7 + $0x40] sm:$0xff] }
  0x48   : > { %v382_v12 = vadd.f32 %v1095_v8, %v381_v11  ;;  %473 = vmatpush.msra.mxu0 %v438_v30  ;;  %493 = vmatpush.msra.mxu1 %v439_v31  ;;  %v417_v51 = vld [vmem:[#allocation7 + $0x30] sm:$0xff]  ;;  %v418_v52 = vld [vmem:[#allocation7 + $0x38] sm:$0xff]  ;;  %v415_v55 = vld [vmem:[#allocation7 + $0x20] sm:$0xff] }
  0x49   : > { %513 = vmatpush.msra.mxu2 %v440_v32  ;;  %v414_v54 = vld [vmem:[#allocation7 + $0x18] sm:$0xff]  ;;  %v416_v56 = vld [vmem:[#allocation7 + $0x28] sm:$0xff]  ;;  %v411_v57 = vld [vmem:[#allocation7] sm:$0xff] }
  0x4a   : > { %v1520_v13 = vsel %vm383_vm0, %v1095_v8, %v382_v12  ;;  %474 = vmatpush.msra.mxu0 %v435_v33  ;;  %494 = vmatpush.msra.mxu1 %v436_v34  ;;  %v412_v58 = vld [vmem:[#allocation7 + $0x8] sm:$0xff]  ;;  %v413_v59 = vld [vmem:[#allocation7 + $0x10] sm:$0xff]  ;;  %v1091_v6 = vld [vmem:[#allocation4] ss:$0 sm:$0xff] }
  0x4b   : > { %514 = vmatpush.msra.mxu2 %v437_v35  ;;  %v1092_v9 = vld [vmem:[#allocation6] ss:$0 sm:$0xff]  ;;  %v459_v12 = vld [vmem:[%s1595_s4] sm:$0x7] }
  0x4c   : > { %475 = vmatpush.msra.mxu0 %v432_v36  ;;  %495 = vmatpush.msra.mxu1 %v433_v37  ;;  %v463_v19 = vperm.slane %v459_v12, 2 }
  0x4d   : > { %515 = vmatpush.msra.mxu2 %v434_v38 }
  0x4e   : > { %476 = vmatpush.msra.mxu0 %v429_v39  ;;  %496 = vmatpush.msra.mxu1 %v430_v40 }
  0x4f   : > { %516 = vmatpush.msra.mxu2 %v431_v41 }
  0x50   : > { %477 = vmatpush.msra.mxu0 %v426_v42  ;;  %497 = vmatpush.msra.mxu1 %v427_v43 }
  0x51   : > { %517 = vmatpush.msra.mxu2 %v428_v44 }
  0x52   : > { %478 = vmatpush.msra.mxu0 %v423_v45  ;;  %498 = vmatpush.msra.mxu1 %v424_v46 }
  0x53   : > { %518 = vmatpush.msra.mxu2 %v425_v47 }
  0x54   : > { %479 = vmatpush.msra.mxu0 %v420_v48  ;;  %499 = vmatpush.msra.mxu1 %v421_v49 }
  0x55   : > { %519 = vmatpush.msra.mxu2 %v422_v50 }
  0x56   : > { %480 = vmatpush.msra.mxu0 %v417_v51  ;;  %500 = vmatpush.msra.mxu1 %v418_v52 }
  0x57   : > { %520 = vmatpush.msra.mxu2 %v419_v53 }
  0x58   : > { %481 = vmatpush.msra.mxu0 %v414_v54  ;;  %501 = vmatpush.msra.mxu1 %v415_v55 }
  0x59   : > { %521 = vmatpush.msra.mxu2 %v416_v56 }
  0x5a   : > { %482 = vmatpush.msra.mxu0 %v411_v57  ;;  %502 = vmatpush.msra.mxu1 %v412_v58 }
  0x5b   : > { %522 = vmatpush.msra.mxu2 %v413_v59 }
  0xae   : > { %v377_v14 = vpop.xlane.xlu0 %376 }
  0xaf   : > { %v385_v15 = vmul.f32 %v1520_v13, %v377_v14  ;;  %v461_v14 = vperm.slane %v459_v12, 0 }
  0xb1   : > { %v1524_v16 = vsub.f32 %v1517_v0, %v385_v15 }
  0xb3   : > { %v387_v17 = vmul.f32 %v1524_v16, %v1524_v16 }
  0xb5   : > { %388 = vadd.xlane.f32.xlu0 %v387_v17 }
 0x128   : > { %v389_v60 = vpop.xlane.xlu0 %388 }
 0x129   : > { %v390_v61 = vmul.f32 %v389_v60, %v1520_v13  ;;  %v462_v13 = vperm.slane %v459_v12, 1 }
 0x12b   : > { %v391_v62 = vadd.f32 1e-05, %v390_v61 }
 0x12d   : > { %1096 = vrsqrt.f32 %v391_v62  ;;  %vm398_vm2 = vweird.f32 %v391_v62 }
 0x133   : > { %v1097_v63 = vpop.eup %1096 }
 0x134   : > { %v393_v1 = vmul.f32 %v1097_v63, %v391_v62  ;;  %vm399_vm1 = vweird.f32 %v1097_v63 }
 0x135   : > { %vm400_vm3 = vmor %vm398_vm2, %vm399_vm1 }
 0x136   : > { %v394_v2 = vmul.f32 %v1097_v63, %v393_v1 }
 0x138   : > { %v395_v3 = vmul.f32 0.5, %v394_v2 }
 0x13a   : > { %v396_v4 = vsub.f32 1.5, %v395_v3 }
 0x13c   : > { %v397_v5 = vmul.f32 %v1097_v63, %v396_v4 }
 0x13e   : > { %v401_v7 = vsel %vm400_vm3, %v1097_v63, %v397_v5 }
 0x13f   : > { %v402_v8 = vmul.f32 %v401_v7, %v1524_v16 }
 0x141   : > { %v406_v10 = vmul.f32 %v1091_v6, %v402_v8 }
 0x143   : > { %v410_v11 = vadd.f32 %v1092_v9, %v406_v10 }
 0x145   : > { %483 = vmatmul.f32.vlgmr.msra.gmra.mxu0 %v410_v11  ;;  %503 = vmatmul.f32.vlgmr.msra.gmra.mxu1 %v410_v11 }
 0x146   : > { %523 = vmatmul.f32.vlgmr.msra.gmra.mxu2 %v410_v11 }
 0x1c2   : > { %v504_v15 = vpop.f32.mrf.mxu1  ;;  %v484_v17 = vpop.f32.mrf.mxu0 }
 0x1c3   : > { %v505_v18 = vadd.f32 %v504_v15, %v462_v13  ;;  %v485_v16 = vadd.f32 %v484_v17, %v461_v14  ;;  %v821_v17 = vld [vmem:[#allocation9 + $0x78] sm:$0xff] }
 0x1c5   : > { %592 = vrot.lane.b32.xlu1 %v505_v18, %s1352_s14  ;;  %979 = vmatpush.xpose.msk.msrb.mxu0 %vm527_vm4, %v505_v18 }
 0x1c8   : > { %980 = vmatmul.msk.f32.vlgmr.msrb.gmra.mxu0 %vm527_vm4, %v485_v16 }
 0x1c9   : > { %v524_v20 = vpop.f32.mrf.mxu2 }
 0x1ca   : > { %v1536_v21 = vadd.f32 %v524_v20, %v463_v19  ;;  %v818_v19 = vld [vmem:[#allocation9 + $0x60] sm:$0xff]  ;;  %v817_v20 = vld [vmem:[#allocation9 + $0x58] sm:$0xff] }
 0x1cc   : > { %631 = vrot.lane.b32.xlu0 %v1536_v21, %s1352_s14  ;;  %585 = vmatpush.msrb.mxu2 %v1536_v21 }
 0x1cd   : > { %590 = vrot.lane.b32.xlu1 %v485_v16, %s1352_s14 }
 0x1d5   : > { %659 = vrot.lane.b32.xlu1 %v505_v18, %s1353_s16 }
 0x1dd   : > { %657 = vrot.lane.b32.xlu1 %v485_v16, %s1353_s16 }
 0x1e5   : > { %723 = vrot.lane.b32.xlu1 %v485_v16, %s1354_s17  ;;  %v819_v16 = vld [vmem:[#allocation9 + $0x68] sm:$0xff] }
 0x237   : > { %v593_v22 = vpop.permute.xlu1 %592 }
 0x238   : > { %982 = vmatpush.xpose.msk.msrb.mxu1 %vm527_vm4, %v593_v22  ;;  %v815_v22 = vld [vmem:[#allocation9 + $0x48] sm:$0xff] }
 0x23e   : > { %v632_v23 = vpop.permute.xlu0 %631 }
 0x23f   : > { %652 = vmatpush.msra.mxu3 %v632_v23  ;;  %v591_v24 = vpop.permute.xlu1 %590  ;;  %v814_v23 = vld [vmem:[#allocation9 + $0x40] sm:$0xff] }
 0x240   : > { %983 = vmatmul.msk.f32.vlgmr.msrb.gmra.mxu1 %vm527_vm4, %v591_v24  ;;  %v813_v24 = vld [vmem:[#allocation9 + $0x38] sm:$0xff] }
 0x245   : > { %v551_v25 = vpop.f32.mrf.mxu0 }
 0x246   : > { %v554_v26 = vmul.f32 0.17677669, %v551_v25  ;;  %v812_v25 = vld [vmem:[#allocation9 + $0x30] sm:$0xff] }
 0x247   : > { %v660_v27 = vpop.permute.xlu1 %659 }
 0x248   : > { %985 = vmatpush.xpose.msk.msrb.mxu3 %vm527_vm4, %v660_v27  ;;  %v556_v28 = vsel %vm555_vm5, %v554_v26, -inf  ;;  %v810_v27 = vld [vmem:[#allocation9 + $0x20] sm:$0xff] }
 0x249   : > { %557 = vmax.xlane.f32.xlu0 %v556_v28  ;;  %v809_v28 = vld [vmem:[#allocation9 + $0x18] sm:$0xff] }
 0x24f   : > { %v658_v47 = vpop.permute.xlu1 %657 }
 0x257   : > { %v724_v51 = vpop.permute.xlu1 %723 }
 0x2bc   : > { %v558_v29 = vpop.xlane.xlu0 %557 }
 0x2bd   : > { %v559_v30 = vsub.f32 %v554_v26, %v558_v29  ;;  %v615_v31 = vpop.f32.mrf.mxu1  ;;  %v811_v26 = vld [vmem:[#allocation9 + $0x28] sm:$0xff]  ;;  %v808_v29 = vld [vmem:[#allocation9 + $0x10] sm:$0xff] }
 0x2be   : > { %v618_v32 = vmul.f32 0.17677669, %v615_v31  ;;  %v806_v31 = vld [vmem:[#allocation9] sm:$0xff] }
 0x2bf   : > { %v560_v33 = vmul.f32 1.442695, %v559_v30  ;;  %v807_v30 = vld [vmem:[#allocation9 + $0x8] sm:$0xff] }
 0x2c0   : > { %v619_v34 = vsel %vm555_vm5, %v618_v32, -inf }
 0x2c1   : > { %1098 = vpow2.f32 %v560_v33  ;;  %620 = vmax.xlane.f32.xlu2 %v619_v34 }
 0x2c7   : > { %v1099_v35 = vpop.eup %1098 }
 0x2c8   : > { %v562_v36 = vsel %vm555_vm5, %v1099_v35, 0.0 }
 0x2c9   : > { %563 = vadd.xlane.f32.xlu0 %v562_v36 }
 0x2dd   : > { %763 = vrot.lane.b32.xlu0 %v1536_v21, %s1354_s17 }
 0x334   : > { %v621_v37 = vpop.xlane.xlu2 %620 }
 0x335   : > { %v622_v38 = vsub.f32 %v618_v32, %v621_v37 }
 0x337   : > { %v623_v39 = vmul.f32 1.442695, %v622_v38  ;;  %v1093_v38 = vld [vmem:[#allocation10] ss:$0 sm:$0xff] }
 0x339   : > { %1100 = vpow2.f32 %v623_v39 }
 0x33c   : > { %v564_v40 = vpop.xlane.xlu0 %563 }
 0x33d   : > { %1102 = vrcp.f32 %v564_v40 }
 0x33f   : > { %v1101_v41 = vpop.eup %1100 }
 0x340   : > { %v625_v42 = vsel %vm555_vm5, %v1101_v41, 0.0 }
 0x341   : > { %626 = vadd.xlane.f32.xlu2 %v625_v42 }
 0x343   : > { %v1103_v43 = vpop.eup %1102 }
 0x344   : > { %v566_v44 = vmul.f32 %v1103_v43, %v1099_v35 }
 0x346   : > { %981 = vmatmul.msk.f32.vlgmr.msrb.gmra.mxu2 %vm555_vm5, %v566_v44 }
 0x34f   : > { %v764_v45 = vpop.permute.xlu0 %763 }
 0x350   : > { %784 = vmatpush.msra.mxu2 %v764_v45 }
 0x359   : > { %725 = vrot.lane.b32.xlu2 %v505_v18, %s1354_s17  ;;  %v820_v18 = vld [vmem:[#allocation9 + $0x70] sm:$0xff] }
 0x3b4   : > { %v627_v46 = vpop.xlane.xlu2 %626 }
 0x3b5   : > { %1104 = vrcp.f32 %v627_v46 }
 0x3bb   : > { %v1105_v48 = vpop.eup %1104 }
 0x3bc   : > { %v726_v49 = vpop.permute.xlu2 %725  ;;  %v629_v50 = vmul.f32 %v1105_v48, %v1101_v41 }
 0x3bd   : > { %988 = vmatpush.xpose.msk.msra.mxu1 %vm527_vm4, %v726_v49 }
 0x3be   : > { %984 = vmatmul.msk.f32.vlgmr.msra.gmra.mxu3 %vm555_vm5, %v629_v50 }
 0x3bf   : > { %826 = vmatpush.msra.mxu3 %v821_v17 }
 0x3c0   : > { %989 = vmatmul.msk.f32.vlgmr.msra.gmra.mxu1 %vm527_vm4, %v724_v51 }
 0x3c1   : > { %827 = vmatpush.msra.mxu3 %v820_v18 }
 0x3c3   : > { %828 = vmatpush.msra.mxu3 %v819_v16 }
 0x3c5   : > { %829 = vmatpush.msra.mxu3 %v818_v19 }
 0x3c6   : > { %986 = vmatmul.msk.f32.vlgmr.msrb.gmra.mxu3 %vm527_vm4, %v658_v47 }
 0x3c7   : > { %830 = vmatpush.msra.mxu3 %v817_v20 }
 0x3c9   : > { %v587_v13 = vpop.f32.mrf.mxu2 }
 0x43d   : > { %v748_v52 = vpop.f32.mrf.mxu1 }
 0x43e   : > { %v751_v53 = vmul.f32 0.17677669, %v748_v52 }
 0x440   : > { %v752_v54 = vsel %vm555_vm5, %v751_v53, -inf }
 0x441   : > { %v654_v55 = vpop.f32.mrf.mxu3  ;;  %753 = vmax.xlane.f32.xlu1 %v752_v54 }
 0x449   : > { %v682_v56 = vpop.f32.mrf.mxu3 }
 0x44a   : > { %v685_v57 = vmul.f32 0.17677669, %v682_v56 }
 0x44c   : > { %v686_v58 = vsel %vm555_vm5, %v685_v57, -inf }
 0x44d   : > { %687 = vmax.xlane.f32.xlu2 %v686_v58 }
 0x4b4   : > { %v754_v59 = vpop.xlane.xlu1 %753 }
 0x4b5   : > { %v755_v60 = vsub.f32 %v751_v53, %v754_v59 }
 0x4b7   : > { %v756_v61 = vmul.f32 1.442695, %v755_v60 }
 0x4b9   : > { %1106 = vpow2.f32 %v756_v61 }
 0x4bf   : > { %v1107_v62 = vpop.eup %1106 }
 0x4c0   : > { %v688_v63 = vpop.xlane.xlu2 %687  ;;  %v758_v1 = vsel %vm555_vm5, %v1107_v62, 0.0 }
 0x4c1   : > { %v689_v2 = vsub.f32 %v685_v57, %v688_v63  ;;  %759 = vadd.xlane.f32.xlu2 %v758_v1 }
 0x4c3   : > { %v690_v3 = vmul.f32 1.442695, %v689_v2 }
 0x4c5   : > { %1108 = vpow2.f32 %v690_v3 }
 0x4cb   : > { %v1109_v4 = vpop.eup %1108 }
 0x4cc   : > { %v692_v5 = vsel %vm555_vm5, %v1109_v4, 0.0 }
 0x4cd   : > { %693 = vadd.xlane.f32.xlu1 %v692_v5 }
 0x4d9   : > { %697 = vrot.lane.b32.xlu2 %v1536_v21, %s1353_s16  ;;  %v816_v21 = vld [vmem:[#allocation9 + $0x50] sm:$0xff] }
 0x4da   : > { %831 = vmatpush.msra.mxu3 %v816_v21 }
 0x4dc   : > { %832 = vmatpush.msra.mxu3 %v815_v22 }
 0x4de   : > { %833 = vmatpush.msra.mxu3 %v814_v23 }
 0x4e0   : > { %834 = vmatpush.msra.mxu3 %v813_v24 }
 0x4e2   : > { %835 = vmatpush.msra.mxu3 %v812_v25 }
 0x4e4   : > { %836 = vmatpush.msra.mxu3 %v811_v26 }
 0x4e6   : > { %790 = vrot.lane.b32.xlu1 %v654_v55, %s1354_s17  ;;  %837 = vmatpush.msra.mxu3 %v810_v27 }
 0x4e8   : > { %838 = vmatpush.msra.mxu3 %v809_v28 }
 0x4ea   : > { %839 = vmatpush.msra.mxu3 %v808_v29 }
 0x4ec   : > { %840 = vmatpush.msra.mxu3 %v807_v30 }
 0x4ee   : > { %841 = vmatpush.msra.mxu3 %v806_v31 }
 0x534   : > { %v760_v6 = vpop.xlane.xlu2 %759 }
 0x535   : > { %1110 = vrcp.f32 %v760_v6 }
 0x53b   : > { %v1111_v7 = vpop.eup %1110 }
 0x53c   : > { %v762_v8 = vmul.f32 %v1111_v7, %v1107_v62  ;;  %v698_v9 = vpop.permute.xlu2 %697 }
 0x53d   : > { %718 = vmatpush.msra.mxu0 %v698_v9 }
 0x53e   : > { %990 = vmatmul.msk.f32.vlgmr.msra.gmra.mxu2 %vm555_vm5, %v762_v8 }
 0x540   : > { %v694_v10 = vpop.xlane.xlu1 %693 }
 0x541   : > { %1112 = vrcp.f32 %v694_v10 }
 0x547   : > { %v1113_v11 = vpop.eup %1112 }
 0x548   : > { %v696_v12 = vmul.f32 %v1113_v11, %v1109_v4 }
 0x54a   : > { %987 = vmatmul.msk.f32.vlgmr.msra.gmra.mxu0 %vm555_vm5, %v696_v12 }
 0x558   : > { %v791_v32 = vpop.permute.xlu1 %790 }
 0x559   : > { %v801_v33 = vsel %vm527_vm4, %v587_v13, %v791_v32 }
 0x5c1   : > { %v786_v14 = vpop.f32.mrf.mxu2 }
 0x5c2   : > { %798 = vrot.lane.b32.xlu2 %v786_v14, %s1352_s14 }
 0x5c7   : > { %v720_v15 = vpop.f32.mrf.mxu0 }
 0x5c8   : > { %794 = vrot.lane.b32.xlu0 %v720_v15, %s1353_s16 }
 0x61c   : > { %v799_v35 = vpop.permute.xlu2 %798 }
 0x63a   : > { %v795_v34 = vpop.permute.xlu0 %794 }
 0x63b   : > { %v803_v36 = vsel %vm802_vm6, %v801_v33, %v795_v34 }
 0x63c   : > { %v805_v37 = vsel %vm804_vm7, %v803_v36, %v799_v35 }
 0x63d   : > { %842 = vmatmul.f32.vlgmr.msra.gmra.mxu3 %v805_v37 }
 0x6c0   : > { %v843_v39 = vpop.f32.mrf.mxu3 }
 0x6c1   : > { %v844_v40 = vadd.f32 %v1093_v38, %v843_v39 }
 0x6c3   : > { %v846_v41 = vadd.f32 %v844_v40, %v1517_v0 }
 0x6c5   : > { %847 = vst [vmem:[%s372_s20] sm:$0xff] %v846_v41 }
 0x6c6 PF: > { %p20_p3 = scmp.ge.s32.totalorder %s1459_s21, 4   ;;  %s1603_s24 = smov %s1332_s25 }
 0x6c7   : > { %s1604_s25 = smov %s1336_s26  ;;  %s1605_s26 = smov %s1470_s28 }
 0x6c8   : > { %s1606_s27 = smov %s1459_s21  ;;  %22 = sbr.rel (!%p20_p3) target bundleno = 6 (0x6), region = 108 }
 0x6cd   :  { %867 = vsyncpa [#allocation3], 1 }
 0x6ce   :  { %869 = vsyncpa [#allocation3 + $0x1], 1 }
 0x6cf   :  { %870 = vsyncpa [#allocation5], 1 }
 0x6d0   :  { %871 = vsyncpa [#allocation8], 1 }
 0x6d1   :  { %872 = vsyncpa [#allocation11], 1 }

// kernel: transformer_forward.8
= control target key start
LH: loop header
LB: loop body
LE: loop exit
PB: predicated region body
PF: predicated region fallthrough
CT: control target
= control target key end

     0   :  { %12 = vsyncpa [#allocation3], 0  ;;  %s1015_s0 = inlined_call_operand.vmem [shape: f32[16,128], index: 0, kind: input, shape index: {}]   ;;  %s1016_s1 = inlined_call_operand.vmem [shape: f32[1,128], index: 1, kind: input, shape index: {}]   ;;  %s1017_s2 = inlined_call_operand.vmem [shape: f32[1,128], index: 2, kind: input, shape index: {}]   ;;  %s1018_s3 = inlined_call_operand.hbm [shape: f32[128,512], index: 3, kind: input, shape index: {}]   ;;  %s1019_s4 = inlined_call_operand.vmem [shape: f32[1,512], index: 4, kind: input, shape index: {}]   ;;  %s1020_s5 = inlined_call_operand.hbm [shape: f32[512,128], index: 5, kind: input, shape index: {}]   ;;  %s1021_s6 = inlined_call_operand.vmem [shape: f32[1,128], index: 6, kind: input, shape index: {}]   ;;  %s1022_s7 = inlined_call_operand.vmem [shape: f32[16,128], index: 7, kind: output, shape index: {}]  }
   0x1   :  { %13 = vsyncpa [#allocation5], 0  ;;  %s946_s24 = smov 0  }
   0x2 LB: > { %s219_s27 = sshll.u32 %s1018_s3, 4  ;;  %s761_s28 = sadd.s32 4294967295, %s897_s24   ;;  %s897_s24 = sphi %s946_s24, %s19_s24   ;;  %s220_s27 = int_to_ptr.hbm [resolvable:$true] %s219_s27 }
   0x3   : > { %p763_p0 = scmp.ge.s32.totalorder %s897_s24, 1  ;;  %p202_p1 = scmp.lt.s32.totalorder %s897_s24, 3 }
   0x4   : > { %p789_p2 = scmp.eq.s32.totalorder %s761_s28, 0  ;;  %s899_s30 = smov [#allocation2]  }
   0x5   : > { %p957_p3 = pnand %p763_p0, %p202_p1  ;;  %s221_s8 = sshll.u32 %s899_s30, 4  ;;  %s222_s8 = int_to_ptr.vmem [resolvable:$true] %s221_s8 }
   0x6   : > { %s236_s11 = sshll.u32 %s1020_s5, 4  ;;  %s900_s12 = smov [#allocation4]   ;;  %s237_s11 = int_to_ptr.hbm [resolvable:$true] %s236_s11 }
   0x7   : > { %p782_p4 = pneg %p957_p3  ;;  %s238_s13 = sshll.u32 %s900_s12, 4  ;;  %s239_s13 = int_to_ptr.vmem [resolvable:$true] %s238_s13 }
   0x8   : > { %s901_s14 = smov 512   ;;  %s902_s15 = smov 32  }
   0x9   : > { %p783_p5 = pnand %p789_p2, %p782_p4  ;;  %s903_s16 = smov 128  }
   0xa   : > { %s904_s17 = smov 8   ;;  %264 = sbr.rel (%p957_p3) target bundleno = 585 (0x249), region = 48 }
   0xb   : > { %785 = dma.hbm_to_vmem [thread:$0]  (!%p783_p5), %s220_s27, 8192, %s222_s8, [#allocation3], %s901_s14, %s901_s14, %s902_s15  }
   0xc   : > { %788 = dma.hbm_to_vmem [thread:$0]  (!%p783_p5), %s237_s11, 8192, %s239_s13, [#allocation5], %s903_s16, %s903_s16, %s904_s17  }
   0xf   : > { %888 = dma.done.wait (%p789_p2), [#allocation3], 8192  }
  0x10   : > { %890 = vsyncadd (%p789_p2), [#allocation3], 4294959104 }
  0x11   : > { %892 = dma.done.wait (%p789_p2), [#allocation5], 8192  }
  0x12   : > { %894 = vsyncadd (%p789_p2), [#allocation5], 4294959104  ;;  %p300_p6 = scmp.lt.s32.totalorder %s761_s28, 1  ;;  %v905_v1 = vmov 128.0   ;;  %v406_v2 = vld [vmem:[#allocation2 + $0x1e0] sm:$0xff]  ;;  %v407_v3 = vld [vmem:[#allocation2 + $0x1e8] sm:$0xff] }
  0x13   : > { %811 = vrcp.f32 %v905_v1  ;;  %v408_v4 = vld [vmem:[#allocation2 + $0x1f0] sm:$0xff]  ;;  %420 = vmatpush.msra.mxu0 %v406_v2  ;;  %440 = vmatpush.msra.mxu1 %v407_v3  ;;  %v409_v5 = vld [vmem:[#allocation2 + $0x1f8] sm:$0xff]  ;;  %v402_v6 = vld [vmem:[#allocation2 + $0x1c0] sm:$0xff] }
  0x14   : > { %s1025_s28 = smov (!%p300_p6, %s761_s28), 1  ;;  %v403_v7 = vld [vmem:[#allocation2 + $0x1c8] sm:$0xff]  ;;  %460 = vmatpush.msra.mxu2 %v408_v4  ;;  %480 = vmatpush.msra.mxu3 %v409_v5  ;;  %v404_v8 = vld [vmem:[#allocation2 + $0x1d0] sm:$0xff]  ;;  %v405_v9 = vld [vmem:[#allocation2 + $0x1d8] sm:$0xff] }
  0x15   : > { %s770_s18 = sshll.u32 %s1025_s28, 3  ;;  %421 = vmatpush.msra.mxu0 %v402_v6  ;;  %441 = vmatpush.msra.mxu1 %v403_v7  ;;  %v398_v20 = vld [vmem:[#allocation2 + $0x1a0] sm:$0xff]  ;;  %v399_v21 = vld [vmem:[#allocation2 + $0x1a8] sm:$0xff]  ;;  %v400_v22 = vld [vmem:[#allocation2 + $0x1b0] sm:$0xff] }
  0x16   : > { %s303_s21 = scalar_lea.vmem %s1015_s0, %s770_s18  ;;  %461 = vmatpush.msra.mxu2 %v404_v8  ;;  %481 = vmatpush.msra.mxu3 %v405_v9  ;;  %v401_v23 = vld [vmem:[#allocation2 + $0x1b8] sm:$0xff]  ;;  %v394_v24 = vld [vmem:[#allocation2 + $0x180] sm:$0xff]  ;;  %v395_v25 = vld [vmem:[#allocation2 + $0x188] sm:$0xff]  ;;  %s307_s11 = scalar_lea.vmem %s1022_s7, %s770_s18 }
  0x17   : > { %v981_v0 = vld [vmem:[%s303_s21] sm:$0xff]  ;;  %422 = vmatpush.msra.mxu0 %v398_v20  ;;  %442 = vmatpush.msra.mxu1 %v399_v21  ;;  %v396_v26 = vld [vmem:[#allocation2 + $0x190] sm:$0xff]  ;;  %v397_v27 = vld [vmem:[#allocation2 + $0x198] sm:$0xff] }
  0x18   : > { %311 = vadd.xlane.f32.xlu0 %v981_v0  ;;  %462 = vmatpush.msra.mxu2 %v400_v22  ;;  %v390_v28 = vld [vmem:[#allocation2 + $0x160] sm:$0xff]  ;;  %v391_v29 = vld [vmem:[#allocation2 + $0x168] sm:$0xff]  ;;  %v392_v30 = vld [vmem:[#allocation2 + $0x170] sm:$0xff] }
  0x19   : > { %v812_v10 = vpop.eup %811  ;;  %482 = vmatpush.msra.mxu3 %v401_v23  ;;  %423 = vmatpush.msra.mxu0 %v394_v24  ;;  %v393_v31 = vld [vmem:[#allocation2 + $0x178] sm:$0xff]  ;;  %v386_v32 = vld [vmem:[#allocation2 + $0x140] sm:$0xff]  ;;  %v387_v33 = vld [vmem:[#allocation2 + $0x148] sm:$0xff] }
  0x1a   : > { %v314_v11 = vmul.f32 128.0, %v812_v10  ;;  %vm318_vm0 = vweird.f32 %v812_v10  ;;  %443 = vmatpush.msra.mxu1 %v395_v25  ;;  %463 = vmatpush.msra.mxu2 %v396_v26  ;;  %v388_v34 = vld [vmem:[#allocation2 + $0x150] sm:$0xff]  ;;  %v389_v35 = vld [vmem:[#allocation2 + $0x158] sm:$0xff]  ;;  %v382_v36 = vld [vmem:[#allocation2 + $0x120] sm:$0xff] }
  0x1b   : > { %483 = vmatpush.msra.mxu3 %v397_v27  ;;  %424 = vmatpush.msra.mxu0 %v390_v28  ;;  %v383_v37 = vld [vmem:[#allocation2 + $0x128] sm:$0xff]  ;;  %v384_v38 = vld [vmem:[#allocation2 + $0x130] sm:$0xff]  ;;  %v385_v39 = vld [vmem:[#allocation2 + $0x138] sm:$0xff] }
  0x1c   : > { %v315_v12 = vsub.f32 1.0, %v314_v11  ;;  %444 = vmatpush.msra.mxu1 %v391_v29  ;;  %464 = vmatpush.msra.mxu2 %v392_v30  ;;  %v378_v40 = vld [vmem:[#allocation2 + $0x100] sm:$0xff]  ;;  %v379_v41 = vld [vmem:[#allocation2 + $0x108] sm:$0xff]  ;;  %v380_v42 = vld [vmem:[#allocation2 + $0x110] sm:$0xff] }
  0x1d   : > { %484 = vmatpush.msra.mxu3 %v393_v31  ;;  %425 = vmatpush.msra.mxu0 %v386_v32  ;;  %v381_v43 = vld [vmem:[#allocation2 + $0x118] sm:$0xff]  ;;  %v374_v44 = vld [vmem:[#allocation2 + $0xe0] sm:$0xff]  ;;  %v375_v45 = vld [vmem:[#allocation2 + $0xe8] sm:$0xff] }
  0x1e   : > { %v316_v13 = vmul.f32 %v812_v10, %v315_v12  ;;  %445 = vmatpush.msra.mxu1 %v387_v33  ;;  %465 = vmatpush.msra.mxu2 %v388_v34  ;;  %v376_v46 = vld [vmem:[#allocation2 + $0xf0] sm:$0xff]  ;;  %v377_v47 = vld [vmem:[#allocation2 + $0xf8] sm:$0xff]  ;;  %v370_v48 = vld [vmem:[#allocation2 + $0xc0] sm:$0xff] }
  0x1f   : > { %485 = vmatpush.msra.mxu3 %v389_v35  ;;  %426 = vmatpush.msra.mxu0 %v382_v36  ;;  %v371_v49 = vld [vmem:[#allocation2 + $0xc8] sm:$0xff]  ;;  %v372_v50 = vld [vmem:[#allocation2 + $0xd0] sm:$0xff]  ;;  %v373_v51 = vld [vmem:[#allocation2 + $0xd8] sm:$0xff] }
  0x20   : > { %v317_v14 = vadd.f32 %v812_v10, %v316_v13  ;;  %446 = vmatpush.msra.mxu1 %v383_v37  ;;  %466 = vmatpush.msra.mxu2 %v384_v38  ;;  %v366_v52 = vld [vmem:[#allocation2 + $0xa0] sm:$0xff]  ;;  %v367_v53 = vld [vmem:[#allocation2 + $0xa8] sm:$0xff]  ;;  %v368_v54 = vld [vmem:[#allocation2 + $0xb0] sm:$0xff] }
  0x21   : > { %486 = vmatpush.msra.mxu3 %v385_v39  ;;  %427 = vmatpush.msra.mxu0 %v378_v40  ;;  %v369_v55 = vld [vmem:[#allocation2 + $0xb8] sm:$0xff]  ;;  %v362_v56 = vld [vmem:[#allocation2 + $0x80] sm:$0xff]  ;;  %v363_v57 = vld [vmem:[#allocation2 + $0x88] sm:$0xff] }
  0x22   : > { %v984_v15 = vsel %vm318_vm0, %v812_v10, %v317_v14  ;;  %447 = vmatpush.msra.mxu1 %v379_v41  ;;  %467 = vmatpush.msra.mxu2 %v380_v42  ;;  %v364_v58 = vld [vmem:[#allocation2 + $0x90] sm:$0xff]  ;;  %v365_v59 = vld [vmem:[#allocation2 + $0x98] sm:$0xff]  ;;  %v358_v60 = vld [vmem:[#allocation2 + $0x60] sm:$0xff] }
  0x23   : > { %487 = vmatpush.msra.mxu3 %v381_v43  ;;  %428 = vmatpush.msra.mxu0 %v374_v44  ;;  %v359_v61 = vld [vmem:[#allocation2 + $0x68] sm:$0xff]  ;;  %v360_v62 = vld [vmem:[#allocation2 + $0x70] sm:$0xff]  ;;  %v361_v63 = vld [vmem:[#allocation2 + $0x78] sm:$0xff] }
  0x24   : > { %448 = vmatpush.msra.mxu1 %v375_v45  ;;  %468 = vmatpush.msra.mxu2 %v376_v46  ;;  %v354_v1 = vld [vmem:[#allocation2 + $0x40] sm:$0xff]  ;;  %v355_v2 = vld [vmem:[#allocation2 + $0x48] sm:$0xff]  ;;  %v356_v3 = vld [vmem:[#allocation2 + $0x50] sm:$0xff] }
  0x25   : > { %488 = vmatpush.msra.mxu3 %v377_v47  ;;  %429 = vmatpush.msra.mxu0 %v370_v48  ;;  %v357_v4 = vld [vmem:[#allocation2 + $0x58] sm:$0xff]  ;;  %v350_v5 = vld [vmem:[#allocation2 + $0x20] sm:$0xff]  ;;  %v351_v6 = vld [vmem:[#allocation2 + $0x28] sm:$0xff] }
  0x26   : > { %449 = vmatpush.msra.mxu1 %v371_v49  ;;  %469 = vmatpush.msra.mxu2 %v372_v50  ;;  %v352_v7 = vld [vmem:[#allocation2 + $0x30] sm:$0xff]  ;;  %v353_v8 = vld [vmem:[#allocation2 + $0x38] sm:$0xff]  ;;  %v346_v9 = vld [vmem:[#allocation2] sm:$0xff] }
  0x27   : > { %489 = vmatpush.msra.mxu3 %v373_v51  ;;  %430 = vmatpush.msra.mxu0 %v366_v52  ;;  %v347_v10 = vld [vmem:[#allocation2 + $0x8] sm:$0xff]  ;;  %v348_v11 = vld [vmem:[#allocation2 + $0x10] sm:$0xff]  ;;  %v349_v12 = vld [vmem:[#allocation2 + $0x18] sm:$0xff] }
  0x28   : > { %450 = vmatpush.msra.mxu1 %v367_v53  ;;  %470 = vmatpush.msra.mxu2 %v368_v54  ;;  %v551_v13 = vld [vmem:[#allocation4 + $0x78] sm:$0xff]  ;;  %v549_v20 = vld [vmem:[#allocation4 + $0x68] sm:$0xff]  ;;  %v548_v25 = vld [vmem:[#allocation4 + $0x60] sm:$0xff] }
  0x29   : > { %490 = vmatpush.msra.mxu3 %v369_v55  ;;  %431 = vmatpush.msra.mxu0 %v362_v56  ;;  %v567_v14 = vld [vmem:[#allocation4 + $0xf8] sm:$0xff]  ;;  %v565_v21 = vld [vmem:[#allocation4 + $0xe8] sm:$0xff]  ;;  %v564_v26 = vld [vmem:[#allocation4 + $0xe0] sm:$0xff] }
  0x2a   : > { %451 = vmatpush.msra.mxu1 %v363_v57  ;;  %471 = vmatpush.msra.mxu2 %v364_v58  ;;  %v583_v22 = vld [vmem:[#allocation4 + $0x178] sm:$0xff]  ;;  %v808_v33 = vld [vmem:[%s1016_s1] ss:$0 sm:$0xff]  ;;  %v582_v41 = vld [vmem:[#allocation4 + $0x170] sm:$0xff] }
  0x2b   : > { %491 = vmatpush.msra.mxu3 %v365_v59  ;;  %432 = vmatpush.msra.mxu0 %v358_v60  ;;  %v599_v24 = vld [vmem:[#allocation4 + $0x1f8] sm:$0xff]  ;;  %v809_v36 = vld [vmem:[%s1017_s2] ss:$0 sm:$0xff]  ;;  %v598_v42 = vld [vmem:[#allocation4 + $0x1f0] sm:$0xff] }
  0x2c   : > { %452 = vmatpush.msra.mxu1 %v359_v61  ;;  %472 = vmatpush.msra.mxu2 %v360_v62  ;;  %v547_v39 = vld [vmem:[#allocation4 + $0x58] sm:$0xff]  ;;  %v546_v43 = vld [vmem:[#allocation4 + $0x50] sm:$0xff]  ;;  %v581_v44 = vld [vmem:[#allocation4 + $0x168] sm:$0xff] }
  0x2d   : > { %492 = vmatpush.msra.mxu3 %v361_v63  ;;  %433 = vmatpush.msra.mxu0 %v354_v1  ;;  %v563_v40 = vld [vmem:[#allocation4 + $0xd8] sm:$0xff]  ;;  %v597_v45 = vld [vmem:[#allocation4 + $0x1e8] sm:$0xff]  ;;  %v580_v48 = vld [vmem:[#allocation4 + $0x160] sm:$0xff] }
  0x2e   : > { %453 = vmatpush.msra.mxu1 %v355_v2  ;;  %473 = vmatpush.msra.mxu2 %v356_v3  ;;  %v545_v46 = vld [vmem:[#allocation4 + $0x48] sm:$0xff]  ;;  %v596_v49 = vld [vmem:[#allocation4 + $0x1e0] sm:$0xff]  ;;  %v579_v52 = vld [vmem:[#allocation4 + $0x158] sm:$0xff] }
  0x2f   : > { %493 = vmatpush.msra.mxu3 %v357_v4  ;;  %434 = vmatpush.msra.mxu0 %v350_v5  ;;  %v561_v47 = vld [vmem:[#allocation4 + $0xc8] sm:$0xff]  ;;  %v544_v50 = vld [vmem:[#allocation4 + $0x40] sm:$0xff]  ;;  %v595_v53 = vld [vmem:[#allocation4 + $0x1d8] sm:$0xff] }
  0x30   : > { %454 = vmatpush.msra.mxu1 %v351_v6  ;;  %474 = vmatpush.msra.mxu2 %v352_v7  ;;  %v560_v51 = vld [vmem:[#allocation4 + $0xc0] sm:$0xff]  ;;  %v543_v54 = vld [vmem:[#allocation4 + $0x38] sm:$0xff]  ;;  %v578_v56 = vld [vmem:[#allocation4 + $0x150] sm:$0xff] }
  0x31   : > { %494 = vmatpush.msra.mxu3 %v353_v8  ;;  %435 = vmatpush.msra.mxu0 %v346_v9  ;;  %v559_v55 = vld [vmem:[#allocation4 + $0xb8] sm:$0xff]  ;;  %v594_v57 = vld [vmem:[#allocation4 + $0x1d0] sm:$0xff]  ;;  %v577_v60 = vld [vmem:[#allocation4 + $0x148] sm:$0xff] }
  0x32   : > { %455 = vmatpush.msra.mxu1 %v347_v10  ;;  %475 = vmatpush.msra.mxu2 %v348_v11  ;;  %v542_v58 = vld [vmem:[#allocation4 + $0x30] sm:$0xff]  ;;  %v593_v61 = vld [vmem:[#allocation4 + $0x1c8] sm:$0xff]  ;;  %v576_v1 = vld [vmem:[#allocation4 + $0x140] sm:$0xff] }
  0x33   : > { %495 = vmatpush.msra.mxu3 %v349_v12  ;;  %604 = vmatpush.msrb.mxu0 %v551_v13  ;;  %v558_v59 = vld [vmem:[#allocation4 + $0xb0] sm:$0xff]  ;;  %v541_v62 = vld [vmem:[#allocation4 + $0x28] sm:$0xff]  ;;  %v592_v2 = vld [vmem:[#allocation4 + $0x1c0] sm:$0xff] }
  0x34   : > { %624 = vmatpush.msrb.mxu1 %v567_v14  ;;  %644 = vmatpush.msrb.mxu2 %v583_v22  ;;  %v557_v63 = vld [vmem:[#allocation4 + $0xa8] sm:$0xff]  ;;  %v540_v3 = vld [vmem:[#allocation4 + $0x20] sm:$0xff]  ;;  %v575_v5 = vld [vmem:[#allocation4 + $0x138] sm:$0xff] }
  0x35   : > { %664 = vmatpush.msrb.mxu3 %v599_v24  ;;  %v556_v4 = vld [vmem:[#allocation4 + $0xa0] sm:$0xff]  ;;  %v591_v6 = vld [vmem:[#allocation4 + $0x1b8] sm:$0xff]  ;;  %v574_v9 = vld [vmem:[#allocation4 + $0x130] sm:$0xff] }
  0x36   : > { %645 = vmatpush.msrb.mxu2 %v582_v41  ;;  %v539_v7 = vld [vmem:[#allocation4 + $0x18] sm:$0xff]  ;;  %v590_v10 = vld [vmem:[#allocation4 + $0x1b0] sm:$0xff]  ;;  %v573_v13 = vld [vmem:[#allocation4 + $0x128] sm:$0xff] }
  0x37   : > { %665 = vmatpush.msrb.mxu3 %v598_v42  ;;  %v555_v8 = vld [vmem:[#allocation4 + $0x98] sm:$0xff]  ;;  %v538_v11 = vld [vmem:[#allocation4 + $0x10] sm:$0xff]  ;;  %v589_v14 = vld [vmem:[#allocation4 + $0x1a8] sm:$0xff] }
  0x38   : > { %646 = vmatpush.msrb.mxu2 %v581_v44  ;;  %v554_v12 = vld [vmem:[#allocation4 + $0x90] sm:$0xff]  ;;  %v552_v22 = vld [vmem:[#allocation4 + $0x80] sm:$0xff]  ;;  %v587_v24 = vld [vmem:[#allocation4 + $0x198] sm:$0xff] }
  0x39   : > { %666 = vmatpush.msrb.mxu3 %v597_v45 }
  0x3a   : > { %647 = vmatpush.msrb.mxu2 %v580_v48 }
  0x3b   : > { %667 = vmatpush.msrb.mxu3 %v596_v49 }
  0x3c   : > { %648 = vmatpush.msrb.mxu2 %v579_v52 }
  0x3d   : > { %668 = vmatpush.msrb.mxu3 %v595_v53 }
  0x3e   : > { %649 = vmatpush.msrb.mxu2 %v578_v56 }
  0x3f   : > { %669 = vmatpush.msrb.mxu3 %v594_v57 }
  0x40   : > { %650 = vmatpush.msrb.mxu2 %v577_v60 }
  0x41   : > { %670 = vmatpush.msrb.mxu3 %v593_v61 }
  0x42   : > { %651 = vmatpush.msrb.mxu2 %v576_v1 }
  0x43   : > { %671 = vmatpush.msrb.mxu3 %v592_v2 }
  0x44   : > { %652 = vmatpush.msrb.mxu2 %v575_v5 }
  0x45   : > { %672 = vmatpush.msrb.mxu3 %v591_v6 }
  0x46   : > { %653 = vmatpush.msrb.mxu2 %v574_v9 }
  0x47   : > { %673 = vmatpush.msrb.mxu3 %v590_v10 }
  0x48   : > { %654 = vmatpush.msrb.mxu2 %v573_v13 }
  0x49   : > { %674 = vmatpush.msrb.mxu3 %v589_v14 }
  0x8b   : > { %v312_v16 = vpop.xlane.xlu0 %311 }
  0x8c   : > { %v320_v17 = vmul.f32 %v984_v15, %v312_v16  ;;  %v550_v16 = vld [vmem:[#allocation4 + $0x70] sm:$0xff] }
  0x8d   : > { %605 = vmatpush.msrb.mxu0 %v550_v16  ;;  %v537_v16 = vld [vmem:[#allocation4 + $0x8] sm:$0xff] }
  0x8e   : > { %v988_v18 = vsub.f32 %v981_v0, %v320_v17  ;;  %v566_v17 = vld [vmem:[#allocation4 + $0xf0] sm:$0xff] }
  0x8f   : > { %625 = vmatpush.msrb.mxu1 %v566_v17  ;;  %606 = vmatpush.msrb.mxu0 %v549_v20  ;;  %v553_v17 = vld [vmem:[#allocation4 + $0x88] sm:$0xff]  ;;  %v588_v20 = vld [vmem:[#allocation4 + $0x1a0] sm:$0xff] }
  0x90   : > { %v322_v19 = vmul.f32 %v988_v18, %v988_v18  ;;  %675 = vmatpush.msrb.mxu3 %v588_v20 }
  0x91   : > { %626 = vmatpush.msrb.mxu1 %v565_v21  ;;  %607 = vmatpush.msrb.mxu0 %v548_v25  ;;  %v536_v21 = vld [vmem:[#allocation4] sm:$0xff]  ;;  %v570_v25 = vld [vmem:[#allocation4 + $0x110] sm:$0xff] }
  0x92   : > { %323 = vadd.xlane.f32.xlu0 %v322_v19  ;;  %676 = vmatpush.msrb.mxu3 %v587_v24 }
  0x93   : > { %627 = vmatpush.msrb.mxu1 %v564_v26  ;;  %608 = vmatpush.msrb.mxu0 %v547_v39  ;;  %v586_v26 = vld [vmem:[#allocation4 + $0x190] sm:$0xff] }
  0x94   : > { %677 = vmatpush.msrb.mxu3 %v586_v26 }
  0x95   : > { %628 = vmatpush.msrb.mxu1 %v563_v40  ;;  %609 = vmatpush.msrb.mxu0 %v546_v43 }
  0x97   : > { %610 = vmatpush.msrb.mxu0 %v545_v46 }
  0x99   : > { %611 = vmatpush.msrb.mxu0 %v544_v50 }
  0x9b   : > { %612 = vmatpush.msrb.mxu0 %v543_v54 }
  0x9d   : > { %613 = vmatpush.msrb.mxu0 %v542_v58 }
  0x9f   : > { %614 = vmatpush.msrb.mxu0 %v541_v62 }
  0xa1   : > { %615 = vmatpush.msrb.mxu0 %v540_v3 }
  0xa3   : > { %616 = vmatpush.msrb.mxu0 %v539_v7 }
  0xa5   : > { %617 = vmatpush.msrb.mxu0 %v538_v11 }
  0xa7   : > { %618 = vmatpush.msrb.mxu0 %v537_v16  ;;  %v810_v16 = vld [vmem:[%s1021_s6] ss:$0 sm:$0xff] }
  0xa9   : > { %619 = vmatpush.msrb.mxu0 %v536_v21 }
 0x105   : > { %v324_v19 = vpop.xlane.xlu0 %323 }
 0x106   : > { %v325_v23 = vmul.f32 %v324_v19, %v984_v15  ;;  %v572_v19 = vld [vmem:[#allocation4 + $0x120] sm:$0xff] }
 0x107   : > { %655 = vmatpush.msrb.mxu2 %v572_v19 }
 0x108   : > { %v326_v27 = vadd.f32 1e-05, %v325_v23  ;;  %v571_v23 = vld [vmem:[#allocation4 + $0x118] sm:$0xff] }
 0x109   : > { %656 = vmatpush.msrb.mxu2 %v571_v23 }
 0x10a   : > { %813 = vrsqrt.f32 %v326_v27  ;;  %vm333_vm2 = vweird.f32 %v326_v27 }
 0x10b   : > { %657 = vmatpush.msrb.mxu2 %v570_v25 }
 0x110   : > { %v814_v28 = vpop.eup %813 }
 0x111   : > { %v328_v29 = vmul.f32 %v814_v28, %v326_v27  ;;  %vm334_vm1 = vweird.f32 %v814_v28  ;;  %v410_v27 = vld [vmem:[%s1019_s4] sm:$0xf] }
 0x112   : > { %vm335_vm3 = vmor %vm333_vm2, %vm334_vm1  ;;  %v414_v39 = vperm.slane %v410_v27, 2  ;;  %v415_v40 = vperm.slane %v410_v27, 3 }
 0x113   : > { %v329_v30 = vmul.f32 %v814_v28, %v328_v29  ;;  %v585_v29 = vld [vmem:[#allocation4 + $0x188] sm:$0xff] }
 0x114   : > { %678 = vmatpush.msrb.mxu3 %v585_v29 }
 0x115   : > { %v330_v31 = vmul.f32 0.5, %v329_v30  ;;  %v568_v30 = vld [vmem:[#allocation4 + $0x100] sm:$0xff] }
 0x117   : > { %v331_v32 = vsub.f32 1.5, %v330_v31  ;;  %v584_v31 = vld [vmem:[#allocation4 + $0x180] sm:$0xff] }
 0x118   : > { %679 = vmatpush.msrb.mxu3 %v584_v31 }
 0x119   : > { %v332_v15 = vmul.f32 %v814_v28, %v331_v32  ;;  %v412_v32 = vperm.slane %v410_v27, 0 }
 0x11b   : > { %v336_v34 = vsel %vm335_vm3, %v814_v28, %v332_v15  ;;  %v569_v28 = vld [vmem:[#allocation4 + $0x108] sm:$0xff]  ;;  %v413_v15 = vperm.slane %v410_v27, 1 }
 0x11c   : > { %v337_v35 = vmul.f32 %v336_v34, %v988_v18  ;;  %v562_v18 = vld [vmem:[#allocation4 + $0xd0] sm:$0xff]  ;;  %658 = vmatpush.msrb.mxu2 %v569_v28 }
 0x11d   : > { %629 = vmatpush.msrb.mxu1 %v562_v18 }
 0x11e   : > { %v341_v37 = vmul.f32 %v808_v33, %v337_v35  ;;  %659 = vmatpush.msrb.mxu2 %v568_v30 }
 0x11f   : > { %630 = vmatpush.msrb.mxu1 %v561_v47 }
 0x120   : > { %v345_v38 = vadd.f32 %v809_v36, %v341_v37 }
 0x121   : > { %631 = vmatpush.msrb.mxu1 %v560_v51 }
 0x122   : > { %436 = vmatmul.f32.vlgmr.msra.gmra.mxu0 %v345_v38  ;;  %456 = vmatmul.f32.vlgmr.msra.gmra.mxu1 %v345_v38 }
 0x123   : > { %476 = vmatmul.f32.vlgmr.msra.gmra.mxu2 %v345_v38  ;;  %496 = vmatmul.f32.vlgmr.msra.gmra.mxu3 %v345_v38 }
 0x124   : > { %632 = vmatpush.msrb.mxu1 %v559_v55 }
 0x126   : > { %633 = vmatpush.msrb.mxu1 %v558_v59 }
 0x128   : > { %634 = vmatpush.msrb.mxu1 %v557_v63 }
 0x12a   : > { %635 = vmatpush.msrb.mxu1 %v556_v4 }
 0x12c   : > { %636 = vmatpush.msrb.mxu1 %v555_v8 }
 0x12e   : > { %637 = vmatpush.msrb.mxu1 %v554_v12 }
 0x130   : > { %638 = vmatpush.msrb.mxu1 %v553_v17 }
 0x132   : > { %639 = vmatpush.msrb.mxu1 %v552_v22 }
 0x19f   : > { %v437_v33 = vpop.f32.mrf.mxu0  ;;  %v457_v34 = vpop.f32.mrf.mxu1 }
 0x1a0   : > { %v438_v35 = vadd.f32 %v437_v33, %v412_v32  ;;  %v458_v36 = vadd.f32 %v457_v34, %v413_v15 }
 0x1a2   : > { %v504_v37 = vmul.f32 0.044715, %v438_v35  ;;  %v505_v38 = vmul.f32 0.044715, %v458_v36  ;;  %v500_v1 = vmul.f32 0.5, %v438_v35  ;;  %v501_v3 = vmul.f32 0.5, %v458_v36 }
 0x1a4   : > { %v508_v41 = vmul.f32 %v504_v37, %v438_v35  ;;  %v509_v42 = vmul.f32 %v505_v38, %v458_v36 }
 0x1a6   : > { %v477_v43 = vpop.f32.mrf.mxu2  ;;  %v497_v18 = vpop.f32.mrf.mxu3  ;;  %v512_v44 = vmul.f32 %v508_v41, %v438_v35  ;;  %v513_v45 = vmul.f32 %v509_v42, %v458_v36 }
 0x1a7   : > { %v478_v46 = vadd.f32 %v477_v43, %v414_v39  ;;  %v498_v47 = vadd.f32 %v497_v18, %v415_v40 }
 0x1a8   : > { %v516_v48 = vadd.f32 %v512_v44, %v438_v35  ;;  %v517_v49 = vadd.f32 %v513_v45, %v458_v36 }
 0x1a9   : > { %v506_v50 = vmul.f32 0.044715, %v478_v46  ;;  %v507_v51 = vmul.f32 0.044715, %v498_v47  ;;  %v502_v9 = vmul.f32 0.5, %v478_v46  ;;  %v503_v11 = vmul.f32 0.5, %v498_v47 }
 0x1aa   : > { %v520_v52 = vmul.f32 0.7978846, %v516_v48  ;;  %v521_v53 = vmul.f32 0.7978846, %v517_v49 }
 0x1ab   : > { %v510_v54 = vmul.f32 %v506_v50, %v478_v46  ;;  %v511_v55 = vmul.f32 %v507_v51, %v498_v47 }
 0x1ac   : > { %815 = vtanh.f32 %v520_v52 }
 0x1ad   : > { %817 = vtanh.f32 %v521_v53  ;;  %v514_v56 = vmul.f32 %v510_v54, %v478_v46  ;;  %v515_v57 = vmul.f32 %v511_v55, %v498_v47 }
 0x1af   : > { %v518_v58 = vadd.f32 %v514_v56, %v478_v46  ;;  %v519_v59 = vadd.f32 %v515_v57, %v498_v47 }
 0x1b1   : > { %v522_v60 = vmul.f32 0.7978846, %v518_v58  ;;  %v523_v61 = vmul.f32 0.7978846, %v519_v59 }
 0x1b2   : > { %v816_v62 = vpop.eup %815 }
 0x1b3   : > { %v818_v63 = vpop.eup %817  ;;  %v528_v2 = vadd.f32 1.0, %v816_v62  ;;  %819 = vtanh.f32 %v522_v60 }
 0x1b4   : > { %v529_v4 = vadd.f32 1.0, %v818_v63  ;;  %821 = vtanh.f32 %v523_v61 }
 0x1b5   : > { %v532_v5 = vmul.f32 %v528_v2, %v500_v1 }
 0x1b6   : > { %v533_v6 = vmul.f32 %v529_v4, %v501_v3 }
 0x1b7   : > { %620 = vmatmul.f32.vlgmr.msrb.gmra.mxu0 %v532_v5 }
 0x1b8   : > { %640 = vmatmul.f32.vlgmr.msrb.gmra.mxu1 %v533_v6 }
 0x1b9   : > { %v820_v7 = vpop.eup %819 }
 0x1ba   : > { %v822_v8 = vpop.eup %821  ;;  %v530_v10 = vadd.f32 1.0, %v820_v7 }
 0x1bb   : > { %v531_v12 = vadd.f32 1.0, %v822_v8 }
 0x1bc   : > { %v534_v13 = vmul.f32 %v530_v10, %v502_v9 }
 0x1bd   : > { %v535_v14 = vmul.f32 %v531_v12, %v503_v11 }
 0x1be   : > { %660 = vmatmul.f32.vlgmr.msrb.gmra.mxu2 %v534_v13 }
 0x1bf   : > { %680 = vmatmul.f32.vlgmr.msrb.gmra.mxu3 %v535_v14 }
 0x234   : > { %v621_v17 = vpop.f32.mrf.mxu0 }
 0x235   : > { %v622_v19 = vadd.f32 %v810_v16, %v621_v17  ;;  %v641_v20 = vpop.f32.mrf.mxu1 }
 0x237   : > { %v642_v21 = vadd.f32 %v641_v20, %v622_v19 }
 0x241   : > { %v661_v22 = vpop.f32.mrf.mxu2 }
 0x242   : > { %v662_v23 = vadd.f32 %v661_v22, %v642_v21  ;;  %v681_v24 = vpop.f32.mrf.mxu3 }
 0x244   : > { %v682_v25 = vadd.f32 %v681_v24, %v662_v23 }
 0x246   : > { %v684_v26 = vadd.f32 %v682_v25, %v981_v0 }
 0x248   : > { %685 = vst [vmem:[%s307_s11] sm:$0xff] %v684_v26 }
 0x249 PF: > { %s19_s24 = sadd.s32 1, %s897_s24  }
 0x24a   : > { %p16_p7 = scmp.ge.s32.totalorder %s19_s24, 4  }
 0x24c   :  { %18 = sbr.rel (!%p16_p7) target bundleno = 2 (0x2), region = 87 }
 0x251   :  { %705 = vsyncpa [#allocation3], 1 }
 0x252   :  { %707 = vsyncpa [#allocation3 + $0x1], 1 }
 0x253   :  { %708 = vsyncpa [#allocation5], 1 }

// kernel: transformer_forward.6
= control target key start
LH: loop header
LB: loop body
LE: loop exit
PB: predicated region body
PF: predicated region fallthrough
CT: control target
= control target key end

     0   :  { %12 = vsyncpa [#allocation3], 0  ;;  %s1179_s0 = inlined_call_operand.vmem [shape: f32[16,128], index: 0, kind: input, shape index: {}]   ;;  %s1180_s1 = inlined_call_operand.vmem [shape: f32[1,128], index: 1, kind: input, shape index: {}]   ;;  %s1181_s2 = inlined_call_operand.vmem [shape: f32[1,128], index: 2, kind: input, shape index: {}]   ;;  %s1182_s3 = inlined_call_operand.hbm [shape: f32[128,512], index: 3, kind: input, shape index: {}]   ;;  %s1183_s4 = inlined_call_operand.hbm [shape: f32[1,512], index: 4, kind: input, shape index: {}]   ;;  %s1184_s5 = inlined_call_operand.hbm [shape: f32[512,128], index: 5, kind: input, shape index: {}]   ;;  %s1185_s6 = inlined_call_operand.hbm [shape: f32[1,128], index: 6, kind: input, shape index: {}]   ;;  %s1186_s7 = inlined_call_operand.vmem [shape: f32[16,128], index: 7, kind: output, shape index: {}]  }
   0x1   :  { %13 = vsyncpa [#allocation5], 0 }
   0x2   :  { %14 = vsyncpa [#allocation8], 0  ;;  %s1084_s24 = smov 0  }
   0x3 LB: > { %s235_s27 = sshll.u32 %s1183_s4, 4  ;;  %s1093_s28 = sadd.s32 4294967295, %s1033_s24   ;;  %s1033_s24 = sphi %s1084_s24, %s20_s24   ;;  %s236_s27 = int_to_ptr.hbm [resolvable:$true] %s235_s27 }
   0x4   : > { %p811_p0 = scmp.ge.s32.totalorder %s1033_s24, 1  ;;  %p203_p1 = scmp.lt.s32.totalorder %s1033_s24, 3 }
   0x5   : > { %p855_p2 = scmp.eq.s32.totalorder %s1093_s28, 0  ;;  %s1035_s30 = smov [#allocation4]  }
   0x6   : > { %p1098_p3 = pnand %p811_p0, %p203_p1  ;;  %s237_s8 = sshll.u32 %s1035_s30, 4  ;;  %s238_s8 = int_to_ptr.vmem [resolvable:$true] %s237_s8 }
   0x7   : > { %s220_s11 = sshll.u32 %s1182_s3, 4  ;;  %s1036_s13 = smov [#allocation2]   ;;  %s221_s11 = int_to_ptr.hbm [resolvable:$true] %s220_s11 }
   0x8   : > { %p842_p4 = pneg %p1098_p3  ;;  %s222_s14 = sshll.u32 %s1036_s13, 4  ;;  %s223_s14 = int_to_ptr.vmem [resolvable:$true] %s222_s14 }
   0x9   : > { %s246_s17 = sshll.u32 %s1184_s5, 4  ;;  %s1037_s18 = smov 512   ;;  %s247_s17 = int_to_ptr.hbm [resolvable:$true] %s246_s17 }
   0xa   : > { %p1109_p5 = pnand %p855_p2, %p842_p4  ;;  %s1038_s19 = smov 32  }
   0xb   : > { %s1039_s20 = smov [#allocation6]   ;;  %s1040_s22 = smov 128  }
   0xc   : > { %848 = dma.hbm_to_vmem [thread:$0]  (!%p1109_p5), %s236_s27, 64, %s238_s8, [#allocation5]  }
   0xd   : > { %845 = dma.hbm_to_vmem [thread:$0]  (!%p1109_p5), %s221_s11, 8192, %s223_s14, [#allocation3], %s1037_s18, %s1037_s18, %s1038_s19  }
   0xe   : > { %s248_s21 = sshll.u32 %s1039_s20, 4  ;;  %s1041_s23 = smov 8   ;;  %s249_s21 = int_to_ptr.vmem [resolvable:$true] %s248_s21 }
   0xf   : > { %851 = dma.hbm_to_vmem [thread:$0]  (!%p1109_p5), %s247_s17, 8192, %s249_s21, [#allocation5], %s1040_s22, %s1040_s22, %s1041_s23  }
  0x10   : > { %s261_s30 = sshll.u32 %s1185_s6, 4  ;;  %s1042_s9 = smov [#allocation7]   ;;  %s262_s30 = int_to_ptr.hbm [resolvable:$true] %s261_s30 }
  0x11   : > { %s263_s27 = sshll.u32 %s1042_s9, 4  ;;  %283 = sbr.rel (%p1098_p3) target bundleno = 594 (0x252), region = 48  ;;  %s264_s27 = int_to_ptr.vmem [resolvable:$true] %s263_s27 }
  0x12   : > { %854 = dma.hbm_to_vmem [thread:$0]  (!%p1109_p5), %s262_s30, 16, %s264_s27, [#allocation8]  }
  0x16   : > { %1020 = dma.done.wait (%p855_p2), [#allocation3], 8192  }
  0x17   : > { %1022 = vsyncadd (%p855_p2), [#allocation3], 4294959104 }
  0x18   : > { %1024 = dma.done.wait (%p855_p2), [#allocation5], 8256  }
  0x19   : > { %1026 = vsyncadd (%p855_p2), [#allocation5], 4294959040 }
  0x1a   : > { %1028 = dma.done.wait (%p855_p2), [#allocation8], 16  }
  0x1b   : > { %1030 = vsyncadd (%p855_p2), [#allocation8], 4294967280  ;;  %p329_p6 = scmp.lt.s32.totalorder %s1093_s28, 1  ;;  %v1043_v1 = vmov 128.0   ;;  %v435_v2 = vld [vmem:[#allocation2 + $0x1e0] sm:$0xff]  ;;  %v436_v3 = vld [vmem:[#allocation2 + $0x1e8] sm:$0xff] }
  0x1c   : > { %883 = vrcp.f32 %v1043_v1  ;;  %v437_v4 = vld [vmem:[#allocation2 + $0x1f0] sm:$0xff]  ;;  %449 = vmatpush.msra.mxu0 %v435_v2  ;;  %469 = vmatpush.msra.mxu1 %v436_v3  ;;  %v438_v5 = vld [vmem:[#allocation2 + $0x1f8] sm:$0xff]  ;;  %v431_v6 = vld [vmem:[#allocation2 + $0x1c0] sm:$0xff] }
  0x1d   : > { %s1190_s28 = smov (!%p329_p6, %s1093_s28), 1  ;;  %v432_v7 = vld [vmem:[#allocation2 + $0x1c8] sm:$0xff]  ;;  %489 = vmatpush.msra.mxu2 %v437_v4  ;;  %509 = vmatpush.msra.mxu3 %v438_v5  ;;  %v433_v8 = vld [vmem:[#allocation2 + $0x1d0] sm:$0xff]  ;;  %v434_v9 = vld [vmem:[#allocation2 + $0x1d8] sm:$0xff] }
  0x1e   : > { %s822_s29 = sshll.u32 %s1190_s28, 3  ;;  %450 = vmatpush.msra.mxu0 %v431_v6  ;;  %470 = vmatpush.msra.mxu1 %v432_v7  ;;  %v427_v20 = vld [vmem:[#allocation2 + $0x1a0] sm:$0xff]  ;;  %v428_v21 = vld [vmem:[#allocation2 + $0x1a8] sm:$0xff]  ;;  %v429_v22 = vld [vmem:[#allocation2 + $0x1b0] sm:$0xff] }
  0x1f   : > { %s332_s11 = scalar_lea.vmem %s1179_s0, %s822_s29  ;;  %490 = vmatpush.msra.mxu2 %v433_v8  ;;  %510 = vmatpush.msra.mxu3 %v434_v9  ;;  %v430_v23 = vld [vmem:[#allocation2 + $0x1b8] sm:$0xff]  ;;  %v423_v24 = vld [vmem:[#allocation2 + $0x180] sm:$0xff]  ;;  %v424_v25 = vld [vmem:[#allocation2 + $0x188] sm:$0xff]  ;;  %s336_s18 = scalar_lea.vmem %s1186_s7, %s822_s29 }
  0x20   : > { %v1151_v0 = vld [vmem:[%s332_s11] sm:$0xff]  ;;  %451 = vmatpush.msra.mxu0 %v427_v20  ;;  %471 = vmatpush.msra.mxu1 %v428_v21  ;;  %v425_v26 = vld [vmem:[#allocation2 + $0x190] sm:$0xff]  ;;  %v426_v27 = vld [vmem:[#allocation2 + $0x198] sm:$0xff] }
  0x21   : > { %340 = vadd.xlane.f32.xlu0 %v1151_v0  ;;  %491 = vmatpush.msra.mxu2 %v429_v22  ;;  %v419_v28 = vld [vmem:[#allocation2 + $0x160] sm:$0xff]  ;;  %v420_v29 = vld [vmem:[#allocation2 + $0x168] sm:$0xff]  ;;  %v421_v30 = vld [vmem:[#allocation2 + $0x170] sm:$0xff] }
  0x22   : > { %v884_v10 = vpop.eup %883  ;;  %511 = vmatpush.msra.mxu3 %v430_v23  ;;  %452 = vmatpush.msra.mxu0 %v423_v24  ;;  %v422_v31 = vld [vmem:[#allocation2 + $0x178] sm:$0xff]  ;;  %v415_v32 = vld [vmem:[#allocation2 + $0x140] sm:$0xff]  ;;  %v416_v33 = vld [vmem:[#allocation2 + $0x148] sm:$0xff] }
  0x23   : > { %v343_v11 = vmul.f32 128.0, %v884_v10  ;;  %vm347_vm0 = vweird.f32 %v884_v10  ;;  %472 = vmatpush.msra.mxu1 %v424_v25  ;;  %492 = vmatpush.msra.mxu2 %v425_v26  ;;  %v417_v34 = vld [vmem:[#allocation2 + $0x150] sm:$0xff]  ;;  %v418_v35 = vld [vmem:[#allocation2 + $0x158] sm:$0xff]  ;;  %v411_v36 = vld [vmem:[#allocation2 + $0x120] sm:$0xff] }
  0x24   : > { %512 = vmatpush.msra.mxu3 %v426_v27  ;;  %453 = vmatpush.msra.mxu0 %v419_v28  ;;  %v412_v37 = vld [vmem:[#allocation2 + $0x128] sm:$0xff]  ;;  %v413_v38 = vld [vmem:[#allocation2 + $0x130] sm:$0xff]  ;;  %v414_v39 = vld [vmem:[#allocation2 + $0x138] sm:$0xff] }
  0x25   : > { %v344_v12 = vsub.f32 1.0, %v343_v11  ;;  %473 = vmatpush.msra.mxu1 %v420_v29  ;;  %493 = vmatpush.msra.mxu2 %v421_v30  ;;  %v407_v40 = vld [vmem:[#allocation2 + $0x100] sm:$0xff]  ;;  %v408_v41 = vld [vmem:[#allocation2 + $0x108] sm:$0xff]  ;;  %v409_v42 = vld [vmem:[#allocation2 + $0x110] sm:$0xff] }
  0x26   : > { %513 = vmatpush.msra.mxu3 %v422_v31  ;;  %454 = vmatpush.msra.mxu0 %v415_v32  ;;  %v410_v43 = vld [vmem:[#allocation2 + $0x118] sm:$0xff]  ;;  %v403_v44 = vld [vmem:[#allocation2 + $0xe0] sm:$0xff]  ;;  %v404_v45 = vld [vmem:[#allocation2 + $0xe8] sm:$0xff] }
  0x27   : > { %v345_v13 = vmul.f32 %v884_v10, %v344_v12  ;;  %474 = vmatpush.msra.mxu1 %v416_v33  ;;  %494 = vmatpush.msra.mxu2 %v417_v34  ;;  %v405_v46 = vld [vmem:[#allocation2 + $0xf0] sm:$0xff]  ;;  %v406_v47 = vld [vmem:[#allocation2 + $0xf8] sm:$0xff]  ;;  %v399_v48 = vld [vmem:[#allocation2 + $0xc0] sm:$0xff] }
  0x28   : > { %514 = vmatpush.msra.mxu3 %v418_v35  ;;  %455 = vmatpush.msra.mxu0 %v411_v36  ;;  %v400_v49 = vld [vmem:[#allocation2 + $0xc8] sm:$0xff]  ;;  %v401_v50 = vld [vmem:[#allocation2 + $0xd0] sm:$0xff]  ;;  %v402_v51 = vld [vmem:[#allocation2 + $0xd8] sm:$0xff] }
  0x29   : > { %v346_v14 = vadd.f32 %v884_v10, %v345_v13  ;;  %475 = vmatpush.msra.mxu1 %v412_v37  ;;  %495 = vmatpush.msra.mxu2 %v413_v38  ;;  %v395_v52 = vld [vmem:[#allocation2 + $0xa0] sm:$0xff]  ;;  %v396_v53 = vld [vmem:[#allocation2 + $0xa8] sm:$0xff]  ;;  %v397_v54 = vld [vmem:[#allocation2 + $0xb0] sm:$0xff] }
  0x2a   : > { %515 = vmatpush.msra.mxu3 %v414_v39  ;;  %456 = vmatpush.msra.mxu0 %v407_v40  ;;  %v398_v55 = vld [vmem:[#allocation2 + $0xb8] sm:$0xff]  ;;  %v391_v56 = vld [vmem:[#allocation2 + $0x80] sm:$0xff]  ;;  %v392_v57 = vld [vmem:[#allocation2 + $0x88] sm:$0xff] }
  0x2b   : > { %v1154_v15 = vsel %vm347_vm0, %v884_v10, %v346_v14  ;;  %476 = vmatpush.msra.mxu1 %v408_v41  ;;  %496 = vmatpush.msra.mxu2 %v409_v42  ;;  %v393_v58 = vld [vmem:[#allocation2 + $0x90] sm:$0xff]  ;;  %v394_v59 = vld [vmem:[#allocation2 + $0x98] sm:$0xff]  ;;  %v387_v60 = vld [vmem:[#allocation2 + $0x60] sm:$0xff] }
  0x2c   : > { %516 = vmatpush.msra.mxu3 %v410_v43  ;;  %457 = vmatpush.msra.mxu0 %v403_v44  ;;  %v388_v61 = vld [vmem:[#allocation2 + $0x68] sm:$0xff]  ;;  %v389_v62 = vld [vmem:[#allocation2 + $0x70] sm:$0xff]  ;;  %v390_v63 = vld [vmem:[#allocation2 + $0x78] sm:$0xff] }
  0x2d   : > { %477 = vmatpush.msra.mxu1 %v404_v45  ;;  %497 = vmatpush.msra.mxu2 %v405_v46  ;;  %v383_v1 = vld [vmem:[#allocation2 + $0x40] sm:$0xff]  ;;  %v384_v2 = vld [vmem:[#allocation2 + $0x48] sm:$0xff]  ;;  %v385_v3 = vld [vmem:[#allocation2 + $0x50] sm:$0xff] }
  0x2e   : > { %517 = vmatpush.msra.mxu3 %v406_v47  ;;  %458 = vmatpush.msra.mxu0 %v399_v48  ;;  %v386_v4 = vld [vmem:[#allocation2 + $0x58] sm:$0xff]  ;;  %v379_v5 = vld [vmem:[#allocation2 + $0x20] sm:$0xff]  ;;  %v380_v6 = vld [vmem:[#allocation2 + $0x28] sm:$0xff] }
  0x2f   : > { %478 = vmatpush.msra.mxu1 %v400_v49  ;;  %498 = vmatpush.msra.mxu2 %v401_v50  ;;  %v381_v7 = vld [vmem:[#allocation2 + $0x30] sm:$0xff]  ;;  %v382_v8 = vld [vmem:[#allocation2 + $0x38] sm:$0xff]  ;;  %v375_v9 = vld [vmem:[#allocation2] sm:$0xff] }
  0x30   : > { %518 = vmatpush.msra.mxu3 %v402_v51  ;;  %459 = vmatpush.msra.mxu0 %v395_v52  ;;  %v376_v10 = vld [vmem:[#allocation2 + $0x8] sm:$0xff]  ;;  %v377_v11 = vld [vmem:[#allocation2 + $0x10] sm:$0xff]  ;;  %v378_v12 = vld [vmem:[#allocation2 + $0x18] sm:$0xff] }
  0x31   : > { %479 = vmatpush.msra.mxu1 %v396_v53  ;;  %499 = vmatpush.msra.mxu2 %v397_v54  ;;  %v580_v13 = vld [vmem:[#allocation6 + $0x78] sm:$0xff]  ;;  %v578_v20 = vld [vmem:[#allocation6 + $0x68] sm:$0xff]  ;;  %v577_v25 = vld [vmem:[#allocation6 + $0x60] sm:$0xff] }
  0x32   : > { %519 = vmatpush.msra.mxu3 %v398_v55  ;;  %460 = vmatpush.msra.mxu0 %v391_v56  ;;  %v596_v14 = vld [vmem:[#allocation6 + $0xf8] sm:$0xff]  ;;  %v594_v21 = vld [vmem:[#allocation6 + $0xe8] sm:$0xff]  ;;  %v593_v26 = vld [vmem:[#allocation6 + $0xe0] sm:$0xff] }
  0x33   : > { %480 = vmatpush.msra.mxu1 %v392_v57  ;;  %500 = vmatpush.msra.mxu2 %v393_v58  ;;  %v612_v22 = vld [vmem:[#allocation6 + $0x178] sm:$0xff]  ;;  %v611_v41 = vld [vmem:[#allocation6 + $0x170] sm:$0xff]  ;;  %v610_v44 = vld [vmem:[#allocation6 + $0x168] sm:$0xff] }
  0x34   : > { %520 = vmatpush.msra.mxu3 %v394_v59  ;;  %461 = vmatpush.msra.mxu0 %v387_v60  ;;  %v628_v24 = vld [vmem:[#allocation6 + $0x1f8] sm:$0xff]  ;;  %v627_v42 = vld [vmem:[#allocation6 + $0x1f0] sm:$0xff]  ;;  %v626_v45 = vld [vmem:[#allocation6 + $0x1e8] sm:$0xff] }
  0x35   : > { %481 = vmatpush.msra.mxu1 %v388_v61  ;;  %501 = vmatpush.msra.mxu2 %v389_v62  ;;  %v880_v33 = vld [vmem:[%s1180_s1] ss:$0 sm:$0xff]  ;;  %v575_v43 = vld [vmem:[#allocation6 + $0x50] sm:$0xff]  ;;  %v574_v46 = vld [vmem:[#allocation6 + $0x48] sm:$0xff] }
  0x36   : > { %521 = vmatpush.msra.mxu3 %v390_v63  ;;  %462 = vmatpush.msra.mxu0 %v383_v1  ;;  %v881_v36 = vld [vmem:[%s1181_s2] ss:$0 sm:$0xff]  ;;  %v590_v47 = vld [vmem:[#allocation6 + $0xc8] sm:$0xff]  ;;  %v609_v48 = vld [vmem:[#allocation6 + $0x160] sm:$0xff] }
  0x37   : > { %482 = vmatpush.msra.mxu1 %v384_v2  ;;  %502 = vmatpush.msra.mxu2 %v385_v3  ;;  %v576_v39 = vld [vmem:[#allocation6 + $0x58] sm:$0xff]  ;;  %v625_v49 = vld [vmem:[#allocation6 + $0x1e0] sm:$0xff]  ;;  %v607_v56 = vld [vmem:[#allocation6 + $0x150] sm:$0xff] }
  0x38   : > { %522 = vmatpush.msra.mxu3 %v386_v4  ;;  %463 = vmatpush.msra.mxu0 %v379_v5  ;;  %v592_v40 = vld [vmem:[#allocation6 + $0xd8] sm:$0xff]  ;;  %v573_v50 = vld [vmem:[#allocation6 + $0x40] sm:$0xff]  ;;  %v623_v57 = vld [vmem:[#allocation6 + $0x1d0] sm:$0xff] }
  0x39   : > { %483 = vmatpush.msra.mxu1 %v380_v6  ;;  %503 = vmatpush.msra.mxu2 %v381_v7  ;;  %v589_v51 = vld [vmem:[#allocation6 + $0xc0] sm:$0xff]  ;;  %v608_v52 = vld [vmem:[#allocation6 + $0x158] sm:$0xff]  ;;  %v571_v58 = vld [vmem:[#allocation6 + $0x30] sm:$0xff] }
  0x3a   : > { %523 = vmatpush.msra.mxu3 %v382_v8  ;;  %464 = vmatpush.msra.mxu0 %v375_v9  ;;  %v624_v53 = vld [vmem:[#allocation6 + $0x1d8] sm:$0xff]  ;;  %v587_v59 = vld [vmem:[#allocation6 + $0xb0] sm:$0xff]  ;;  %v606_v60 = vld [vmem:[#allocation6 + $0x148] sm:$0xff] }
  0x3b   : > { %484 = vmatpush.msra.mxu1 %v376_v10  ;;  %504 = vmatpush.msra.mxu2 %v377_v11  ;;  %v572_v54 = vld [vmem:[#allocation6 + $0x38] sm:$0xff]  ;;  %v622_v61 = vld [vmem:[#allocation6 + $0x1c8] sm:$0xff]  ;;  %v605_v1 = vld [vmem:[#allocation6 + $0x140] sm:$0xff] }
  0x3c   : > { %524 = vmatpush.msra.mxu3 %v378_v12  ;;  %633 = vmatpush.msrb.mxu0 %v580_v13  ;;  %v588_v55 = vld [vmem:[#allocation6 + $0xb8] sm:$0xff]  ;;  %v570_v62 = vld [vmem:[#allocation6 + $0x28] sm:$0xff]  ;;  %v621_v2 = vld [vmem:[#allocation6 + $0x1c0] sm:$0xff] }
  0x3d   : > { %653 = vmatpush.msrb.mxu1 %v596_v14  ;;  %673 = vmatpush.msrb.mxu2 %v612_v22  ;;  %v586_v63 = vld [vmem:[#allocation6 + $0xa8] sm:$0xff]  ;;  %v569_v3 = vld [vmem:[#allocation6 + $0x20] sm:$0xff]  ;;  %v604_v5 = vld [vmem:[#allocation6 + $0x138] sm:$0xff] }
  0x3e   : > { %693 = vmatpush.msrb.mxu3 %v628_v24  ;;  %v585_v4 = vld [vmem:[#allocation6 + $0xa0] sm:$0xff]  ;;  %v620_v6 = vld [vmem:[#allocation6 + $0x1b8] sm:$0xff]  ;;  %v603_v9 = vld [vmem:[#allocation6 + $0x130] sm:$0xff] }
  0x3f   : > { %674 = vmatpush.msrb.mxu2 %v611_v41  ;;  %v568_v7 = vld [vmem:[#allocation6 + $0x18] sm:$0xff]  ;;  %v619_v10 = vld [vmem:[#allocation6 + $0x1b0] sm:$0xff]  ;;  %v602_v13 = vld [vmem:[#allocation6 + $0x128] sm:$0xff] }
  0x40   : > { %694 = vmatpush.msrb.mxu3 %v627_v42  ;;  %v584_v8 = vld [vmem:[#allocation6 + $0x98] sm:$0xff]  ;;  %v567_v11 = vld [vmem:[#allocation6 + $0x10] sm:$0xff]  ;;  %v618_v14 = vld [vmem:[#allocation6 + $0x1a8] sm:$0xff] }
  0x41   : > { %675 = vmatpush.msrb.mxu2 %v610_v44  ;;  %v583_v12 = vld [vmem:[#allocation6 + $0x90] sm:$0xff]  ;;  %v581_v22 = vld [vmem:[#allocation6 + $0x80] sm:$0xff]  ;;  %v616_v24 = vld [vmem:[#allocation6 + $0x198] sm:$0xff] }
  0x42   : > { %695 = vmatpush.msrb.mxu3 %v626_v45 }
  0x43   : > { %676 = vmatpush.msrb.mxu2 %v609_v48 }
  0x44   : > { %696 = vmatpush.msrb.mxu3 %v625_v49 }
  0x45   : > { %677 = vmatpush.msrb.mxu2 %v608_v52 }
  0x46   : > { %697 = vmatpush.msrb.mxu3 %v624_v53 }
  0x47   : > { %678 = vmatpush.msrb.mxu2 %v607_v56 }
  0x48   : > { %698 = vmatpush.msrb.mxu3 %v623_v57 }
  0x49   : > { %679 = vmatpush.msrb.mxu2 %v606_v60 }
  0x4a   : > { %699 = vmatpush.msrb.mxu3 %v622_v61 }
  0x4b   : > { %680 = vmatpush.msrb.mxu2 %v605_v1 }
  0x4c   : > { %700 = vmatpush.msrb.mxu3 %v621_v2 }
  0x4d   : > { %681 = vmatpush.msrb.mxu2 %v604_v5 }
  0x4e   : > { %701 = vmatpush.msrb.mxu3 %v620_v6 }
  0x4f   : > { %682 = vmatpush.msrb.mxu2 %v603_v9 }
  0x50   : > { %702 = vmatpush.msrb.mxu3 %v619_v10 }
  0x51   : > { %683 = vmatpush.msrb.mxu2 %v602_v13 }
  0x52   : > { %703 = vmatpush.msrb.mxu3 %v618_v14 }
  0x94   : > { %v341_v16 = vpop.xlane.xlu0 %340 }
  0x95   : > { %v349_v17 = vmul.f32 %v1154_v15, %v341_v16  ;;  %v579_v16 = vld [vmem:[#allocation6 + $0x70] sm:$0xff] }
  0x96   : > { %634 = vmatpush.msrb.mxu0 %v579_v16  ;;  %v566_v16 = vld [vmem:[#allocation6 + $0x8] sm:$0xff] }
  0x97   : > { %v1158_v18 = vsub.f32 %v1151_v0, %v349_v17  ;;  %v595_v17 = vld [vmem:[#allocation6 + $0xf0] sm:$0xff] }
  0x98   : > { %654 = vmatpush.msrb.mxu1 %v595_v17  ;;  %635 = vmatpush.msrb.mxu0 %v578_v20  ;;  %v582_v17 = vld [vmem:[#allocation6 + $0x88] sm:$0xff]  ;;  %v617_v20 = vld [vmem:[#allocation6 + $0x1a0] sm:$0xff] }
  0x99   : > { %v351_v19 = vmul.f32 %v1158_v18, %v1158_v18  ;;  %704 = vmatpush.msrb.mxu3 %v617_v20 }
  0x9a   : > { %655 = vmatpush.msrb.mxu1 %v594_v21  ;;  %636 = vmatpush.msrb.mxu0 %v577_v25  ;;  %v565_v21 = vld [vmem:[#allocation6] sm:$0xff]  ;;  %v599_v25 = vld [vmem:[#allocation6 + $0x110] sm:$0xff] }
  0x9b   : > { %352 = vadd.xlane.f32.xlu0 %v351_v19  ;;  %705 = vmatpush.msrb.mxu3 %v616_v24 }
  0x9c   : > { %656 = vmatpush.msrb.mxu1 %v593_v26  ;;  %637 = vmatpush.msrb.mxu0 %v576_v39  ;;  %v615_v26 = vld [vmem:[#allocation6 + $0x190] sm:$0xff] }
  0x9d   : > { %706 = vmatpush.msrb.mxu3 %v615_v26 }
  0x9e   : > { %657 = vmatpush.msrb.mxu1 %v592_v40  ;;  %638 = vmatpush.msrb.mxu0 %v575_v43 }
  0xa0   : > { %639 = vmatpush.msrb.mxu0 %v574_v46 }
  0xa2   : > { %640 = vmatpush.msrb.mxu0 %v573_v50 }
  0xa4   : > { %641 = vmatpush.msrb.mxu0 %v572_v54 }
  0xa6   : > { %642 = vmatpush.msrb.mxu0 %v571_v58 }
  0xa8   : > { %643 = vmatpush.msrb.mxu0 %v570_v62 }
  0xaa   : > { %644 = vmatpush.msrb.mxu0 %v569_v3 }
  0xac   : > { %645 = vmatpush.msrb.mxu0 %v568_v7 }
  0xae   : > { %646 = vmatpush.msrb.mxu0 %v567_v11 }
  0xb0   : > { %647 = vmatpush.msrb.mxu0 %v566_v16  ;;  %v882_v16 = vld [vmem:[#allocation7] ss:$0 sm:$0xff] }
  0xb2   : > { %648 = vmatpush.msrb.mxu0 %v565_v21 }
 0x10e   : > { %v353_v19 = vpop.xlane.xlu0 %352 }
 0x10f   : > { %v354_v23 = vmul.f32 %v353_v19, %v1154_v15  ;;  %v601_v19 = vld [vmem:[#allocation6 + $0x120] sm:$0xff] }
 0x110   : > { %684 = vmatpush.msrb.mxu2 %v601_v19 }
 0x111   : > { %v355_v27 = vadd.f32 1e-05, %v354_v23  ;;  %v600_v23 = vld [vmem:[#allocation6 + $0x118] sm:$0xff] }
 0x112   : > { %685 = vmatpush.msrb.mxu2 %v600_v23 }
 0x113   : > { %885 = vrsqrt.f32 %v355_v27  ;;  %vm362_vm2 = vweird.f32 %v355_v27 }
 0x114   : > { %686 = vmatpush.msrb.mxu2 %v599_v25 }
 0x119   : > { %v886_v28 = vpop.eup %885 }
 0x11a   : > { %v357_v29 = vmul.f32 %v886_v28, %v355_v27  ;;  %vm363_vm1 = vweird.f32 %v886_v28  ;;  %v439_v27 = vld [vmem:[#allocation4] sm:$0xf] }
 0x11b   : > { %vm364_vm3 = vmor %vm362_vm2, %vm363_vm1  ;;  %v443_v39 = vperm.slane %v439_v27, 2  ;;  %v444_v40 = vperm.slane %v439_v27, 3 }
 0x11c   : > { %v358_v30 = vmul.f32 %v886_v28, %v357_v29  ;;  %v614_v29 = vld [vmem:[#allocation6 + $0x188] sm:$0xff] }
 0x11d   : > { %707 = vmatpush.msrb.mxu3 %v614_v29 }
 0x11e   : > { %v359_v31 = vmul.f32 0.5, %v358_v30  ;;  %v597_v30 = vld [vmem:[#allocation6 + $0x100] sm:$0xff] }
 0x120   : > { %v360_v32 = vsub.f32 1.5, %v359_v31  ;;  %v613_v31 = vld [vmem:[#allocation6 + $0x180] sm:$0xff] }
 0x121   : > { %708 = vmatpush.msrb.mxu3 %v613_v31 }
 0x122   : > { %v361_v15 = vmul.f32 %v886_v28, %v360_v32  ;;  %v441_v32 = vperm.slane %v439_v27, 0 }
 0x124   : > { %v365_v34 = vsel %vm364_vm3, %v886_v28, %v361_v15  ;;  %v598_v28 = vld [vmem:[#allocation6 + $0x108] sm:$0xff]  ;;  %v442_v15 = vperm.slane %v439_v27, 1 }
 0x125   : > { %v366_v35 = vmul.f32 %v365_v34, %v1158_v18  ;;  %v591_v18 = vld [vmem:[#allocation6 + $0xd0] sm:$0xff]  ;;  %687 = vmatpush.msrb.mxu2 %v598_v28 }
 0x126   : > { %658 = vmatpush.msrb.mxu1 %v591_v18 }
 0x127   : > { %v370_v37 = vmul.f32 %v880_v33, %v366_v35  ;;  %688 = vmatpush.msrb.mxu2 %v597_v30 }
 0x128   : > { %659 = vmatpush.msrb.mxu1 %v590_v47 }
 0x129   : > { %v374_v38 = vadd.f32 %v881_v36, %v370_v37 }
 0x12a   : > { %660 = vmatpush.msrb.mxu1 %v589_v51 }
 0x12b   : > { %465 = vmatmul.f32.vlgmr.msra.gmra.mxu0 %v374_v38  ;;  %485 = vmatmul.f32.vlgmr.msra.gmra.mxu1 %v374_v38 }
 0x12c   : > { %505 = vmatmul.f32.vlgmr.msra.gmra.mxu2 %v374_v38  ;;  %525 = vmatmul.f32.vlgmr.msra.gmra.mxu3 %v374_v38 }
 0x12d   : > { %661 = vmatpush.msrb.mxu1 %v588_v55 }
 0x12f   : > { %662 = vmatpush.msrb.mxu1 %v587_v59 }
 0x131   : > { %663 = vmatpush.msrb.mxu1 %v586_v63 }
 0x133   : > { %664 = vmatpush.msrb.mxu1 %v585_v4 }
 0x135   : > { %665 = vmatpush.msrb.mxu1 %v584_v8 }
 0x137   : > { %666 = vmatpush.msrb.mxu1 %v583_v12 }
 0x139   : > { %667 = vmatpush.msrb.mxu1 %v582_v17 }
 0x13b   : > { %668 = vmatpush.msrb.mxu1 %v581_v22 }
 0x1a8   : > { %v466_v33 = vpop.f32.mrf.mxu0  ;;  %v486_v34 = vpop.f32.mrf.mxu1 }
 0x1a9   : > { %v467_v35 = vadd.f32 %v466_v33, %v441_v32  ;;  %v487_v36 = vadd.f32 %v486_v34, %v442_v15 }
 0x1ab   : > { %v533_v37 = vmul.f32 0.044715, %v467_v35  ;;  %v534_v38 = vmul.f32 0.044715, %v487_v36  ;;  %v529_v1 = vmul.f32 0.5, %v467_v35  ;;  %v530_v3 = vmul.f32 0.5, %v487_v36 }
 0x1ad   : > { %v537_v41 = vmul.f32 %v533_v37, %v467_v35  ;;  %v538_v42 = vmul.f32 %v534_v38, %v487_v36 }
 0x1af   : > { %v506_v43 = vpop.f32.mrf.mxu2  ;;  %v526_v18 = vpop.f32.mrf.mxu3  ;;  %v541_v44 = vmul.f32 %v537_v41, %v467_v35  ;;  %v542_v45 = vmul.f32 %v538_v42, %v487_v36 }
 0x1b0   : > { %v507_v46 = vadd.f32 %v506_v43, %v443_v39  ;;  %v527_v47 = vadd.f32 %v526_v18, %v444_v40 }
 0x1b1   : > { %v545_v48 = vadd.f32 %v541_v44, %v467_v35  ;;  %v546_v49 = vadd.f32 %v542_v45, %v487_v36 }
 0x1b2   : > { %v535_v50 = vmul.f32 0.044715, %v507_v46  ;;  %v536_v51 = vmul.f32 0.044715, %v527_v47  ;;  %v531_v9 = vmul.f32 0.5, %v507_v46  ;;  %v532_v11 = vmul.f32 0.5, %v527_v47 }
 0x1b3   : > { %v549_v52 = vmul.f32 0.7978846, %v545_v48  ;;  %v550_v53 = vmul.f32 0.7978846, %v546_v49 }
 0x1b4   : > { %v539_v54 = vmul.f32 %v535_v50, %v507_v46  ;;  %v540_v55 = vmul.f32 %v536_v51, %v527_v47 }
 0x1b5   : > { %887 = vtanh.f32 %v549_v52 }
 0x1b6   : > { %889 = vtanh.f32 %v550_v53  ;;  %v543_v56 = vmul.f32 %v539_v54, %v507_v46  ;;  %v544_v57 = vmul.f32 %v540_v55, %v527_v47 }
 0x1b8   : > { %v547_v58 = vadd.f32 %v543_v56, %v507_v46  ;;  %v548_v59 = vadd.f32 %v544_v57, %v527_v47 }
 0x1ba   : > { %v551_v60 = vmul.f32 0.7978846, %v547_v58  ;;  %v552_v61 = vmul.f32 0.7978846, %v548_v59 }
 0x1bb   : > { %v888_v62 = vpop.eup %887 }
 0x1bc   : > { %v890_v63 = vpop.eup %889  ;;  %v557_v2 = vadd.f32 1.0, %v888_v62  ;;  %891 = vtanh.f32 %v551_v60 }
 0x1bd   : > { %v558_v4 = vadd.f32 1.0, %v890_v63  ;;  %893 = vtanh.f32 %v552_v61 }
 0x1be   : > { %v561_v5 = vmul.f32 %v557_v2, %v529_v1 }
 0x1bf   : > { %v562_v6 = vmul.f32 %v558_v4, %v530_v3 }
 0x1c0   : > { %649 = vmatmul.f32.vlgmr.msrb.gmra.mxu0 %v561_v5 }
 0x1c1   : > { %669 = vmatmul.f32.vlgmr.msrb.gmra.mxu1 %v562_v6 }
 0x1c2   : > { %v892_v7 = vpop.eup %891 }
 0x1c3   : > { %v894_v8 = vpop.eup %893  ;;  %v559_v10 = vadd.f32 1.0, %v892_v7 }
 0x1c4   : > { %v560_v12 = vadd.f32 1.0, %v894_v8 }
 0x1c5   : > { %v563_v13 = vmul.f32 %v559_v10, %v531_v9 }
 0x1c6   : > { %v564_v14 = vmul.f32 %v560_v12, %v532_v11 }
 0x1c7   : > { %689 = vmatmul.f32.vlgmr.msrb.gmra.mxu2 %v563_v13 }
 0x1c8   : > { %709 = vmatmul.f32.vlgmr.msrb.gmra.mxu3 %v564_v14 }
 0x23d   : > { %v650_v17 = vpop.f32.mrf.mxu0 }
 0x23e   : > { %v651_v19 = vadd.f32 %v882_v16, %v650_v17  ;;  %v670_v20 = vpop.f32.mrf.mxu1 }
 0x240   : > { %v671_v21 = vadd.f32 %v670_v20, %v651_v19 }
 0x24a   : > { %v690_v22 = vpop.f32.mrf.mxu2 }
 0x24b   : > { %v691_v23 = vadd.f32 %v690_v22, %v671_v21  ;;  %v710_v24 = vpop.f32.mrf.mxu3 }
 0x24d   : > { %v711_v25 = vadd.f32 %v710_v24, %v691_v23 }
 0x24f   : > { %v713_v26 = vadd.f32 %v711_v25, %v1151_v0 }
 0x251   : > { %714 = vst [vmem:[%s336_s18] sm:$0xff] %v713_v26 }
 0x252 PF: > { %s20_s24 = sadd.s32 1, %s1033_s24  }
 0x253   : > { %p17_p7 = scmp.ge.s32.totalorder %s20_s24, 4  }
 0x255   :  { %19 = sbr.rel (!%p17_p7) target bundleno = 3 (0x3), region = 95 }
 0x25a   :  { %734 = vsyncpa [#allocation3], 1 }
 0x25b   :  { %736 = vsyncpa [#allocation3 + $0x1], 1 }
 0x25c   :  { %737 = vsyncpa [#allocation5], 1 }
 0x25d   :  { %738 = vsyncpa [#allocation8], 1 }

// kernel: transformer_forward.7
= control target key start
LH: loop header
LB: loop body
LE: loop exit
PB: predicated region body
PF: predicated region fallthrough
CT: control target
= control target key end

     0   :  { %12 = vsyncpa [#allocation3], 0  ;;  %s1177_s0 = inlined_call_operand.vmem [shape: f32[2,8,128], index: 0, kind: input, shape index: {}]   ;;  %s1178_s1 = inlined_call_operand.vmem [shape: f32[1,128], index: 1, kind: input, shape index: {}]   ;;  %s1179_s2 = inlined_call_operand.vmem [shape: f32[1,128], index: 2, kind: input, shape index: {}]   ;;  %s1180_s3 = inlined_call_operand.hbm [shape: f32[128,384], index: 3, kind: input, shape index: {}]   ;;  %s1181_s4 = inlined_call_operand.vmem [shape: f32[1,384], index: 4, kind: input, shape index: {}]   ;;  %s1182_s5 = inlined_call_operand.hbm [shape: f32[128,128], index: 5, kind: input, shape index: {}]   ;;  %s1183_s6 = inlined_call_operand.vmem [shape: f32[1,128], index: 6, kind: input, shape index: {}]   ;;  %s1184_s7 = inlined_call_operand.vmem [shape: f32[2,8,128], index: 7, kind: output, shape index: {}]  }
   0x1   :  { %13 = vsyncpa [#allocation5], 0  ;;  %s1069_s24 = smov 0  }
   0x2 LB: > { %s219_s27 = sshll.u32 %s1180_s3, 4  ;;  %s858_s28 = sadd.s32 4294967295, %s1017_s24   ;;  %s1017_s24 = sphi %s1069_s24, %s19_s24   ;;  %s220_s27 = int_to_ptr.hbm [resolvable:$true] %s219_s27 }
   0x3   : > { %p860_p0 = scmp.ge.s32.totalorder %s1017_s24, 1  ;;  %p202_p1 = scmp.lt.s32.totalorder %s1017_s24, 3 }
   0x4   : > { %p898_p2 = scmp.eq.s32.totalorder %s858_s28, 0  ;;  %s1019_s30 = smov [#allocation2]  }
   0x5   : > { %p1080_p3 = pnand %p860_p0, %p202_p1  ;;  %s221_s8 = sshll.u32 %s1019_s30, 4  ;;  %s222_s8 = int_to_ptr.vmem [resolvable:$true] %s221_s8 }
   0x6   : > { %s236_s11 = sshll.u32 %s1182_s5, 4  ;;  %s1020_s12 = smov [#allocation4]   ;;  %s237_s11 = int_to_ptr.hbm [resolvable:$true] %s236_s11 }
   0x7   : > { %p891_p4 = pneg %p1080_p3  ;;  %s238_s13 = sshll.u32 %s1020_s12, 4  ;;  %s239_s13 = int_to_ptr.vmem [resolvable:$true] %s238_s13 }
   0x8   : > { %s1021_s14 = smov 384   ;;  %s1022_s15 = smov 24  }
   0x9   : > { %p892_p5 = pnand %p898_p2, %p891_p4  ;;  %s1023_s16 = smov 128  }
   0xa   : > { %s1024_s17 = smov 8   ;;  %264 = sbr.rel (%p1080_p3) target bundleno = 1699 (0x6a3), region = 48 }
   0xb   : > { %894 = dma.hbm_to_vmem [thread:$0]  (!%p892_p5), %s220_s27, 6144, %s222_s8, [#allocation3], %s1021_s14, %s1021_s14, %s1022_s15  }
   0xc   : > { %897 = dma.hbm_to_vmem [thread:$0]  (!%p892_p5), %s237_s11, 2048, %s239_s13, [#allocation5], %s1023_s16, %s1023_s16, %s1024_s17  }
   0xf   : > { %1008 = dma.done.wait (%p898_p2), [#allocation3], 6144  }
  0x10   : > { %1010 = vsyncadd (%p898_p2), [#allocation3], 4294961152 }
  0x11   : > { %1012 = dma.done.wait (%p898_p2), [#allocation5], 2048  }
  0x12   : > { %1014 = vsyncadd (%p898_p2), [#allocation5], 4294965248  ;;  %p300_p6 = scmp.lt.s32.totalorder %s858_s28, 1  ;;  %v1025_v1 = vmov 128.0   ;;  %v391_v2 = vld [vmem:[#allocation2 + $0x168] sm:$0xff]  ;;  %v392_v3 = vld [vmem:[#allocation2 + $0x170] sm:$0xff] }
  0x13   : > { %923 = vrcp.f32 %v1025_v1  ;;  %v393_v4 = vld [vmem:[#allocation2 + $0x178] sm:$0xff]  ;;  %402 = vmatpush.msra.mxu0 %v391_v2  ;;  %422 = vmatpush.msra.mxu1 %v392_v3  ;;  %v388_v5 = vld [vmem:[#allocation2 + $0x150] sm:$0xff]  ;;  %v390_v7 = vld [vmem:[#allocation2 + $0x160] sm:$0xff]  ;;  %vm462_vm4 = vcmask 261120   ;;  %s1026_s30 = smov 96   ;;  %s1027_s8 = smov 64  }
  0x14   : > { %s1187_s28 = smov (!%p300_p6, %s858_s28), 1  ;;  %v389_v6 = vld [vmem:[#allocation2 + $0x158] sm:$0xff]  ;;  %442 = vmatpush.msra.mxu2 %v393_v4  ;;  %v386_v19 = vld [vmem:[#allocation2 + $0x140] sm:$0xff]  ;;  %v387_v20 = vld [vmem:[#allocation2 + $0x148] sm:$0xff]  ;;  %s1028_s9 = smov 32   ;;  %vm490_vm5 = vcmask 64512  }
  0x15   : > { %s867_s18 = sshll.u32 %s1187_s28, 3  ;;  %403 = vmatpush.msra.mxu0 %v388_v5  ;;  %423 = vmatpush.msra.mxu1 %v389_v6  ;;  %v385_v18 = vld [vmem:[#allocation2 + $0x138] sm:$0xff]  ;;  %v382_v21 = vld [vmem:[#allocation2 + $0x120] sm:$0xff]  ;;  %v383_v22 = vld [vmem:[#allocation2 + $0x128] sm:$0xff]  ;;  %vm737_vm6 = vcmask 523264   ;;  %vm739_vm7 = vcmask 785408  }
  0x16   : > { %s303_s21 = scalar_lea.vmem %s1177_s0, %s867_s18  ;;  %443 = vmatpush.msra.mxu2 %v390_v7  ;;  %v384_v23 = vld [vmem:[#allocation2 + $0x130] sm:$0xff]  ;;  %v379_v24 = vld [vmem:[#allocation2 + $0x108] sm:$0xff]  ;;  %v381_v26 = vld [vmem:[#allocation2 + $0x118] sm:$0xff]  ;;  %s307_s14 = scalar_lea.vmem %s1184_s7, %s867_s18 }
  0x17   : > { %v1104_v0 = vld [vmem:[%s303_s21] sm:$0xff]  ;;  %404 = vmatpush.msra.mxu0 %v385_v18  ;;  %424 = vmatpush.msra.mxu1 %v386_v19  ;;  %v380_v25 = vld [vmem:[#allocation2 + $0x110] sm:$0xff]  ;;  %v377_v28 = vld [vmem:[#allocation2 + $0xf8] sm:$0xff] }
  0x18   : > { %311 = vadd.xlane.f32.xlu0 %v1104_v0  ;;  %444 = vmatpush.msra.mxu2 %v387_v20  ;;  %v376_v27 = vld [vmem:[#allocation2 + $0xf0] sm:$0xff]  ;;  %v378_v29 = vld [vmem:[#allocation2 + $0x100] sm:$0xff]  ;;  %v373_v30 = vld [vmem:[#allocation2 + $0xd8] sm:$0xff] }
  0x19   : > { %v924_v8 = vpop.eup %923  ;;  %405 = vmatpush.msra.mxu0 %v382_v21  ;;  %425 = vmatpush.msra.mxu1 %v383_v22  ;;  %v374_v31 = vld [vmem:[#allocation2 + $0xe0] sm:$0xff]  ;;  %v375_v32 = vld [vmem:[#allocation2 + $0xe8] sm:$0xff]  ;;  %v372_v35 = vld [vmem:[#allocation2 + $0xd0] sm:$0xff] }
  0x1a   : > { %v314_v9 = vmul.f32 128.0, %v924_v8  ;;  %vm318_vm0 = vweird.f32 %v924_v8  ;;  %445 = vmatpush.msra.mxu2 %v384_v23  ;;  %v370_v33 = vld [vmem:[#allocation2 + $0xc0] sm:$0xff]  ;;  %v371_v34 = vld [vmem:[#allocation2 + $0xc8] sm:$0xff]  ;;  %v368_v37 = vld [vmem:[#allocation2 + $0xb0] sm:$0xff] }
  0x1b   : > { %406 = vmatpush.msra.mxu0 %v379_v24  ;;  %426 = vmatpush.msra.mxu1 %v380_v25  ;;  %v367_v36 = vld [vmem:[#allocation2 + $0xa8] sm:$0xff]  ;;  %v369_v38 = vld [vmem:[#allocation2 + $0xb8] sm:$0xff]  ;;  %v364_v39 = vld [vmem:[#allocation2 + $0x90] sm:$0xff] }
  0x1c   : > { %v315_v10 = vsub.f32 1.0, %v314_v9  ;;  %446 = vmatpush.msra.mxu2 %v381_v26  ;;  %v365_v40 = vld [vmem:[#allocation2 + $0x98] sm:$0xff]  ;;  %v366_v41 = vld [vmem:[#allocation2 + $0xa0] sm:$0xff]  ;;  %v363_v44 = vld [vmem:[#allocation2 + $0x88] sm:$0xff] }
  0x1d   : > { %407 = vmatpush.msra.mxu0 %v376_v27  ;;  %427 = vmatpush.msra.mxu1 %v377_v28  ;;  %v361_v42 = vld [vmem:[#allocation2 + $0x78] sm:$0xff]  ;;  %v362_v43 = vld [vmem:[#allocation2 + $0x80] sm:$0xff]  ;;  %v359_v46 = vld [vmem:[#allocation2 + $0x68] sm:$0xff] }
  0x1e   : > { %v316_v11 = vmul.f32 %v924_v8, %v315_v10  ;;  %447 = vmatpush.msra.mxu2 %v378_v29  ;;  %v358_v45 = vld [vmem:[#allocation2 + $0x60] sm:$0xff]  ;;  %v360_v47 = vld [vmem:[#allocation2 + $0x70] sm:$0xff]  ;;  %v355_v48 = vld [vmem:[#allocation2 + $0x48] sm:$0xff] }
  0x1f   : > { %408 = vmatpush.msra.mxu0 %v373_v30  ;;  %428 = vmatpush.msra.mxu1 %v374_v31  ;;  %v356_v49 = vld [vmem:[#allocation2 + $0x50] sm:$0xff]  ;;  %v357_v50 = vld [vmem:[#allocation2 + $0x58] sm:$0xff]  ;;  %v354_v53 = vld [vmem:[#allocation2 + $0x40] sm:$0xff] }
  0x20   : > { %v317_v12 = vadd.f32 %v924_v8, %v316_v11  ;;  %448 = vmatpush.msra.mxu2 %v375_v32  ;;  %v352_v51 = vld [vmem:[#allocation2 + $0x30] sm:$0xff]  ;;  %v353_v52 = vld [vmem:[#allocation2 + $0x38] sm:$0xff]  ;;  %v350_v55 = vld [vmem:[#allocation2 + $0x20] sm:$0xff] }
  0x21   : > { %409 = vmatpush.msra.mxu0 %v370_v33  ;;  %429 = vmatpush.msra.mxu1 %v371_v34  ;;  %v349_v54 = vld [vmem:[#allocation2 + $0x18] sm:$0xff]  ;;  %v351_v56 = vld [vmem:[#allocation2 + $0x28] sm:$0xff]  ;;  %v346_v57 = vld [vmem:[#allocation2] sm:$0xff] }
  0x22   : > { %v1107_v13 = vsel %vm318_vm0, %v924_v8, %v317_v12  ;;  %449 = vmatpush.msra.mxu2 %v372_v35  ;;  %v347_v58 = vld [vmem:[#allocation2 + $0x8] sm:$0xff]  ;;  %v348_v59 = vld [vmem:[#allocation2 + $0x10] sm:$0xff]  ;;  %v920_v6 = vld [vmem:[%s1178_s1] ss:$0 sm:$0xff] }
  0x23   : > { %410 = vmatpush.msra.mxu0 %v367_v36  ;;  %430 = vmatpush.msra.mxu1 %v368_v37  ;;  %v921_v9 = vld [vmem:[%s1179_s2] ss:$0 sm:$0xff] }
  0x24   : > { %450 = vmatpush.msra.mxu2 %v369_v38  ;;  %v394_v12 = vld [vmem:[%s1181_s4] sm:$0x7] }
  0x25   : > { %411 = vmatpush.msra.mxu0 %v364_v39  ;;  %431 = vmatpush.msra.mxu1 %v365_v40  ;;  %v398_v19 = vperm.slane %v394_v12, 2 }
  0x26   : > { %451 = vmatpush.msra.mxu2 %v366_v41 }
  0x27   : > { %412 = vmatpush.msra.mxu0 %v361_v42  ;;  %432 = vmatpush.msra.mxu1 %v362_v43 }
  0x28   : > { %452 = vmatpush.msra.mxu2 %v363_v44 }
  0x29   : > { %413 = vmatpush.msra.mxu0 %v358_v45  ;;  %433 = vmatpush.msra.mxu1 %v359_v46 }
  0x2a   : > { %453 = vmatpush.msra.mxu2 %v360_v47 }
  0x2b   : > { %414 = vmatpush.msra.mxu0 %v355_v48  ;;  %434 = vmatpush.msra.mxu1 %v356_v49 }
  0x2c   : > { %454 = vmatpush.msra.mxu2 %v357_v50 }
  0x2d   : > { %415 = vmatpush.msra.mxu0 %v352_v51  ;;  %435 = vmatpush.msra.mxu1 %v353_v52 }
  0x2e   : > { %455 = vmatpush.msra.mxu2 %v354_v53 }
  0x2f   : > { %416 = vmatpush.msra.mxu0 %v349_v54  ;;  %436 = vmatpush.msra.mxu1 %v350_v55 }
  0x30   : > { %456 = vmatpush.msra.mxu2 %v351_v56 }
  0x31   : > { %417 = vmatpush.msra.mxu0 %v346_v57  ;;  %437 = vmatpush.msra.mxu1 %v347_v58 }
  0x32   : > { %457 = vmatpush.msra.mxu2 %v348_v59 }
  0x8b   : > { %v312_v14 = vpop.xlane.xlu0 %311 }
  0x8c   : > { %v320_v15 = vmul.f32 %v1107_v13, %v312_v14  ;;  %v396_v14 = vperm.slane %v394_v12, 0 }
  0x8e   : > { %v1111_v16 = vsub.f32 %v1104_v0, %v320_v15 }
  0x90   : > { %v322_v17 = vmul.f32 %v1111_v16, %v1111_v16 }
  0x92   : > { %323 = vadd.xlane.f32.xlu0 %v322_v17 }
 0x105   : > { %v324_v60 = vpop.xlane.xlu0 %323 }
 0x106   : > { %v325_v61 = vmul.f32 %v324_v60, %v1107_v13  ;;  %v397_v13 = vperm.slane %v394_v12, 1 }
 0x108   : > { %v326_v62 = vadd.f32 1e-05, %v325_v61 }
 0x10a   : > { %925 = vrsqrt.f32 %v326_v62  ;;  %vm333_vm2 = vweird.f32 %v326_v62 }
 0x110   : > { %v926_v63 = vpop.eup %925 }
 0x111   : > { %v328_v1 = vmul.f32 %v926_v63, %v326_v62  ;;  %vm334_vm1 = vweird.f32 %v926_v63 }
 0x112   : > { %vm335_vm3 = vmor %vm333_vm2, %vm334_vm1 }
 0x113   : > { %v329_v2 = vmul.f32 %v926_v63, %v328_v1 }
 0x115   : > { %v330_v3 = vmul.f32 0.5, %v329_v2 }
 0x117   : > { %v331_v4 = vsub.f32 1.5, %v330_v3 }
 0x119   : > { %v332_v5 = vmul.f32 %v926_v63, %v331_v4 }
 0x11b   : > { %v336_v7 = vsel %vm335_vm3, %v926_v63, %v332_v5 }
 0x11c   : > { %v337_v8 = vmul.f32 %v336_v7, %v1111_v16 }
 0x11e   : > { %v341_v10 = vmul.f32 %v920_v6, %v337_v8 }
 0x120   : > { %v345_v11 = vadd.f32 %v921_v9, %v341_v10 }
 0x122   : > { %418 = vmatmul.f32.vlgmr.msra.gmra.mxu0 %v345_v11  ;;  %438 = vmatmul.f32.vlgmr.msra.gmra.mxu1 %v345_v11 }
 0x123   : > { %458 = vmatmul.f32.vlgmr.msra.gmra.mxu2 %v345_v11 }
 0x19f   : > { %v439_v15 = vpop.f32.mrf.mxu1  ;;  %v419_v17 = vpop.f32.mrf.mxu0 }
 0x1a0   : > { %v440_v18 = vadd.f32 %v439_v15, %v397_v13  ;;  %v420_v16 = vadd.f32 %v419_v17, %v396_v14  ;;  %v756_v17 = vld [vmem:[#allocation4 + $0x78] sm:$0xff] }
 0x1a2   : > { %527 = vrot.lane.b32.xlu1 %v440_v18, %s1026_s30  ;;  %869 = vmatpush.xpose.msk.msrb.mxu0 %vm462_vm4, %v440_v18 }
 0x1a5   : > { %870 = vmatmul.msk.f32.vlgmr.msrb.gmra.mxu0 %vm462_vm4, %v420_v16 }
 0x1a6   : > { %v459_v20 = vpop.f32.mrf.mxu2 }
 0x1a7   : > { %v1129_v21 = vadd.f32 %v459_v20, %v398_v19  ;;  %v753_v19 = vld [vmem:[#allocation4 + $0x60] sm:$0xff]  ;;  %v752_v20 = vld [vmem:[#allocation4 + $0x58] sm:$0xff] }
 0x1a9   : > { %566 = vrot.lane.b32.xlu0 %v1129_v21, %s1026_s30  ;;  %520 = vmatpush.msrb.mxu2 %v1129_v21 }
 0x1aa   : > { %525 = vrot.lane.b32.xlu1 %v420_v16, %s1026_s30 }
 0x1b2   : > { %594 = vrot.lane.b32.xlu1 %v440_v18, %s1027_s8 }
 0x1ba   : > { %592 = vrot.lane.b32.xlu1 %v420_v16, %s1027_s8 }
 0x1c2   : > { %658 = vrot.lane.b32.xlu1 %v420_v16, %s1028_s9  ;;  %v754_v16 = vld [vmem:[#allocation4 + $0x68] sm:$0xff] }
 0x214   : > { %v528_v22 = vpop.permute.xlu1 %527 }
 0x215   : > { %872 = vmatpush.xpose.msk.msrb.mxu1 %vm462_vm4, %v528_v22  ;;  %v750_v22 = vld [vmem:[#allocation4 + $0x48] sm:$0xff] }
 0x21b   : > { %v567_v23 = vpop.permute.xlu0 %566 }
 0x21c   : > { %587 = vmatpush.msra.mxu3 %v567_v23  ;;  %v526_v24 = vpop.permute.xlu1 %525  ;;  %v749_v23 = vld [vmem:[#allocation4 + $0x40] sm:$0xff] }
 0x21d   : > { %873 = vmatmul.msk.f32.vlgmr.msrb.gmra.mxu1 %vm462_vm4, %v526_v24  ;;  %v748_v24 = vld [vmem:[#allocation4 + $0x38] sm:$0xff] }
 0x222   : > { %v486_v25 = vpop.f32.mrf.mxu0 }
 0x223   : > { %v489_v26 = vmul.f32 0.17677669, %v486_v25  ;;  %v747_v25 = vld [vmem:[#allocation4 + $0x30] sm:$0xff] }
 0x224   : > { %v595_v27 = vpop.permute.xlu1 %594 }
 0x225   : > { %875 = vmatpush.xpose.msk.msrb.mxu3 %vm462_vm4, %v595_v27  ;;  %v491_v28 = vsel %vm490_vm5, %v489_v26, -inf  ;;  %v745_v27 = vld [vmem:[#allocation4 + $0x20] sm:$0xff] }
 0x226   : > { %492 = vmax.xlane.f32.xlu0 %v491_v28  ;;  %v744_v28 = vld [vmem:[#allocation4 + $0x18] sm:$0xff] }
 0x22c   : > { %v593_v47 = vpop.permute.xlu1 %592 }
 0x234   : > { %v659_v51 = vpop.permute.xlu1 %658 }
 0x299   : > { %v493_v29 = vpop.xlane.xlu0 %492 }
 0x29a   : > { %v494_v30 = vsub.f32 %v489_v26, %v493_v29  ;;  %v550_v31 = vpop.f32.mrf.mxu1  ;;  %v746_v26 = vld [vmem:[#allocation4 + $0x28] sm:$0xff]  ;;  %v743_v29 = vld [vmem:[#allocation4 + $0x10] sm:$0xff] }
 0x29b   : > { %v553_v32 = vmul.f32 0.17677669, %v550_v31  ;;  %v741_v31 = vld [vmem:[#allocation4] sm:$0xff] }
 0x29c   : > { %v495_v33 = vmul.f32 1.442695, %v494_v30  ;;  %v742_v30 = vld [vmem:[#allocation4 + $0x8] sm:$0xff] }
 0x29d   : > { %v554_v34 = vsel %vm490_vm5, %v553_v32, -inf }
 0x29e   : > { %927 = vpow2.f32 %v495_v33  ;;  %555 = vmax.xlane.f32.xlu2 %v554_v34 }
 0x2a4   : > { %v928_v35 = vpop.eup %927 }
 0x2a5   : > { %v497_v36 = vsel %vm490_vm5, %v928_v35, 0.0 }
 0x2a6   : > { %498 = vadd.xlane.f32.xlu0 %v497_v36 }
 0x2ba   : > { %698 = vrot.lane.b32.xlu0 %v1129_v21, %s1028_s9 }
 0x311   : > { %v556_v37 = vpop.xlane.xlu2 %555 }
 0x312   : > { %v557_v38 = vsub.f32 %v553_v32, %v556_v37 }
 0x314   : > { %v558_v39 = vmul.f32 1.442695, %v557_v38  ;;  %v922_v38 = vld [vmem:[%s1183_s6] ss:$0 sm:$0xff] }
 0x316   : > { %929 = vpow2.f32 %v558_v39 }
 0x319   : > { %v499_v40 = vpop.xlane.xlu0 %498 }
 0x31a   : > { %931 = vrcp.f32 %v499_v40 }
 0x31c   : > { %v930_v41 = vpop.eup %929 }
 0x31d   : > { %v560_v42 = vsel %vm490_vm5, %v930_v41, 0.0 }
 0x31e   : > { %561 = vadd.xlane.f32.xlu2 %v560_v42 }
 0x320   : > { %v932_v43 = vpop.eup %931 }
 0x321   : > { %v501_v44 = vmul.f32 %v932_v43, %v928_v35 }
 0x323   : > { %871 = vmatmul.msk.f32.vlgmr.msrb.gmra.mxu2 %vm490_vm5, %v501_v44 }
 0x32c   : > { %v699_v45 = vpop.permute.xlu0 %698 }
 0x32d   : > { %719 = vmatpush.msra.mxu2 %v699_v45 }
 0x336   : > { %660 = vrot.lane.b32.xlu2 %v440_v18, %s1028_s9  ;;  %v755_v18 = vld [vmem:[#allocation4 + $0x70] sm:$0xff] }
 0x391   : > { %v562_v46 = vpop.xlane.xlu2 %561 }
 0x392   : > { %933 = vrcp.f32 %v562_v46 }
 0x398   : > { %v934_v48 = vpop.eup %933 }
 0x399   : > { %v661_v49 = vpop.permute.xlu2 %660  ;;  %v564_v50 = vmul.f32 %v934_v48, %v930_v41 }
 0x39a   : > { %878 = vmatpush.xpose.msk.msra.mxu1 %vm462_vm4, %v661_v49 }
 0x39b   : > { %874 = vmatmul.msk.f32.vlgmr.msra.gmra.mxu3 %vm490_vm5, %v564_v50 }
 0x39c   : > { %761 = vmatpush.msra.mxu3 %v756_v17 }
 0x39d   : > { %879 = vmatmul.msk.f32.vlgmr.msra.gmra.mxu1 %vm462_vm4, %v659_v51 }
 0x39e   : > { %762 = vmatpush.msra.mxu3 %v755_v18 }
 0x3a0   : > { %763 = vmatpush.msra.mxu3 %v754_v16 }
 0x3a2   : > { %764 = vmatpush.msra.mxu3 %v753_v19 }
 0x3a3   : > { %876 = vmatmul.msk.f32.vlgmr.msrb.gmra.mxu3 %vm462_vm4, %v593_v47 }
 0x3a4   : > { %765 = vmatpush.msra.mxu3 %v752_v20 }
 0x3a6   : > { %v522_v13 = vpop.f32.mrf.mxu2 }
 0x41a   : > { %v683_v52 = vpop.f32.mrf.mxu1 }
 0x41b   : > { %v686_v53 = vmul.f32 0.17677669, %v683_v52 }
 0x41d   : > { %v687_v54 = vsel %vm490_vm5, %v686_v53, -inf }
 0x41e   : > { %v589_v55 = vpop.f32.mrf.mxu3  ;;  %688 = vmax.xlane.f32.xlu1 %v687_v54 }
 0x426   : > { %v617_v56 = vpop.f32.mrf.mxu3 }
 0x427   : > { %v620_v57 = vmul.f32 0.17677669, %v617_v56 }
 0x429   : > { %v621_v58 = vsel %vm490_vm5, %v620_v57, -inf }
 0x42a   : > { %622 = vmax.xlane.f32.xlu2 %v621_v58 }
 0x491   : > { %v689_v59 = vpop.xlane.xlu1 %688 }
 0x492   : > { %v690_v60 = vsub.f32 %v686_v53, %v689_v59 }
 0x494   : > { %v691_v61 = vmul.f32 1.442695, %v690_v60 }
 0x496   : > { %935 = vpow2.f32 %v691_v61 }
 0x49c   : > { %v936_v62 = vpop.eup %935 }
 0x49d   : > { %v623_v63 = vpop.xlane.xlu2 %622  ;;  %v693_v1 = vsel %vm490_vm5, %v936_v62, 0.0 }
 0x49e   : > { %v624_v2 = vsub.f32 %v620_v57, %v623_v63  ;;  %694 = vadd.xlane.f32.xlu2 %v693_v1 }
 0x4a0   : > { %v625_v3 = vmul.f32 1.442695, %v624_v2 }
 0x4a2   : > { %937 = vpow2.f32 %v625_v3 }
 0x4a8   : > { %v938_v4 = vpop.eup %937 }
 0x4a9   : > { %v627_v5 = vsel %vm490_vm5, %v938_v4, 0.0 }
 0x4aa   : > { %628 = vadd.xlane.f32.xlu1 %v627_v5 }
 0x4b6   : > { %632 = vrot.lane.b32.xlu2 %v1129_v21, %s1027_s8  ;;  %v751_v21 = vld [vmem:[#allocation4 + $0x50] sm:$0xff] }
 0x4b7   : > { %766 = vmatpush.msra.mxu3 %v751_v21 }
 0x4b9   : > { %767 = vmatpush.msra.mxu3 %v750_v22 }
 0x4bb   : > { %768 = vmatpush.msra.mxu3 %v749_v23 }
 0x4bd   : > { %769 = vmatpush.msra.mxu3 %v748_v24 }
 0x4bf   : > { %770 = vmatpush.msra.mxu3 %v747_v25 }
 0x4c1   : > { %771 = vmatpush.msra.mxu3 %v746_v26 }
 0x4c3   : > { %725 = vrot.lane.b32.xlu1 %v589_v55, %s1028_s9  ;;  %772 = vmatpush.msra.mxu3 %v745_v27 }
 0x4c5   : > { %773 = vmatpush.msra.mxu3 %v744_v28 }
 0x4c7   : > { %774 = vmatpush.msra.mxu3 %v743_v29 }
 0x4c9   : > { %775 = vmatpush.msra.mxu3 %v742_v30 }
 0x4cb   : > { %776 = vmatpush.msra.mxu3 %v741_v31 }
 0x511   : > { %v695_v6 = vpop.xlane.xlu2 %694 }
 0x512   : > { %939 = vrcp.f32 %v695_v6 }
 0x518   : > { %v940_v7 = vpop.eup %939 }
 0x519   : > { %v697_v8 = vmul.f32 %v940_v7, %v936_v62  ;;  %v633_v9 = vpop.permute.xlu2 %632 }
 0x51a   : > { %653 = vmatpush.msra.mxu0 %v633_v9 }
 0x51b   : > { %880 = vmatmul.msk.f32.vlgmr.msra.gmra.mxu2 %vm490_vm5, %v697_v8 }
 0x51d   : > { %v629_v10 = vpop.xlane.xlu1 %628 }
 0x51e   : > { %941 = vrcp.f32 %v629_v10 }
 0x524   : > { %v942_v11 = vpop.eup %941 }
 0x525   : > { %v631_v12 = vmul.f32 %v942_v11, %v938_v4 }
 0x527   : > { %877 = vmatmul.msk.f32.vlgmr.msra.gmra.mxu0 %vm490_vm5, %v631_v12 }
 0x535   : > { %v726_v32 = vpop.permute.xlu1 %725 }
 0x536   : > { %v736_v33 = vsel %vm462_vm4, %v522_v13, %v726_v32 }
 0x59e   : > { %v721_v14 = vpop.f32.mrf.mxu2 }
 0x59f   : > { %733 = vrot.lane.b32.xlu2 %v721_v14, %s1026_s30 }
 0x5a4   : > { %v655_v15 = vpop.f32.mrf.mxu0 }
 0x5a5   : > { %729 = vrot.lane.b32.xlu0 %v655_v15, %s1027_s8 }
 0x5f9   : > { %v734_v35 = vpop.permute.xlu2 %733 }
 0x617   : > { %v730_v34 = vpop.permute.xlu0 %729 }
 0x618   : > { %v738_v36 = vsel %vm737_vm6, %v736_v33, %v730_v34 }
 0x619   : > { %v740_v37 = vsel %vm739_vm7, %v738_v36, %v734_v35 }
 0x61a   : > { %777 = vmatmul.f32.vlgmr.msra.gmra.mxu3 %v740_v37 }
 0x69d   : > { %v778_v39 = vpop.f32.mrf.mxu3 }
 0x69e   : > { %v779_v40 = vadd.f32 %v922_v38, %v778_v39 }
 0x6a0   : > { %v781_v41 = vadd.f32 %v779_v40, %v1104_v0 }
 0x6a2   : > { %782 = vst [vmem:[%s307_s14] sm:$0xff] %v781_v41 }
 0x6a3 PF: > { %s19_s24 = sadd.s32 1, %s1017_s24  }
 0x6a4   : > { %p16_p7 = scmp.ge.s32.totalorder %s19_s24, 4  }
 0x6a6   :  { %18 = sbr.rel (!%p16_p7) target bundleno = 2 (0x2), region = 87 }
 0x6ab   :  { %802 = vsyncpa [#allocation3], 1 }
 0x6ac   :  { %804 = vsyncpa [#allocation3 + $0x1], 1 }
 0x6ad   :  { %805 = vsyncpa [#allocation5], 1 }

// kernel: transformer_forward.9
= control target key start
LH: loop header
LB: loop body
LE: loop exit
PB: predicated region body
PF: predicated region fallthrough
CT: control target
= control target key end

     0   :  { %8 = vsyncpa [#allocation3], 0  ;;  %s512_s0 = inlined_call_operand.vmem [shape: f32[16,128], index: 0, kind: input, shape index: {}]   ;;  %s513_s1 = inlined_call_operand.vmem [shape: f32[1,128], index: 1, kind: input, shape index: {}]   ;;  %s514_s2 = inlined_call_operand.vmem [shape: f32[1,128], index: 2, kind: input, shape index: {}]   ;;  %s515_s3 = inlined_call_operand.hbm [shape: f32[16,128], index: 3, kind: output, shape index: {}]  }
   0x1   :  { %10 = vsyncpa [#allocation3 + $0x1], 0  ;;  %s421_s12 = smov 0   ;;  %s423_s13 = smov 0  }
   0x2   :  { %s425_s14 = smov 0   ;;  %s427_s15 = smov 0  }
   0x3 LB: > { %s442_s16 = sadd.s32 4294967295, %s398_s15   ;;  %s280_s17 = sadd.s32 4294967294, %s398_s15   ;;  %s398_s15 = sphi %s427_s15, %s521_s15   ;;  %s394_s14 = sphi %s425_s14, %s520_s14   ;;  %s390_s13 = sphi %s423_s13, %s519_s13   ;;  %s386_s12 = sphi %s421_s12, %s518_s12  }
   0x4   : > { %s446_s18 = sadd.s32 1, %s398_s15   ;;  %s91_s19 = sadd.s32 1, %s394_s14 }
   0x5   : > { %s88_s20 = ssub.s32 %s398_s15, %s446_s18  ;;  %p101_p0 = scmp.ne.s32.totalorder %s394_s14, %s390_s13 }
   0x6   : > { %p89_p1 = scmp.eq.s32.totalorder %s88_s20, 0  ;;  %p102_p2 = scmp.eq.s32.totalorder %s442_s16, 1 }
   0x7   : > { %p107_p3 = scmp.ne.s32.totalorder %s390_s13, %s386_s12  ;;  %p108_p4 = scmp.eq.s32.totalorder %s280_s17, 1 }
   0x8   : > { %s457_s21 = scalar_select %p89_p1, %s394_s14, %s91_s19  }
   0x9   : > { %p459_p5 = por %p102_p2, %p101_p0  ;;  %p463_p6 = por %p108_p4, %p107_p3 }
   0xa   : > { %p283_p7 = scmp.ge.s32.totalorder %s398_s15, 1  ;;  %p139_p8 = scmp.lt.s32.totalorder %s398_s15, 3 }
   0xc   : > { %p140_p9 = pnand %p283_p7, %p139_p8 }
   0xd   : > { %p162_p10 = scmp.lt.s32.totalorder (!%p140_p9), %s442_s16, 1  ;;  %s159_s29 = sand.u32 (!%p140_p9), 1, %s390_s13  }
   0xe   : > { %143 = sbr.rel (%p140_p9) target bundleno = 293 (0x125), region = 32  ;;  %s284_s30 = sshll.u32 (!%p140_p9), %s159_s29, 3 }
   0xf   : > { %s287_s4 = sshll.u32 (!%p140_p9), %s442_s16, 3  ;;  %s161_s17 = scalar_lea.vmem (!%p140_p9), [#allocation2], %s284_s30 }
  0x10   : > { %s216_s9 = scalar_lea.hbm (!%p140_p9), %s515_s3, %s287_s4  ;;  %s206_s20 = scalar_lea.sflag (!%p140_p9), [#allocation3], %s159_s29 }
  0x11   : > { %s220_s19 = sshll.u32 (!%p140_p9), %s216_s9, 4  ;;  %s221_s19 = int_to_ptr.hbm [resolvable:$true] %s220_s19 }
  0x13   : > { %s163_s24 = scalar_select %p162_p10, %s442_s16, 1  ;;  %v400_v1 = vmov 128.0   ;;  %v330_v21 = vld [vmem:[%s513_s1] ss:$0 sm:$0xff] }
  0x14   : > { %332 = vrcp.f32 %v400_v1  ;;  %v331_v24 = vld [vmem:[%s514_s2] ss:$0 sm:$0xff]  ;;  %s218_s16 = sshll.u32 %s161_s17, 4  ;;  %s219_s16 = int_to_ptr.vmem [resolvable:$true] %s218_s16 }
  0x15   : > { %s285_s25 = sshll.u32 %s163_s24, 3  ;;  %s350_s24 = sshra.s32 %s221_s19, 4  ;;  %s351_s24 = int_to_ptr.hbm [resolvable:$true] %s350_s24 }
  0x16   : > { %s165_s28 = scalar_lea.vmem %s512_s0, %s285_s25  ;;  %s352_s25 = scalar_lea.hbm %s351_s24, 8 }
  0x17   : > { %v166_v0 = vld [vmem:[%s165_s28] sm:$0xff]  ;;  %p353_p11 = scmp.ne.s32.totalorder %s351_s24, %s352_s25  ;;  %s356_s28 = scalar_lea.hbm %s515_s3, 16 }
  0x18   : > { %169 = vadd.xlane.f32.xlu0 %v166_v0  ;;  %p357_p0 = scmp.lt.s32.totalorder %s351_s24, %s515_s3  ;;  %p358_p1 = scmp.lt.s32.totalorder %s356_s28, %s352_s25 }
  0x19   : > { %p354_p12 = pnand %p353_p11, %p459_p5 }
  0x1a   : > { %v333_v2 = vpop.eup %332  ;;  %p359_p2 = por %p358_p1, %p357_p0 }
  0x1b   : > { %v172_v3 = vmul.f32 128.0, %v333_v2  ;;  %vm176_vm0 = vweird.f32 %v333_v2  ;;  %p355_p13 = pneg %p354_p12 }
  0x1d   : > { %v173_v4 = vsub.f32 1.0, %v172_v3  ;;  %p360_p3 = pnand %p359_p2, %p355_p13 }
  0x1f   : > { %v174_v5 = vmul.f32 %v333_v2, %v173_v4 }
  0x21   : > { %v175_v6 = vadd.f32 %v333_v2, %v174_v5 }
  0x23   : > { %v177_v7 = vsel %vm176_vm0, %v333_v2, %v175_v6 }
  0x8b   : > { %v170_v8 = vpop.xlane.xlu0 %169 }
  0x8c   : > { %v178_v9 = vmul.f32 %v177_v7, %v170_v8 }
  0x8e   : > { %v179_v10 = vsub.f32 %v166_v0, %v178_v9 }
  0x90   : > { %v180_v11 = vmul.f32 %v179_v10, %v179_v10 }
  0x92   : > { %181 = vadd.xlane.f32.xlu0 %v180_v11 }
 0x105   : > { %v182_v12 = vpop.xlane.xlu0 %181 }
 0x106   : > { %v183_v13 = vmul.f32 %v182_v12, %v177_v7 }
 0x108   : > { %v184_v14 = vadd.f32 1e-05, %v183_v13 }
 0x10a   : > { %334 = vrsqrt.f32 %v184_v14  ;;  %vm191_vm2 = vweird.f32 %v184_v14 }
 0x110   : > { %v335_v15 = vpop.eup %334 }
 0x111   : > { %v186_v16 = vmul.f32 %v335_v15, %v184_v14  ;;  %vm192_vm1 = vweird.f32 %v335_v15 }
 0x112   : > { %vm193_vm3 = vmor %vm191_vm2, %vm192_vm1 }
 0x113   : > { %v187_v17 = vmul.f32 %v335_v15, %v186_v16 }
 0x115   : > { %v188_v18 = vmul.f32 0.5, %v187_v17 }
 0x117   : > { %v189_v19 = vsub.f32 1.5, %v188_v18 }
 0x119   : > { %v190_v20 = vmul.f32 %v335_v15, %v189_v19 }
 0x11b   : > { %v194_v22 = vsel %vm193_vm3, %v335_v15, %v190_v20 }
 0x11c   : > { %v195_v23 = vmul.f32 %v194_v22, %v179_v10 }
 0x11e   : > { %v199_v25 = vmul.f32 %v330_v21, %v195_v23 }
 0x120   : > { %v203_v26 = vadd.f32 %v331_v24, %v199_v25 }
 0x122   : > { %204 = vst [vmem:[%s161_s17] sm:$0xff] %v203_v26 }
 0x123   : > { %363 = shalt.err (!%p360_p3)
}
 0x124   : > { %290 = dma.vmem_to_hbm [thread:$0]  (%p459_p5), %s219_s16, 128, %s221_s19, %s206_s20  }
 0x125 PF: > { %p296_p4 = scmp.ge.s32.totalorder %s398_s15, 2  ;;  %s232_s29 = sand.u32 1, %s386_s12  }
 0x126   : > { %s233_s5 = scalar_lea.sflag [#allocation3], %s232_s29 }
 0x127   : > { %p293_p7 = pnand %p296_p4, %p463_p6 }
 0x129   : > { %p294_p8 = pneg %p293_p7 }
 0x12b   : > { %381 = dma.done.wait (%p294_p8), %s233_s5, 128  }
 0x12c   : > { %383 = vsyncadd (%p294_p8), %s233_s5, 4294967168  ;;  %p13_p9 = scmp.ge.s32.totalorder %s446_s18, 4   ;;  %s518_s12 = smov %s390_s13 }
 0x12d   : > { %s519_s13 = smov %s394_s14  ;;  %s520_s14 = smov %s457_s21 }
 0x12e   : > { %s521_s15 = smov %s446_s18  ;;  %15 = sbr.rel (!%p13_p9) target bundleno = 3 (0x3), region = 67 }
 0x133   :  { %239 = vsyncpa [#allocation3], 1 }
 0x134   :  { %241 = vsyncpa [#allocation3 + $0x1], 1 }

</bundles_post_ra>
